<compile_context>
chip_gen: v6e
topology: v6e:2x2x1
jax: 0.10.0
libtpu: 0.0.40
codegen_flags: <defaults>
</compile_context>

<pallas_src>
import functools

import jax
import jax.numpy as jnp
from jax.experimental import pallas as pl
from jax.experimental.pallas import tpu as pltpu

NUM_CASCADES = 12
SENS_CHANS = 8
CHANS = 18
NOISE_CHANS = 8


# ----------------------------------------------------------------------------
# spec / compiler-param helpers
# ----------------------------------------------------------------------------
def _vmem_limit_bytes():
    # ~half of physical VMEM (64 MiB on v5e/v6e, 32 MiB on v7x), capped at 96 MiB.
    try:
        cap = int(pltpu.get_tpu_info().vmem_capacity_bytes)
        return int(min(max(cap // 2, 32 * 1024 * 1024), 96 * 1024 * 1024))
    except Exception:
        return 32 * 1024 * 1024


_VMEM_LIMIT = _vmem_limit_bytes()


def _cparams(sems=None):
    if sems is None:
        return pltpu.CompilerParams(vmem_limit_bytes=_VMEM_LIMIT)
    return pltpu.CompilerParams(dimension_semantics=sems,
                                vmem_limit_bytes=_VMEM_LIMIT)


def _resident_spec(shape):
    """Whole-array block, resident across the (coil) grid."""
    nd = len(shape)
    return pl.BlockSpec(shape, lambda c: (0,) * nd)


_VMEM_WHOLE = pl.BlockSpec(memory_space=pltpu.MemorySpace.VMEM)
_SMEM_WHOLE = pl.BlockSpec(memory_space=pltpu.MemorySpace.SMEM)


# ----------------------------------------------------------------------------
# in-kernel 3x3 conv on lane-flattened images (tap-stacked MXU matmuls)
# ----------------------------------------------------------------------------
def _col_masks(H, W):
    """Host-side column edge masks: (2, H*W) f32, rows = [col>=1], [col<=W-2]."""
    col = jnp.tile(jnp.arange(W, dtype=jnp.int32), H)
    return jnp.stack([col >= 1, col <= W - 2], axis=0).astype(jnp.float32)


def _make_tap_masks(col_m, H, W):
    """Per-tap multiplicative edge masks ((1,N) f32 or None), built once per
    kernel invocation and shared by every conv layer / tap."""
    N = H * W
    idx = jax.lax.broadcasted_iota(jnp.int32, (1, N), 1)
    row_ok = {-1: (idx >= W).astype(jnp.float32),
              0: None,
              1: (idx < (H - 1) * W).astype(jnp.float32)}
    col_ok = {-1: col_m[0:1, :], 0: None, 1: col_m[1:2, :]}
    masks = []
    for k in range(9):
        oy, ox = k // 3 - 1, k % 3 - 1
        r, c = row_ok[oy], col_ok[ox]
        if r is None:
            masks.append(c)
        elif c is None:
            masks.append(r)
        else:
            masks.append(r * c)
    return masks


def _conv3x3(x, w_ref, b_ref, masks, *, H, W, relu):
    """3x3 'same' conv on lane-flattened images.

    x:      (Cin, N) float32, N = H*W
    w_ref:  (G, Cout, (9//G)*Cin) bfloat16 ref (G=1 full tap stack, G=3 row groups)
    b_ref:  (Cout, 1) float32 ref
    masks:  output of _make_tap_masks
    """
    N = H * W

    def tap(k):
        oy, ox = k // 3 - 1, k % 3 - 1
        off = oy * W + ox
        t = x if off == 0 else pltpu.roll(x, (-off) % N, 1)
        m = masks[k]
        return t if m is None else t * m

    G = w_ref.shape[0]
    tpg = 9 // G
    acc = None
    for g in range(G):
        stacked = jnp.concatenate(
            [tap(k) for k in range(g * tpg, (g + 1) * tpg)], axis=0
        ).astype(jnp.bfloat16)                              # (tpg*Cin, N)
        part = jnp.dot(w_ref[g], stacked, preferred_element_type=jnp.float32)
        acc = part if acc is None else acc + part
    acc = acc + b_ref[...]
    if relu:
        acc = jnp.maximum(acc, 0.0)
    return acc


def _prep_conv(w, b):
    """(Cout,Cin,3,3),(Cout,) -> (G,Cout,(9//G)*Cin) bf16 + (Cout,1) f32.

    K ordering matches the in-kernel tap stacking (K = tap*Cin + cin, taps in
    row-major stencil order).  Narrow layers (Cin<=2) are fully stacked; wide
    layers are grouped 3 taps (one row offset) per matmul to bound the stacked
    RHS footprint."""
    cout, cin = w.shape[0], w.shape[1]
    wm = jnp.transpose(w, (0, 2, 3, 1)).reshape(cout, 9 * cin)
    g = 1 if cin <= 2 else 3
    wg = jnp.transpose(wm.reshape(cout, g, (9 * cin) // g), (1, 0, 2))
    return wg.astype(jnp.bfloat16), b.reshape(cout, 1).astype(jnp.float32)


# ----------------------------------------------------------------------------
# Pallas kernels
# ----------------------------------------------------------------------------
def _sens_conv_kernel(x_ref, cm_ref, w1_ref, b1_ref, w2_ref, b2_ref, s_ref, *, H, W):
    # per-coil 2-layer conv of the sens model ("parallel" over coils)
    masks = _make_tap_masks(cm_ref[...], H, W)
    h = _conv3x3(x_ref[0], w1_ref, b1_ref, masks, H=H, W=W, relu=True)
    s_ref[0] = _conv3x3(h, w2_ref, b2_ref, masks, H=H, W=W, relu=False)


def _ssq_kernel(s_ref, ss_ref):
    # sum over coils of |S_c|^2 (reduction grid, resident output accumulator)
    c = pl.program_id(0)

    @pl.when(c == 0)
    def _():
        ss_ref[...] = jnp.zeros_like(ss_ref)

    s = s_ref[0]
    ss_ref[...] = ss_ref[...] + s[0:1, :] * s[0:1, :] + s[1:2, :] * s[1:2, :]


def _sens_norm_kernel(s_ref, ss_ref, o_ref):
    # divide each coil map by the RSS (tiny eps only to guard rsqrt(0))
    inv = jax.lax.rsqrt(ss_ref[...] + 1e-12)
    o_ref[0] = s_ref[0] * inv


def _reduce_kernel(x_ref, s_ref, o_ref):
    # coil combine: sum_c conj(S_c) * x_c   (reduction grid over coils)
    c = pl.program_id(0)

    @pl.when(c == 0)
    def _():
        o_ref[...] = jnp.zeros_like(o_ref)

    xr, xi = x_ref[0, 0:1, :], x_ref[0, 1:2, :]
    sr, si = s_ref[0, 0:1, :], s_ref[0, 1:2, :]
    o_ref[0:1, :] = o_ref[0:1, :] + (sr * xr + si * xi)
    o_ref[1:2, :] = o_ref[1:2, :] + (sr * xi - si * xr)


def _refine_kernel(x_ref, cm_ref, w1_ref, b1_ref, w2_ref, b2_ref, o_ref, *, H, W):
    # TODO(synk): per-cascade NormUnet(chans=18, pools=4) not specified in the
    # reference; simplified to conv(2->chans)+ReLU -> conv(chans->2).
    # TODO(synk): tile over H-rows (1-row halo) at realistic fastMRI sizes so
    # the (chans, N) intermediates stay well inside v7x's 64 MiB VMEM.
    masks = _make_tap_masks(cm_ref[...], H, W)
    h = _conv3x3(x_ref[...], w1_ref, b1_ref, masks, H=H, W=W, relu=True)
    o_ref[...] = _conv3x3(h, w2_ref, b2_ref, masks, H=H, W=W, relu=False)


def _expand_kernel(r_ref, s_ref, o_ref):
    # S_c * refined_image, per coil ("parallel")
    rr, ri = r_ref[0:1, :], r_ref[1:2, :]
    sr, si = s_ref[0, 0:1, :], s_ref[0, 1:2, :]
    o_ref[0, 0:1, :] = sr * rr - si * ri
    o_ref[0, 1:2, :] = sr * ri + si * rr


def _dc_kernel(k_ref, k0_ref, rk_ref, m_ref, dcw_ref, o_ref):
    # k <- k - dc_w * mask * (k - k0) - refinement_kspace   (in place)
    m = m_ref[...] * dcw_ref[0]
    o_ref[...] = k_ref[...] - m * (k_ref[...] - k0_ref[...]) - rk_ref[...]


def _rss_kernel(x_ref, o_ref):
    # root-sum-of-squares coil combine (reduction grid over coils)
    c = pl.program_id(0)

    @pl.when(c == 0)
    def _():
        o_ref[...] = jnp.zeros_like(o_ref)

    x = x_ref[0]
    o_ref[...] = o_ref[...] + x[0:1, :] * x[0:1, :] + x[1:2, :] * x[1:2, :]

    @pl.when(c == pl.num_programs(0) - 1)
    def _():
        o_ref[...] = jnp.sqrt(o_ref[...])


def _noise_kernel(x_ref, cm_ref, w1_ref, b1_ref, w2_ref, b2_ref, w3_ref, b3_ref,
                  o_ref, *, H, W):
    # TODO(synk): Noise_Est definition not provided; implemented as a fused
    # 3-layer CNN.  TODO(synk): tile over H-rows / grid the batch axis at
    # realistic sizes instead of one whole-frame call.
    masks = _make_tap_masks(cm_ref[...], H, W)
    h = _conv3x3(x_ref[...], w1_ref, b1_ref, masks, H=H, W=W, relu=True)
    h = _conv3x3(h, w2_ref, b2_ref, masks, H=H, W=W, relu=True)
    o_ref[...] = _conv3x3(h, w3_ref, b3_ref, masks, H=H, W=W, relu=False)


# ----------------------------------------------------------------------------
# fastMRI-style centered FFTs + packing glue (plain JAX)
# ----------------------------------------------------------------------------
def fft2c(x):
    return jnp.fft.fftshift(
        jnp.fft.fft2(jnp.fft.ifftshift(x, axes=(-2, -1)), norm="ortho"),
        axes=(-2, -1))


def ifft2c(x):
    return jnp.fft.fftshift(
        jnp.fft.ifft2(jnp.fft.ifftshift(x, axes=(-2, -1)), norm="ortho"),
        axes=(-2, -1))


def _to_packed_image(x_c, C, N):
    """(C,H,W) complex -> (C, 2, H*W) float32 (real/imag packed on sublanes)."""
    return jnp.stack([jnp.real(x_c), jnp.imag(x_c)],
                     axis=1).astype(jnp.float32).reshape(C, 2, N)


# ----------------------------------------------------------------------------
# Model forward
# ----------------------------------------------------------------------------
def _sens_maps(params, k0_c, col_m):
    # TODO(synk): VarNet SensitivityModel U-Net (sens_chans=8, sens_pools=4) is
    # simplified to a fused per-coil 2-layer conv net + RSS normalization.
    C, H, W = k0_c.shape
    N = H * W
    x = _to_packed_image(ifft2c(k0_c), C, N)
    w1, b1 = _prep_conv(params["sens_w1"], params["sens_b1"])
    w2, b2 = _prep_conv(params["sens_w2"], params["sens_b2"])

    coil = pl.BlockSpec((1, 2, N), lambda c: (c, 0, 0))
    row = pl.BlockSpec((1, N), lambda c: (0, 0))
    cm_spec = pl.BlockSpec((2, N), lambda c: (0, 0))

    s_raw = pl.pallas_call(
        functools.partial(_sens_conv_kernel, H=H, W=W),
        grid=(C,),
        in_specs=[coil, cm_spec, _resident_spec(w1.shape), _resident_spec(b1.shape),
                  _resident_spec(w2.shape), _resident_spec(b2.shape)],
        out_specs=coil,
        out_shape=jax.ShapeDtypeStruct((C, 2, N), jnp.float32),
        compiler_params=_cparams(("parallel",)),
    )(x, col_m, w1, b1, w2, b2)

    ss = pl.pallas_call(
        _ssq_kernel,
        grid=(C,),
        in_specs=[coil],
        out_specs=row,
        out_shape=jax.ShapeDtypeStruct((1, N), jnp.float32),
        compiler_params=_cparams(("arbitrary",)),
    )(s_raw)

    s = pl.pallas_call(
        _sens_norm_kernel,
        grid=(C,),
        in_specs=[coil, row],
        out_specs=coil,
        out_shape=jax.ShapeDtypeStruct((C, 2, N), jnp.float32),
        input_output_aliases={0: 0},
        compiler_params=_cparams(("parallel",)),
    )(s_raw, ss)
    return s


def varnet_forward(params, k0_c, mask_w):
    """k0_c: complex64 (C,H,W) masked k-space; mask_w: float32 (W,). -> (H,W)."""
    C, H, W = k0_c.shape
    N = H * W

    col_m = _col_masks(H, W)
    s = _sens_maps(params, k0_c, col_m)

    k0 = jnp.stack([jnp.real(k0_c), jnp.imag(k0_c)], axis=1).astype(jnp.float32)
    mask_row = mask_w.reshape(1, 1, 1, W).astype(jnp.float32)

    coil = pl.BlockSpec((1, 2, N), lambda c: (c, 0, 0))
    img2 = pl.BlockSpec((2, N), lambda c: (0, 0))
    kspc = pl.BlockSpec((1, 2, H, W), lambda c: (c, 0, 0, 0))
    mspec = pl.BlockSpec((1, 1, 1, W), lambda c: (0, 0, 0, 0))

    k = k0
    for t in range(NUM_CASCADES):
        p = params["cascades"][t]
        w1, b1 = _prep_conv(p["w1"], p["b1"])
        w2, b2 = _prep_conv(p["w2"], p["b2"])
        dcw = p["dc_weight"].reshape(1).astype(jnp.float32)

        x = _to_packed_image(ifft2c(k[:, 0] + 1j * k[:, 1]), C, N)

        # coil combine (reduction over coils)
        comb = pl.pallas_call(
            _reduce_kernel,
            grid=(C,),
            in_specs=[coil, coil],
            out_specs=img2,
            out_shape=jax.ShapeDtypeStruct((2, N), jnp.float32),
            compiler_params=_cparams(("arbitrary",)),
        )(x, s)

        # refinement convs (split out of the reduction grid)
        refined = pl.pallas_call(
            functools.partial(_refine_kernel, H=H, W=W),
            in_specs=[_VMEM_WHOLE] * 6,
            out_specs=_VMEM_WHOLE,
            out_shape=jax.ShapeDtypeStruct((2, N), jnp.float32),
            compiler_params=_cparams(),
        )(comb, col_m, w1, b1, w2, b2)

        # sens expand (parallel over coils)
        exp = pl.pallas_call(
            _expand_kernel,
            grid=(C,),
            in_specs=[img2, coil],
            out_specs=coil,
            out_shape=jax.ShapeDtypeStruct((C, 2, N), jnp.float32),
            compiler_params=_cparams(("parallel",)),
        )(refined, s)

        exp4 = exp.reshape(C, 2, H, W)
        rk_c = fft2c(exp4[:, 0] + 1j * exp4[:, 1])
        rk = jnp.stack([jnp.real(rk_c), jnp.imag(rk_c)], axis=1).astype(jnp.float32)

        # data consistency, in place, dc_weight applied in-kernel from SMEM
        k = pl.pallas_call(
            _dc_kernel,
            grid=(C,),
            in_specs=[kspc, kspc, kspc, mspec, _SMEM_WHOLE],
            out_specs=kspc,
            out_shape=jax.ShapeDtypeStruct((C, 2, H, W), jnp.float32),
            input_output_aliases={0: 0} if t > 0 else {},
            compiler_params=_cparams(("parallel",)),
        )(k, k0, rk, mask_row, dcw)

    final = _to_packed_image(ifft2c(k[:, 0] + 1j * k[:, 1]), C, N)
    rss = pl.pallas_call(
        _rss_kernel,
        grid=(C,),
        in_specs=[coil],
        out_specs=pl.BlockSpec((1, N), lambda c: (0, 0)),
        out_shape=jax.ShapeDtypeStruct((1, N), jnp.float32),
        compiler_params=_cparams(("arbitrary",)),
    )(final)
    return rss.reshape(H, W)


def noise_est_forward(params, x):
    """x: (n, Cin, H, W) -> (n, 1, H, W).  Fused 3-layer CNN per batch element."""
    n, cin, H, W = x.shape
    N = H * W
    col_m = _col_masks(H, W)
    w1, b1 = _prep_conv(params["n_w1"], params["n_b1"])
    w2, b2 = _prep_conv(params["n_w2"], params["n_b2"])
    w3, b3 = _prep_conv(params["n_w3"], params["n_b3"])
    outs = []
    for i in range(n):
        xf = x[i].reshape(cin, N).astype(jnp.float32)
        o = pl.pallas_call(
            functools.partial(_noise_kernel, H=H, W=W),
            in_specs=[_VMEM_WHOLE] * 8,
            out_specs=_VMEM_WHOLE,
            out_shape=jax.ShapeDtypeStruct((1, N), jnp.float32),
            compiler_params=_cparams(),
        )(xf, col_m, w1, b1, w2, b2, w3, b3)
        outs.append(o.reshape(1, H, W))
    return jnp.stack(outs, axis=0)


def varnoise_forward(params, masked_kspace, mask):
    """masked_kspace: (B,C,H,W,2) float32; mask: (B,1,1,W,1). -> (1, H, W)."""
    B, C, H, W, _ = masked_kspace.shape
    imgs = []
    for b in range(B):
        k0 = masked_kspace[b, ..., 0] + 1j * masked_kspace[b, ..., 1]
        mw = mask[b, 0, 0, :, 0].astype(jnp.float32)
        imgs.append(varnet_forward(params, k0, mw))
    x = jnp.stack(imgs, axis=0)        # VarNet output (B, H, W)
    x = x[None]                        # unsqueeze(dim=0) -> (1, B, H, W)
    x = noise_est_forward(params, x)   # Noise_Est (in_channels == B, so B must be 1)
    return x[0]                        # squeeze(dim=0) -> (1, H, W)


# ----------------------------------------------------------------------------
# Deterministic parameter init
# ----------------------------------------------------------------------------
def init_params(key, num_cascades=NUM_CASCADES, sens_chans=SENS_CHANS,
                chans=CHANS, noise_chans=NOISE_CHANS, batch=1):
    def conv_init(k, cout, cin):
        kw, kb = jax.random.split(k)
        w = jax.random.normal(kw, (cout, cin, 3, 3), jnp.float32) / jnp.sqrt(cin * 9.0)
        b = 0.01 * jax.random.normal(kb, (cout,), jnp.float32)
        return w, b

    n_keys = 2 + 2 * num_cascades + 3
    keys = jax.random.split(key, n_keys)
    ki = iter(range(n_keys))

    params = {}
    params["sens_w1"], params["sens_b1"] = conv_init(keys[next(ki)], sens_chans, 2)
    params["sens_w2"], params["sens_b2"] = conv_init(keys[next(ki)], 2, sens_chans)

    cascades = []
    for _ in range(num_cascades):
        w1, b1 = conv_init(keys[next(ki)], chans, 2)
        w2, b2 = conv_init(keys[next(ki)], 2, chans)
        cascades.append({"w1": w1, "b1": b1, "w2": w2, "b2": b2,
                         "dc_weight": jnp.ones((1,), jnp.float32)})
    params["cascades"] = cascades

    params["n_w1"], params["n_b1"] = conv_init(keys[next(ki)], noise_chans, batch)
    params["n_w2"], params["n_b2"] = conv_init(keys[next(ki)], noise_chans, noise_chans)
    params["n_w3"], params["n_b3"] = conv_init(keys[next(ki)], 1, noise_chans)
    return params


# ----------------------------------------------------------------------------
if __name__ == "__main__":
    key = jax.random.PRNGKey(0)
    kp, kk = jax.random.split(key)

    B, C, H, W = 1, 4, 16, 16
    params = init_params(kp, batch=B)

    # deterministic undersampling mask along W with a fully-sampled center band
    cols = jnp.arange(W)
    mask_1d = ((cols % 2 == 0) |
               ((cols >= W // 2 - 2) & (cols < W // 2 + 2))).astype(jnp.float32)
    mask = jnp.broadcast_to(mask_1d[None, None, None, :, None], (B, 1, 1, W, 1))

    kspace = jax.random.normal(kk, (B, C, H, W, 2), jnp.float32)
    masked_kspace = kspace * mask

    out = jax.jit(varnoise_forward)(params, masked_kspace, mask)
    out = jax.block_until_ready(out)
    assert out.shape == (1, H, W) and out.dtype == jnp.float32
    print("KERNEL_OK")
</pallas_src>

<mosaic_0001>
module attributes {stable_mosaic.version = 11 : i64} {
  func.func @_sens_conv_kernel(%arg0: i32, %arg1: memref<1x2x256xf32, #tpu.memory_space<vmem>>, %arg2: memref<2x256xf32, #tpu.memory_space<vmem>>, %arg3: memref<1x8x18xbf16, #tpu.memory_space<vmem>>, %arg4: memref<8x1xf32, #tpu.memory_space<vmem>>, %arg5: memref<3x2x24xbf16, #tpu.memory_space<vmem>>, %arg6: memref<2x1xf32, #tpu.memory_space<vmem>>, %arg7: memref<1x2x256xf32, #tpu.memory_space<vmem>>) attributes {dimension_semantics = [#tpu.dimension_semantics<parallel>], iteration_bounds = array<i64: 4>, scalar_prefetch = 0 : i64, scratch_operands = 0 : i64, tpu.core_type = #tpu.core_type<tc>, window_params = [{transform_indices = @transform_0, window_bounds = array<i64: 1, 2, 256>}, {pipeline_mode = #tpu.pipeline_mode<synchronous>, transform_indices = @transform_1, window_bounds = array<i64: 2, 256>}, {pipeline_mode = #tpu.pipeline_mode<synchronous>, transform_indices = @transform_2, window_bounds = array<i64: 1, 8, 18>}, {pipeline_mode = #tpu.pipeline_mode<synchronous>, transform_indices = @transform_3, window_bounds = array<i64: 8, 1>}, {pipeline_mode = #tpu.pipeline_mode<synchronous>, transform_indices = @transform_4, window_bounds = array<i64: 3, 2, 24>}, {pipeline_mode = #tpu.pipeline_mode<synchronous>, transform_indices = @transform_5, window_bounds = array<i64: 2, 1>}, {transform_indices = @transform_6, window_bounds = array<i64: 1, 2, 256>}]} {
    %c0 = arith.constant 0 : index
    %c0_0 = arith.constant 0 : index
    %0 = vector.load %arg2[%c0, %c0_0] : memref<2x256xf32, #tpu.memory_space<vmem>>, vector<2x256xf32>
    %1 = tpu.iota {dimensions = array<i32: 1>} : vector<1x256xi32>
    %c16_i32 = arith.constant 16 : i32
    %2 = vector.broadcast %c16_i32 : i32 to vector<1x256xi32>
    %3 = arith.cmpi sge, %1, %2 : vector<1x256xi32>
    %4 = arith.extui %3 : vector<1x256xi1> to vector<1x256xi32>
    %5 = arith.sitofp %4 : vector<1x256xi32> to vector<1x256xf32>
    %c240_i32 = arith.constant 240 : i32
    %6 = vector.broadcast %c240_i32 : i32 to vector<1x256xi32>
    %7 = arith.cmpi slt, %1, %6 : vector<1x256xi32>
    %8 = arith.extui %7 : vector<1x256xi1> to vector<1x256xi32>
    %9 = arith.sitofp %8 : vector<1x256xi32> to vector<1x256xf32>
    %10 = vector.extract_strided_slice %0 {offsets = [0, 0], sizes = [1, 256], strides = [1, 1]} : vector<2x256xf32> to vector<1x256xf32>
    %11 = vector.extract_strided_slice %0 {offsets = [1, 0], sizes = [1, 256], strides = [1, 1]} : vector<2x256xf32> to vector<1x256xf32>
    %12 = arith.mulf %5, %10 : vector<1x256xf32>
    %13 = arith.mulf %5, %11 : vector<1x256xf32>
    %14 = arith.mulf %9, %10 : vector<1x256xf32>
    %15 = arith.mulf %9, %11 : vector<1x256xf32>
    %c0_1 = arith.constant 0 : index
    %c0_2 = arith.constant 0 : index
    %c0_3 = arith.constant 0 : index
    %16 = vector.load %arg1[%c0_1, %c0_2, %c0_3] : memref<1x2x256xf32, #tpu.memory_space<vmem>>, vector<1x2x256xf32>
    %17 = vector.shape_cast %16 : vector<1x2x256xf32> to vector<2x256xf32>
    %c17_i32 = arith.constant 17 : i32
    %18 = tpu.dynamic_rotate %17 by %c17_i32 dim 1 : vector<2x256xf32>, i32 -> vector<2x256xf32>
    %19 = vector.broadcast %12 : vector<1x256xf32> to vector<2x256xf32>
    %20 = arith.mulf %18, %19 : vector<2x256xf32>
    %c16_i32_4 = arith.constant 16 : i32
    %21 = tpu.dynamic_rotate %17 by %c16_i32_4 dim 1 : vector<2x256xf32>, i32 -> vector<2x256xf32>
    %22 = vector.broadcast %5 : vector<1x256xf32> to vector<2x256xf32>
    %23 = arith.mulf %21, %22 : vector<2x256xf32>
    %c15_i32 = arith.constant 15 : i32
    %24 = tpu.dynamic_rotate %17 by %c15_i32 dim 1 : vector<2x256xf32>, i32 -> vector<2x256xf32>
    %25 = vector.broadcast %13 : vector<1x256xf32> to vector<2x256xf32>
    %26 = arith.mulf %24, %25 : vector<2x256xf32>
    %c1_i32 = arith.constant 1 : i32
    %27 = tpu.dynamic_rotate %17 by %c1_i32 dim 1 : vector<2x256xf32>, i32 -> vector<2x256xf32>
    %28 = vector.broadcast %10 : vector<1x256xf32> to vector<2x256xf32>
    %29 = arith.mulf %27, %28 : vector<2x256xf32>
    %c255_i32 = arith.constant 255 : i32
    %30 = tpu.dynamic_rotate %17 by %c255_i32 dim 1 : vector<2x256xf32>, i32 -> vector<2x256xf32>
    %31 = vector.broadcast %11 : vector<1x256xf32> to vector<2x256xf32>
    %32 = arith.mulf %30, %31 : vector<2x256xf32>
    %c241_i32 = arith.constant 241 : i32
    %33 = tpu.dynamic_rotate %17 by %c241_i32 dim 1 : vector<2x256xf32>, i32 -> vector<2x256xf32>
    %34 = vector.broadcast %14 : vector<1x256xf32> to vector<2x256xf32>
    %35 = arith.mulf %33, %34 : vector<2x256xf32>
    %c240_i32_5 = arith.constant 240 : i32
    %36 = tpu.dynamic_rotate %17 by %c240_i32_5 dim 1 : vector<2x256xf32>, i32 -> vector<2x256xf32>
    %37 = vector.broadcast %9 : vector<1x256xf32> to vector<2x256xf32>
    %38 = arith.mulf %36, %37 : vector<2x256xf32>
    %c239_i32 = arith.constant 239 : i32
    %39 = tpu.dynamic_rotate %17 by %c239_i32 dim 1 : vector<2x256xf32>, i32 -> vector<2x256xf32>
    %40 = vector.broadcast %15 : vector<1x256xf32> to vector<2x256xf32>
    %41 = arith.mulf %39, %40 : vector<2x256xf32>
    %42 = tpu.concatenate %20, %23, %26, %29, %17, %32, %35, %38, %41 in 0 : vector<2x256xf32>, vector<2x256xf32>, vector<2x256xf32>, vector<2x256xf32>, vector<2x256xf32>, vector<2x256xf32>, vector<2x256xf32>, vector<2x256xf32>, vector<2x256xf32> -> vector<18x256xf32>
    %43 = arith.truncf %42 : vector<18x256xf32> to vector<18x256xbf16>
    %c0_6 = arith.constant 0 : index
    %c0_7 = arith.constant 0 : index
    %c0_8 = arith.constant 0 : index
    %44 = vector.load %arg3[%c0_6, %c0_7, %c0_8] : memref<1x8x18xbf16, #tpu.memory_space<vmem>>, vector<1x8x18xbf16>
    %45 = vector.shape_cast %44 : vector<1x8x18xbf16> to vector<8x18xbf16>
    %cst = arith.constant dense<0.000000e+00> : vector<8x256xf32>
    %46 = tpu.matmul %45, %43, %cst {dimension_numbers = #tpu.dot_dimension_numbers<[1], [0], [0], [1], [0, 0, 1, 1], [], []>} : vector<8x18xbf16>, vector<18x256xbf16>, vector<8x256xf32> -> vector<8x256xf32>
    %c0_9 = arith.constant 0 : index
    %c0_10 = arith.constant 0 : index
    %47 = vector.load %arg4[%c0_9, %c0_10] : memref<8x1xf32, #tpu.memory_space<vmem>>, vector<8x1xf32>
    %48 = vector.broadcast %47 : vector<8x1xf32> to vector<8x256xf32>
    %49 = arith.addf %46, %48 : vector<8x256xf32>
    %cst_11 = arith.constant 0.000000e+00 : f32
    %50 = vector.broadcast %cst_11 : f32 to vector<8x256xf32>
    %51 = arith.maximumf %49, %50 : vector<8x256xf32>
    %c17_i32_12 = arith.constant 17 : i32
    %52 = tpu.dynamic_rotate %51 by %c17_i32_12 dim 1 : vector<8x256xf32>, i32 -> vector<8x256xf32>
    %53 = vector.broadcast %12 : vector<1x256xf32> to vector<8x256xf32>
    %54 = arith.mulf %52, %53 : vector<8x256xf32>
    %c16_i32_13 = arith.constant 16 : i32
    %55 = tpu.dynamic_rotate %51 by %c16_i32_13 dim 1 : vector<8x256xf32>, i32 -> vector<8x256xf32>
    %56 = vector.broadcast %5 : vector<1x256xf32> to vector<8x256xf32>
    %57 = arith.mulf %55, %56 : vector<8x256xf32>
    %c15_i32_14 = arith.constant 15 : i32
    %58 = tpu.dynamic_rotate %51 by %c15_i32_14 dim 1 : vector<8x256xf32>, i32 -> vector<8x256xf32>
    %59 = vector.broadcast %13 : vector<1x256xf32> to vector<8x256xf32>
    %60 = arith.mulf %58, %59 : vector<8x256xf32>
    %61 = tpu.concatenate %54, %57, %60 in 0 : vector<8x256xf32>, vector<8x256xf32>, vector<8x256xf32> -> vector<24x256xf32>
    %62 = arith.truncf %61 : vector<24x256xf32> to vector<24x256xbf16>
    %c0_15 = arith.constant 0 : index
    %c0_16 = arith.constant 0 : index
    %c0_17 = arith.constant 0 : index
    %63 = vector.load %arg5[%c0_15, %c0_16, %c0_17] : memref<3x2x24xbf16, #tpu.memory_space<vmem>>, vector<1x2x24xbf16>
    %64 = vector.shape_cast %63 : vector<1x2x24xbf16> to vector<2x24xbf16>
    %cst_18 = arith.constant dense<0.000000e+00> : vector<2x256xf32>
    %65 = tpu.matmul %64, %62, %cst_18 {dimension_numbers = #tpu.dot_dimension_numbers<[1], [0], [0], [1], [0, 0, 1, 1], [], []>} : vector<2x24xbf16>, vector<24x256xbf16>, vector<2x256xf32> -> vector<2x256xf32>
    %c1_i32_19 = arith.constant 1 : i32
    %66 = tpu.dynamic_rotate %51 by %c1_i32_19 dim 1 : vector<8x256xf32>, i32 -> vector<8x256xf32>
    %67 = vector.broadcast %10 : vector<1x256xf32> to vector<8x256xf32>
    %68 = arith.mulf %66, %67 : vector<8x256xf32>
    %c255_i32_20 = arith.constant 255 : i32
    %69 = tpu.dynamic_rotate %51 by %c255_i32_20 dim 1 : vector<8x256xf32>, i32 -> vector<8x256xf32>
    %70 = vector.broadcast %11 : vector<1x256xf32> to vector<8x256xf32>
    %71 = arith.mulf %69, %70 : vector<8x256xf32>
    %72 = tpu.concatenate %68, %51, %71 in 0 : vector<8x256xf32>, vector<8x256xf32>, vector<8x256xf32> -> vector<24x256xf32>
    %73 = arith.truncf %72 : vector<24x256xf32> to vector<24x256xbf16>
    %c1 = arith.constant 1 : index
    %c0_21 = arith.constant 0 : index
    %c0_22 = arith.constant 0 : index
    %74 = vector.load %arg5[%c1, %c0_21, %c0_22] : memref<3x2x24xbf16, #tpu.memory_space<vmem>>, vector<1x2x24xbf16>
    %75 = vector.shape_cast %74 : vector<1x2x24xbf16> to vector<2x24xbf16>
    %cst_23 = arith.constant dense<0.000000e+00> : vector<2x256xf32>
    %76 = tpu.matmul %75, %73, %cst_23 {dimension_numbers = #tpu.dot_dimension_numbers<[1], [0], [0], [1], [0, 0, 1, 1], [], []>} : vector<2x24xbf16>, vector<24x256xbf16>, vector<2x256xf32> -> vector<2x256xf32>
    %77 = arith.addf %65, %76 : vector<2x256xf32>
    %c241_i32_24 = arith.constant 241 : i32
    %78 = tpu.dynamic_rotate %51 by %c241_i32_24 dim 1 : vector<8x256xf32>, i32 -> vector<8x256xf32>
    %79 = vector.broadcast %14 : vector<1x256xf32> to vector<8x256xf32>
    %80 = arith.mulf %78, %79 : vector<8x256xf32>
    %c240_i32_25 = arith.constant 240 : i32
    %81 = tpu.dynamic_rotate %51 by %c240_i32_25 dim 1 : vector<8x256xf32>, i32 -> vector<8x256xf32>
    %82 = vector.broadcast %9 : vector<1x256xf32> to vector<8x256xf32>
    %83 = arith.mulf %81, %82 : vector<8x256xf32>
    %c239_i32_26 = arith.constant 239 : i32
    %84 = tpu.dynamic_rotate %51 by %c239_i32_26 dim 1 : vector<8x256xf32>, i32 -> vector<8x256xf32>
    %85 = vector.broadcast %15 : vector<1x256xf32> to vector<8x256xf32>
    %86 = arith.mulf %84, %85 : vector<8x256xf32>
    %87 = tpu.concatenate %80, %83, %86 in 0 : vector<8x256xf32>, vector<8x256xf32>, vector<8x256xf32> -> vector<24x256xf32>
    %88 = arith.truncf %87 : vector<24x256xf32> to vector<24x256xbf16>
    %c2 = arith.constant 2 : index
    %c0_27 = arith.constant 0 : index
    %c0_28 = arith.constant 0 : index
    %89 = vector.load %arg5[%c2, %c0_27, %c0_28] : memref<3x2x24xbf16, #tpu.memory_space<vmem>>, vector<1x2x24xbf16>
    %90 = vector.shape_cast %89 : vector<1x2x24xbf16> to vector<2x24xbf16>
    %cst_29 = arith.constant dense<0.000000e+00> : vector<2x256xf32>
    %91 = tpu.matmul %90, %88, %cst_29 {dimension_numbers = #tpu.dot_dimension_numbers<[1], [0], [0], [1], [0, 0, 1, 1], [], []>} : vector<2x24xbf16>, vector<24x256xbf16>, vector<2x256xf32> -> vector<2x256xf32>
    %92 = arith.addf %77, %91 : vector<2x256xf32>
    %c0_30 = arith.constant 0 : index
    %c0_31 = arith.constant 0 : index
    %93 = vector.load %arg6[%c0_30, %c0_31] : memref<2x1xf32, #tpu.memory_space<vmem>>, vector<2x1xf32>
    %94 = vector.broadcast %93 : vector<2x1xf32> to vector<2x256xf32>
    %95 = arith.addf %92, %94 : vector<2x256xf32>
    %c0_32 = arith.constant 0 : index
    %c0_33 = arith.constant 0 : index
    %c0_34 = arith.constant 0 : index
    %96 = vector.load %arg7[%c0_32, %c0_33, %c0_34] : memref<1x2x256xf32, #tpu.memory_space<vmem>>, vector<1x2x256xf32>
    %97 = vector.shape_cast %96 : vector<1x2x256xf32> to vector<2x256xf32>
    %98 = vector.shape_cast %95 : vector<2x256xf32> to vector<1x2x256xf32>
    tpu.vector_store %arg7[%c0_32, %c0_33, %c0_34], %98 {strides = array<i32>} : memref<1x2x256xf32, #tpu.memory_space<vmem>>, vector<1x2x256xf32>,
    return
  }
  func.func @transform_0(%arg0: i32) -> (i32, i32, i32) {
    %c0_i32 = arith.constant 0 : i32
    %c0_i32_0 = arith.constant 0 : i32
    %c0_i32_1 = arith.constant 0 : i32
    return %arg0, %c0_i32, %c0_i32_0 : i32, i32, i32
  }
  func.func @transform_1(%arg0: i32) -> (i32, i32) {
    %c0_i32 = arith.constant 0 : i32
    %c0_i32_0 = arith.constant 0 : i32
    %c0_i32_1 = arith.constant 0 : i32
    return %c0_i32, %c0_i32_0 : i32, i32
  }
  func.func @transform_2(%arg0: i32) -> (i32, i32, i32) {
    %c0_i32 = arith.constant 0 : i32
    %c0_i32_0 = arith.constant 0 : i32
    %c0_i32_1 = arith.constant 0 : i32
    %c0_i32_2 = arith.constant 0 : i32
    return %c0_i32, %c0_i32_0, %c0_i32_1 : i32, i32, i32
  }
  func.func @transform_3(%arg0: i32) -> (i32, i32) {
    %c0_i32 = arith.constant 0 : i32
    %c0_i32_0 = arith.constant 0 : i32
    %c0_i32_1 = arith.constant 0 : i32
    return %c0_i32, %c0_i32_0 : i32, i32
  }
  func.func @transform_4(%arg0: i32) -> (i32, i32, i32) {
    %c0_i32 = arith.constant 0 : i32
    %c0_i32_0 = arith.constant 0 : i32
    %c0_i32_1 = arith.constant 0 : i32
    %c0_i32_2 = arith.constant 0 : i32
    return %c0_i32, %c0_i32_0, %c0_i32_1 : i32, i32, i32
  }
  func.func @transform_5(%arg0: i32) -> (i32, i32) {
    %c0_i32 = arith.constant 0 : i32
    %c0_i32_0 = arith.constant 0 : i32
    %c0_i32_1 = arith.constant 0 : i32
    return %c0_i32, %c0_i32_0 : i32, i32
  }
  func.func @transform_6(%arg0: i32) -> (i32, i32, i32) {
    %c0_i32 = arith.constant 0 : i32
    %c0_i32_0 = arith.constant 0 : i32
    %c0_i32_1 = arith.constant 0 : i32
    return %arg0, %c0_i32, %c0_i32_0 : i32, i32, i32
  }
}

module attributes {stable_mosaic.version = 11 : i64} {
  func.func @_ssq_kernel(%arg0: i32, %arg1: memref<1x2x256xf32, #tpu.memory_space<vmem>>, %arg2: memref<1x256xf32, #tpu.memory_space<vmem>>) attributes {dimension_semantics = [#tpu.dimension_semantics<arbitrary>], iteration_bounds = array<i64: 4>, scalar_prefetch = 0 : i64, scratch_operands = 0 : i64, tpu.core_type = #tpu.core_type<tc>, window_params = [{transform_indices = @transform_0, window_bounds = array<i64: 1, 2, 256>}, {pipeline_mode = #tpu.pipeline_mode<synchronous>, transform_indices = @transform_1, window_bounds = array<i64: 1, 256>}]} {
    %c0_i32 = arith.constant 0 : i32
    %0 = arith.cmpi eq, %arg0, %c0_i32 : i32
    %1 = arith.extui %0 : i1 to i32
    %c0_i32_0 = arith.constant 0 : i32
    %2 = arith.cmpi ne, %1, %c0_i32_0 : i32
    scf.if %2 {
      %cst = arith.constant 0.000000e+00 : f32
      %15 = vector.broadcast %cst : f32 to vector<1x256xf32>
      %c0_7 = arith.constant 0 : index
      %c0_8 = arith.constant 0 : index
      %16 = vector.load %arg2[%c0_7, %c0_8] : memref<1x256xf32, #tpu.memory_space<vmem>>, vector<1x256xf32>
      tpu.vector_store %arg2[%c0_7, %c0_8], %15 {strides = array<i32>} : memref<1x256xf32, #tpu.memory_space<vmem>>, vector<1x256xf32>,
    } else {
    }
    %c0 = arith.constant 0 : index
    %c0_1 = arith.constant 0 : index
    %c0_2 = arith.constant 0 : index
    %3 = vector.load %arg1[%c0, %c0_1, %c0_2] : memref<1x2x256xf32, #tpu.memory_space<vmem>>, vector<1x2x256xf32>
    %4 = vector.shape_cast %3 : vector<1x2x256xf32> to vector<2x256xf32>
    %c0_3 = arith.constant 0 : index
    %c0_4 = arith.constant 0 : index
    %5 = vector.load %arg2[%c0_3, %c0_4] : memref<1x256xf32, #tpu.memory_space<vmem>>, vector<1x256xf32>
    %6 = vector.extract_strided_slice %4 {offsets = [0, 0], sizes = [1, 256], strides = [1, 1]} : vector<2x256xf32> to vector<1x256xf32>
    %7 = vector.extract_strided_slice %4 {offsets = [0, 0], sizes = [1, 256], strides = [1, 1]} : vector<2x256xf32> to vector<1x256xf32>
    %8 = arith.mulf %6, %7 : vector<1x256xf32>
    %9 = arith.addf %5, %8 : vector<1x256xf32>
    %10 = vector.extract_strided_slice %4 {offsets = [1, 0], sizes = [1, 256], strides = [1, 1]} : vector<2x256xf32> to vector<1x256xf32>
    %11 = vector.extract_strided_slice %4 {offsets = [1, 0], sizes = [1, 256], strides = [1, 1]} : vector<2x256xf32> to vector<1x256xf32>
    %12 = arith.mulf %10, %11 : vector<1x256xf32>
    %13 = arith.addf %9, %12 : vector<1x256xf32>
    %c0_5 = arith.constant 0 : index
    %c0_6 = arith.constant 0 : index
    %14 = vector.load %arg2[%c0_5, %c0_6] : memref<1x256xf32, #tpu.memory_space<vmem>>, vector<1x256xf32>
    tpu.vector_store %arg2[%c0_5, %c0_6], %13 {strides = array<i32>} : memref<1x256xf32, #tpu.memory_space<vmem>>, vector<1x256xf32>,
    return
  }
  func.func @transform_0(%arg0: i32) -> (i32, i32, i32) {
    %c0_i32 = arith.constant 0 : i32
    %c0_i32_0 = arith.constant 0 : i32
    %c0_i32_1 = arith.constant 0 : i32
    return %arg0, %c0_i32, %c0_i32_0 : i32, i32, i32
  }
  func.func @transform_1(%arg0: i32) -> (i32, i32) {
    %c0_i32 = arith.constant 0 : i32
    %c0_i32_0 = arith.constant 0 : i32
    %c0_i32_1 = arith.constant 0 : i32
    return %c0_i32, %c0_i32_0 : i32, i32
  }
}

module attributes {stable_mosaic.version = 11 : i64} {
  func.func @_sens_norm_kernel(%arg0: i32, %arg1: memref<1x2x256xf32, #tpu.memory_space<vmem>>, %arg2: memref<1x256xf32, #tpu.memory_space<vmem>>, %arg3: memref<1x2x256xf32, #tpu.memory_space<vmem>>) attributes {dimension_semantics = [#tpu.dimension_semantics<parallel>], iteration_bounds = array<i64: 4>, scalar_prefetch = 0 : i64, scratch_operands = 0 : i64, tpu.core_type = #tpu.core_type<tc>, window_params = [{transform_indices = @transform_0, window_bounds = array<i64: 1, 2, 256>}, {pipeline_mode = #tpu.pipeline_mode<synchronous>, transform_indices = @transform_1, window_bounds = array<i64: 1, 256>}, {transform_indices = @transform_2, window_bounds = array<i64: 1, 2, 256>}]} {
    %c0 = arith.constant 0 : index
    %c0_0 = arith.constant 0 : index
    %0 = vector.load %arg2[%c0, %c0_0] : memref<1x256xf32, #tpu.memory_space<vmem>>, vector<1x256xf32>
    %cst = arith.constant 9.99999996E-13 : f32
    %1 = vector.broadcast %cst : f32 to vector<1x256xf32>
    %2 = arith.addf %0, %1 : vector<1x256xf32>
    %3 = math.rsqrt %2 : vector<1x256xf32>
    %c0_1 = arith.constant 0 : index
    %c0_2 = arith.constant 0 : index
    %c0_3 = arith.constant 0 : index
    %4 = vector.load %arg1[%c0_1, %c0_2, %c0_3] : memref<1x2x256xf32, #tpu.memory_space<vmem>>, vector<1x2x256xf32>
    %5 = vector.shape_cast %4 : vector<1x2x256xf32> to vector<2x256xf32>
    %6 = vector.broadcast %3 : vector<1x256xf32> to vector<2x256xf32>
    %7 = arith.mulf %5, %6 : vector<2x256xf32>
    %c0_4 = arith.constant 0 : index
    %c0_5 = arith.constant 0 : index
    %c0_6 = arith.constant 0 : index
    %8 = vector.load %arg3[%c0_4, %c0_5, %c0_6] : memref<1x2x256xf32, #tpu.memory_space<vmem>>, vector<1x2x256xf32>
    %9 = vector.shape_cast %8 : vector<1x2x256xf32> to vector<2x256xf32>
    %10 = vector.shape_cast %7 : vector<2x256xf32> to vector<1x2x256xf32>
    tpu.vector_store %arg3[%c0_4, %c0_5, %c0_6], %10 {strides = array<i32>} : memref<1x2x256xf32, #tpu.memory_space<vmem>>, vector<1x2x256xf32>,
    return
  }
  func.func @transform_0(%arg0: i32) -> (i32, i32, i32) {
    %c0_i32 = arith.constant 0 : i32
    %c0_i32_0 = arith.constant 0 : i32
    %c0_i32_1 = arith.constant 0 : i32
    return %arg0, %c0_i32, %c0_i32_0 : i32, i32, i32
  }
  func.func @transform_1(%arg0: i32) -> (i32, i32) {
    %c0_i32 = arith.constant 0 : i32
    %c0_i32_0 = arith.constant 0 : i32
    %c0_i32_1 = arith.constant 0 : i32
    return %c0_i32, %c0_i32_0 : i32, i32
  }
  func.func @transform_2(%arg0: i32) -> (i32, i32, i32) {
    %c0_i32 = arith.constant 0 : i32
    %c0_i32_0 = arith.constant 0 : i32
    %c0_i32_1 = arith.constant 0 : i32
    return %arg0, %c0_i32, %c0_i32_0 : i32, i32, i32
  }
}

module attributes {stable_mosaic.version = 11 : i64} {
  func.func @_reduce_kernel(%arg0: i32, %arg1: memref<1x2x256xf32, #tpu.memory_space<vmem>>, %arg2: memref<1x2x256xf32, #tpu.memory_space<vmem>>, %arg3: memref<2x256xf32, #tpu.memory_space<vmem>>) attributes {dimension_semantics = [#tpu.dimension_semantics<arbitrary>], iteration_bounds = array<i64: 4>, scalar_prefetch = 0 : i64, scratch_operands = 0 : i64, tpu.core_type = #tpu.core_type<tc>, window_params = [{transform_indices = @transform_0, window_bounds = array<i64: 1, 2, 256>}, {transform_indices = @transform_1, window_bounds = array<i64: 1, 2, 256>}, {pipeline_mode = #tpu.pipeline_mode<synchronous>, transform_indices = @transform_2, window_bounds = array<i64: 2, 256>}]} {
    %c0_i32 = arith.constant 0 : i32
    %0 = arith.cmpi eq, %arg0, %c0_i32 : i32
    %1 = arith.extui %0 : i1 to i32
    %c0_i32_0 = arith.constant 0 : i32
    %2 = arith.cmpi ne, %1, %c0_i32_0 : i32
    scf.if %2 {
      %cst = arith.constant 0.000000e+00 : f32
      %23 = vector.broadcast %cst : f32 to vector<2x256xf32>
      %c0_19 = arith.constant 0 : index
      %c0_20 = arith.constant 0 : index
      %24 = vector.load %arg3[%c0_19, %c0_20] : memref<2x256xf32, #tpu.memory_space<vmem>>, vector<2x256xf32>
      tpu.vector_store %arg3[%c0_19, %c0_20], %23 {strides = array<i32>} : memref<2x256xf32, #tpu.memory_space<vmem>>, vector<2x256xf32>,
    } else {
    }
    %c0 = arith.constant 0 : index
    %c0_1 = arith.constant 0 : index
    %c0_2 = arith.constant 0 : index
    %3 = vector.load %arg1[%c0, %c0_1, %c0_2] : memref<1x2x256xf32, #tpu.memory_space<vmem>>, vector<1x1x256xf32>
    %4 = vector.shape_cast %3 : vector<1x1x256xf32> to vector<1x256xf32>
    %c0_3 = arith.constant 0 : index
    %c1 = arith.constant 1 : index
    %c0_4 = arith.constant 0 : index
    %5 = vector.load %arg1[%c0_3, %c1, %c0_4] : memref<1x2x256xf32, #tpu.memory_space<vmem>>, vector<1x1x256xf32>
    %6 = vector.shape_cast %5 : vector<1x1x256xf32> to vector<1x256xf32>
    %c0_5 = arith.constant 0 : index
    %c0_6 = arith.constant 0 : index
    %c0_7 = arith.constant 0 : index
    %7 = vector.load %arg2[%c0_5, %c0_6, %c0_7] : memref<1x2x256xf32, #tpu.memory_space<vmem>>, vector<1x1x256xf32>
    %8 = vector.shape_cast %7 : vector<1x1x256xf32> to vector<1x256xf32>
    %c0_8 = arith.constant 0 : index
    %c1_9 = arith.constant 1 : index
    %c0_10 = arith.constant 0 : index
    %9 = vector.load %arg2[%c0_8, %c1_9, %c0_10] : memref<1x2x256xf32, #tpu.memory_space<vmem>>, vector<1x1x256xf32>
    %10 = vector.shape_cast %9 : vector<1x1x256xf32> to vector<1x256xf32>
    %c0_11 = arith.constant 0 : index
    %c0_12 = arith.constant 0 : index
    %11 = vector.load %arg3[%c0_11, %c0_12] : memref<2x256xf32, #tpu.memory_space<vmem>>, vector<1x256xf32>
    %12 = arith.mulf %8, %4 : vector<1x256xf32>
    %13 = arith.mulf %10, %6 : vector<1x256xf32>
    %14 = arith.addf %12, %13 : vector<1x256xf32>
    %15 = arith.addf %11, %14 : vector<1x256xf32>
    %c0_13 = arith.constant 0 : index
    %c0_14 = arith.constant 0 : index
    %16 = vector.load %arg3[%c0_13, %c0_14] : memref<2x256xf32, #tpu.memory_space<vmem>>, vector<1x256xf32>
    tpu.vector_store %arg3[%c0_13, %c0_14], %15 {strides = array<i32>} : memref<2x256xf32, #tpu.memory_space<vmem>>, vector<1x256xf32>,
    %c1_15 = arith.constant 1 : index
    %c0_16 = arith.constant 0 : index
    %17 = vector.load %arg3[%c1_15, %c0_16] : memref<2x256xf32, #tpu.memory_space<vmem>>, vector<1x256xf32>
    %18 = arith.mulf %8, %6 : vector<1x256xf32>
    %19 = arith.mulf %10, %4 : vector<1x256xf32>
    %20 = arith.subf %18, %19 : vector<1x256xf32>
    %21 = arith.addf %17, %20 : vector<1x256xf32>
    %c1_17 = arith.constant 1 : index
    %c0_18 = arith.constant 0 : index
    %22 = vector.load %arg3[%c1_17, %c0_18] : memref<2x256xf32, #tpu.memory_space<vmem>>, vector<1x256xf32>
    tpu.vector_store %arg3[%c1_17, %c0_18], %21 {strides = array<i32>} : memref<2x256xf32, #tpu.memory_space<vmem>>, vector<1x256xf32>,
    return
  }
  func.func @transform_0(%arg0: i32) -> (i32, i32, i32) {
    %c0_i32 = arith.constant 0 : i32
    %c0_i32_0 = arith.constant 0 : i32
    %c0_i32_1 = arith.constant 0 : i32
    return %arg0, %c0_i32, %c0_i32_0 : i32, i32, i32
  }
  func.func @transform_1(%arg0: i32) -> (i32, i32, i32) {
    %c0_i32 = arith.constant 0 : i32
    %c0_i32_0 = arith.constant 0 : i32
    %c0_i32_1 = arith.constant 0 : i32
    return %arg0, %c0_i32, %c0_i32_0 : i32, i32, i32
  }
  func.func @transform_2(%arg0: i32) -> (i32, i32) {
    %c0_i32 = arith.constant 0 : i32
    %c0_i32_0 = arith.constant 0 : i32
    %c0_i32_1 = arith.constant 0 : i32
    return %c0_i32, %c0_i32_0 : i32, i32
  }
}

module attributes {stable_mosaic.version = 11 : i64} {
  func.func @_refine_kernel(%arg0: memref<2x256xf32, #tpu.memory_space<vmem>>, %arg1: memref<2x256xf32, #tpu.memory_space<vmem>>, %arg2: memref<1x18x18xbf16, #tpu.memory_space<vmem>>, %arg3: memref<18x1xf32, #tpu.memory_space<vmem>>, %arg4: memref<3x2x54xbf16, #tpu.memory_space<vmem>>, %arg5: memref<2x1xf32, #tpu.memory_space<vmem>>, %arg6: memref<2x256xf32, #tpu.memory_space<vmem>>) attributes {dimension_semantics = [], scalar_prefetch = 0 : i64, scratch_operands = 0 : i64, tpu.core_type = #tpu.core_type<tc>} {
    %c0 = arith.constant 0 : index
    %c0_0 = arith.constant 0 : index
    %0 = vector.load %arg1[%c0, %c0_0] : memref<2x256xf32, #tpu.memory_space<vmem>>, vector<2x256xf32>
    %1 = tpu.iota {dimensions = array<i32: 1>} : vector<1x256xi32>
    %c16_i32 = arith.constant 16 : i32
    %2 = vector.broadcast %c16_i32 : i32 to vector<1x256xi32>
    %3 = arith.cmpi sge, %1, %2 : vector<1x256xi32>
    %4 = arith.extui %3 : vector<1x256xi1> to vector<1x256xi32>
    %5 = arith.sitofp %4 : vector<1x256xi32> to vector<1x256xf32>
    %c240_i32 = arith.constant 240 : i32
    %6 = vector.broadcast %c240_i32 : i32 to vector<1x256xi32>
    %7 = arith.cmpi slt, %1, %6 : vector<1x256xi32>
    %8 = arith.extui %7 : vector<1x256xi1> to vector<1x256xi32>
    %9 = arith.sitofp %8 : vector<1x256xi32> to vector<1x256xf32>
    %10 = vector.extract_strided_slice %0 {offsets = [0, 0], sizes = [1, 256], strides = [1, 1]} : vector<2x256xf32> to vector<1x256xf32>
    %11 = vector.extract_strided_slice %0 {offsets = [1, 0], sizes = [1, 256], strides = [1, 1]} : vector<2x256xf32> to vector<1x256xf32>
    %12 = arith.mulf %5, %10 : vector<1x256xf32>
    %13 = arith.mulf %5, %11 : vector<1x256xf32>
    %14 = arith.mulf %9, %10 : vector<1x256xf32>
    %15 = arith.mulf %9, %11 : vector<1x256xf32>
    %c0_1 = arith.constant 0 : index
    %c0_2 = arith.constant 0 : index
    %16 = vector.load %arg0[%c0_1, %c0_2] : memref<2x256xf32, #tpu.memory_space<vmem>>, vector<2x256xf32>
    %c17_i32 = arith.constant 17 : i32
    %17 = tpu.dynamic_rotate %16 by %c17_i32 dim 1 : vector<2x256xf32>, i32 -> vector<2x256xf32>
    %18 = vector.broadcast %12 : vector<1x256xf32> to vector<2x256xf32>
    %19 = arith.mulf %17, %18 : vector<2x256xf32>
    %c16_i32_3 = arith.constant 16 : i32
    %20 = tpu.dynamic_rotate %16 by %c16_i32_3 dim 1 : vector<2x256xf32>, i32 -> vector<2x256xf32>
    %21 = vector.broadcast %5 : vector<1x256xf32> to vector<2x256xf32>
    %22 = arith.mulf %20, %21 : vector<2x256xf32>
    %c15_i32 = arith.constant 15 : i32
    %23 = tpu.dynamic_rotate %16 by %c15_i32 dim 1 : vector<2x256xf32>, i32 -> vector<2x256xf32>
    %24 = vector.broadcast %13 : vector<1x256xf32> to vector<2x256xf32>
    %25 = arith.mulf %23, %24 : vector<2x256xf32>
    %c1_i32 = arith.constant 1 : i32
    %26 = tpu.dynamic_rotate %16 by %c1_i32 dim 1 : vector<2x256xf32>, i32 -> vector<2x256xf32>
    %27 = vector.broadcast %10 : vector<1x256xf32> to vector<2x256xf32>
    %28 = arith.mulf %26, %27 : vector<2x256xf32>
    %c255_i32 = arith.constant 255 : i32
    %29 = tpu.dynamic_rotate %16 by %c255_i32 dim 1 : vector<2x256xf32>, i32 -> vector<2x256xf32>
    %30 = vector.broadcast %11 : vector<1x256xf32> to vector<2x256xf32>
    %31 = arith.mulf %29, %30 : vector<2x256xf32>
    %c241_i32 = arith.constant 241 : i32
    %32 = tpu.dynamic_rotate %16 by %c241_i32 dim 1 : vector<2x256xf32>, i32 -> vector<2x256xf32>
    %33 = vector.broadcast %14 : vector<1x256xf32> to vector<2x256xf32>
    %34 = arith.mulf %32, %33 : vector<2x256xf32>
    %c240_i32_4 = arith.constant 240 : i32
    %35 = tpu.dynamic_rotate %16 by %c240_i32_4 dim 1 : vector<2x256xf32>, i32 -> vector<2x256xf32>
    %36 = vector.broadcast %9 : vector<1x256xf32> to vector<2x256xf32>
    %37 = arith.mulf %35, %36 : vector<2x256xf32>
    %c239_i32 = arith.constant 239 : i32
    %38 = tpu.dynamic_rotate %16 by %c239_i32 dim 1 : vector<2x256xf32>, i32 -> vector<2x256xf32>
    %39 = vector.broadcast %15 : vector<1x256xf32> to vector<2x256xf32>
    %40 = arith.mulf %38, %39 : vector<2x256xf32>
    %41 = tpu.concatenate %19, %22, %25, %28, %16, %31, %34, %37, %40 in 0 : vector<2x256xf32>, vector<2x256xf32>, vector<2x256xf32>, vector<2x256xf32>, vector<2x256xf32>, vector<2x256xf32>, vector<2x256xf32>, vector<2x256xf32>, vector<2x256xf32> -> vector<18x256xf32>
    %42 = arith.truncf %41 : vector<18x256xf32> to vector<18x256xbf16>
    %c0_5 = arith.constant 0 : index
    %c0_6 = arith.constant 0 : index
    %c0_7 = arith.constant 0 : index
    %43 = vector.load %arg2[%c0_5, %c0_6, %c0_7] : memref<1x18x18xbf16, #tpu.memory_space<vmem>>, vector<1x18x18xbf16>
    %44 = vector.shape_cast %43 : vector<1x18x18xbf16> to vector<18x18xbf16>
    %cst = arith.constant dense<0.000000e+00> : vector<18x256xf32>
    %45 = tpu.matmul %44, %42, %cst {dimension_numbers = #tpu.dot_dimension_numbers<[1], [0], [0], [1], [0, 0, 1, 1], [], []>} : vector<18x18xbf16>, vector<18x256xbf16>, vector<18x256xf32> -> vector<18x256xf32>
    %c0_8 = arith.constant 0 : index
    %c0_9 = arith.constant 0 : index
    %46 = vector.load %arg3[%c0_8, %c0_9] : memref<18x1xf32, #tpu.memory_space<vmem>>, vector<18x1xf32>
    %47 = vector.broadcast %46 : vector<18x1xf32> to vector<18x256xf32>
    %48 = arith.addf %45, %47 : vector<18x256xf32>
    %cst_10 = arith.constant 0.000000e+00 : f32
    %49 = vector.broadcast %cst_10 : f32 to vector<18x256xf32>
    %50 = arith.maximumf %48, %49 : vector<18x256xf32>
    %c17_i32_11 = arith.constant 17 : i32
    %51 = tpu.dynamic_rotate %50 by %c17_i32_11 dim 1 : vector<18x256xf32>, i32 -> vector<18x256xf32>
    %52 = vector.broadcast %12 : vector<1x256xf32> to vector<18x256xf32>
    %53 = arith.mulf %51, %52 : vector<18x256xf32>
    %c16_i32_12 = arith.constant 16 : i32
    %54 = tpu.dynamic_rotate %50 by %c16_i32_12 dim 1 : vector<18x256xf32>, i32 -> vector<18x256xf32>
    %55 = vector.broadcast %5 : vector<1x256xf32> to vector<18x256xf32>
    %56 = arith.mulf %54, %55 : vector<18x256xf32>
    %c15_i32_13 = arith.constant 15 : i32
    %57 = tpu.dynamic_rotate %50 by %c15_i32_13 dim 1 : vector<18x256xf32>, i32 -> vector<18x256xf32>
    %58 = vector.broadcast %13 : vector<1x256xf32> to vector<18x256xf32>
    %59 = arith.mulf %57, %58 : vector<18x256xf32>
    %60 = tpu.concatenate %53, %56, %59 in 0 : vector<18x256xf32>, vector<18x256xf32>, vector<18x256xf32> -> vector<54x256xf32>
    %61 = arith.truncf %60 : vector<54x256xf32> to vector<54x256xbf16>
    %c0_14 = arith.constant 0 : index
    %c0_15 = arith.constant 0 : index
    %c0_16 = arith.constant 0 : index
    %62 = vector.load %arg4[%c0_14, %c0_15, %c0_16] : memref<3x2x54xbf16, #tpu.memory_space<vmem>>, vector<1x2x54xbf16>
    %63 = vector.shape_cast %62 : vector<1x2x54xbf16> to vector<2x54xbf16>
    %cst_17 = arith.constant dense<0.000000e+00> : vector<2x256xf32>
    %64 = tpu.matmul %63, %61, %cst_17 {dimension_numbers = #tpu.dot_dimension_numbers<[1], [0], [0], [1], [0, 0, 1, 1], [], []>} : vector<2x54xbf16>, vector<54x256xbf16>, vector<2x256xf32> -> vector<2x256xf32>
    %c1_i32_18 = arith.constant 1 : i32
    %65 = tpu.dynamic_rotate %50 by %c1_i32_18 dim 1 : vector<18x256xf32>, i32 -> vector<18x256xf32>
    %66 = vector.broadcast %10 : vector<1x256xf32> to vector<18x256xf32>
    %67 = arith.mulf %65, %66 : vector<18x256xf32>
    %c255_i32_19 = arith.constant 255 : i32
    %68 = tpu.dynamic_rotate %50 by %c255_i32_19 dim 1 : vector<18x256xf32>, i32 -> vector<18x256xf32>
    %69 = vector.broadcast %11 : vector<1x256xf32> to vector<18x256xf32>
    %70 = arith.mulf %68, %69 : vector<18x256xf32>
    %71 = tpu.concatenate %67, %50, %70 in 0 : vector<18x256xf32>, vector<18x256xf32>, vector<18x256xf32> -> vector<54x256xf32>
    %72 = arith.truncf %71 : vector<54x256xf32> to vector<54x256xbf16>
    %c1 = arith.constant 1 : index
    %c0_20 = arith.constant 0 : index
    %c0_21 = arith.constant 0 : index
    %73 = vector.load %arg4[%c1, %c0_20, %c0_21] : memref<3x2x54xbf16, #tpu.memory_space<vmem>>, vector<1x2x54xbf16>
    %74 = vector.shape_cast %73 : vector<1x2x54xbf16> to vector<2x54xbf16>
    %cst_22 = arith.constant dense<0.000000e+00> : vector<2x256xf32>
    %75 = tpu.matmul %74, %72, %cst_22 {dimension_numbers = #tpu.dot_dimension_numbers<[1], [0], [0], [1], [0, 0, 1, 1], [], []>} : vector<2x54xbf16>, vector<54x256xbf16>, vector<2x256xf32> -> vector<2x256xf32>
    %76 = arith.addf %64, %75 : vector<2x256xf32>
    %c241_i32_23 = arith.constant 241 : i32
    %77 = tpu.dynamic_rotate %50 by %c241_i32_23 dim 1 : vector<18x256xf32>, i32 -> vector<18x256xf32>
    %78 = vector.broadcast %14 : vector<1x256xf32> to vector<18x256xf32>
    %79 = arith.mulf %77, %78 : vector<18x256xf32>
    %c240_i32_24 = arith.constant 240 : i32
    %80 = tpu.dynamic_rotate %50 by %c240_i32_24 dim 1 : vector<18x256xf32>, i32 -> vector<18x256xf32>
    %81 = vector.broadcast %9 : vector<1x256xf32> to vector<18x256xf32>
    %82 = arith.mulf %80, %81 : vector<18x256xf32>
    %c239_i32_25 = arith.constant 239 : i32
    %83 = tpu.dynamic_rotate %50 by %c239_i32_25 dim 1 : vector<18x256xf32>, i32 -> vector<18x256xf32>
    %84 = vector.broadcast %15 : vector<1x256xf32> to vector<18x256xf32>
    %85 = arith.mulf %83, %84 : vector<18x256xf32>
    %86 = tpu.concatenate %79, %82, %85 in 0 : vector<18x256xf32>, vector<18x256xf32>, vector<18x256xf32> -> vector<54x256xf32>
    %87 = arith.truncf %86 : vector<54x256xf32> to vector<54x256xbf16>
    %c2 = arith.constant 2 : index
    %c0_26 = arith.constant 0 : index
    %c0_27 = arith.constant 0 : index
    %88 = vector.load %arg4[%c2, %c0_26, %c0_27] : memref<3x2x54xbf16, #tpu.memory_space<vmem>>, vector<1x2x54xbf16>
    %89 = vector.shape_cast %88 : vector<1x2x54xbf16> to vector<2x54xbf16>
    %cst_28 = arith.constant dense<0.000000e+00> : vector<2x256xf32>
    %90 = tpu.matmul %89, %87, %cst_28 {dimension_numbers = #tpu.dot_dimension_numbers<[1], [0], [0], [1], [0, 0, 1, 1], [], []>} : vector<2x54xbf16>, vector<54x256xbf16>, vector<2x256xf32> -> vector<2x256xf32>
    %91 = arith.addf %76, %90 : vector<2x256xf32>
    %c0_29 = arith.constant 0 : index
    %c0_30 = arith.constant 0 : index
    %92 = vector.load %arg5[%c0_29, %c0_30] : memref<2x1xf32, #tpu.memory_space<vmem>>, vector<2x1xf32>
    %93 = vector.broadcast %92 : vector<2x1xf32> to vector<2x256xf32>
    %94 = arith.addf %91, %93 : vector<2x256xf32>
    %c0_31 = arith.constant 0 : index
    %c0_32 = arith.constant 0 : index
    %95 = vector.load %arg6[%c0_31, %c0_32] : memref<2x256xf32, #tpu.memory_space<vmem>>, vector<2x256xf32>
    tpu.vector_store %arg6[%c0_31, %c0_32], %94 {strides = array<i32>} : memref<2x256xf32, #tpu.memory_space<vmem>>, vector<2x256xf32>,
    return
  }
}

module attributes {stable_mosaic.version = 11 : i64} {
  func.func @_expand_kernel(%arg0: i32, %arg1: memref<2x256xf32, #tpu.memory_space<vmem>>, %arg2: memref<1x2x256xf32, #tpu.memory_space<vmem>>, %arg3: memref<1x2x256xf32, #tpu.memory_space<vmem>>) attributes {dimension_semantics = [#tpu.dimension_semantics<parallel>], iteration_bounds = array<i64: 4>, scalar_prefetch = 0 : i64, scratch_operands = 0 : i64, tpu.core_type = #tpu.core_type<tc>, window_params = [{pipeline_mode = #tpu.pipeline_mode<synchronous>, transform_indices = @transform_0, window_bounds = array<i64: 2, 256>}, {transform_indices = @transform_1, window_bounds = array<i64: 1, 2, 256>}, {transform_indices = @transform_2, window_bounds = array<i64: 1, 2, 256>}]} {
    %c0 = arith.constant 0 : index
    %c0_0 = arith.constant 0 : index
    %0 = vector.load %arg1[%c0, %c0_0] : memref<2x256xf32, #tpu.memory_space<vmem>>, vector<1x256xf32>
    %c1 = arith.constant 1 : index
    %c0_1 = arith.constant 0 : index
    %1 = vector.load %arg1[%c1, %c0_1] : memref<2x256xf32, #tpu.memory_space<vmem>>, vector<1x256xf32>
    %c0_2 = arith.constant 0 : index
    %c0_3 = arith.constant 0 : index
    %c0_4 = arith.constant 0 : index
    %2 = vector.load %arg2[%c0_2, %c0_3, %c0_4] : memref<1x2x256xf32, #tpu.memory_space<vmem>>, vector<1x1x256xf32>
    %3 = vector.shape_cast %2 : vector<1x1x256xf32> to vector<1x256xf32>
    %c0_5 = arith.constant 0 : index
    %c1_6 = arith.constant 1 : index
    %c0_7 = arith.constant 0 : index
    %4 = vector.load %arg2[%c0_5, %c1_6, %c0_7] : memref<1x2x256xf32, #tpu.memory_space<vmem>>, vector<1x1x256xf32>
    %5 = vector.shape_cast %4 : vector<1x1x256xf32> to vector<1x256xf32>
    %6 = arith.mulf %3, %0 : vector<1x256xf32>
    %7 = arith.mulf %5, %1 : vector<1x256xf32>
    %8 = arith.subf %6, %7 : vector<1x256xf32>
    %c0_8 = arith.constant 0 : index
    %c0_9 = arith.constant 0 : index
    %c0_10 = arith.constant 0 : index
    %9 = vector.load %arg3[%c0_8, %c0_9, %c0_10] : memref<1x2x256xf32, #tpu.memory_space<vmem>>, vector<1x1x256xf32>
    %10 = vector.shape_cast %9 : vector<1x1x256xf32> to vector<1x256xf32>
    %11 = vector.shape_cast %8 : vector<1x256xf32> to vector<1x1x256xf32>
    tpu.vector_store %arg3[%c0_8, %c0_9, %c0_10], %11 {strides = array<i32>} : memref<1x2x256xf32, #tpu.memory_space<vmem>>, vector<1x1x256xf32>,
    %12 = arith.mulf %3, %1 : vector<1x256xf32>
    %13 = arith.mulf %5, %0 : vector<1x256xf32>
    %14 = arith.addf %12, %13 : vector<1x256xf32>
    %c0_11 = arith.constant 0 : index
    %c1_12 = arith.constant 1 : index
    %c0_13 = arith.constant 0 : index
    %15 = vector.load %arg3[%c0_11, %c1_12, %c0_13] : memref<1x2x256xf32, #tpu.memory_space<vmem>>, vector<1x1x256xf32>
    %16 = vector.shape_cast %15 : vector<1x1x256xf32> to vector<1x256xf32>
    %17 = vector.shape_cast %14 : vector<1x256xf32> to vector<1x1x256xf32>
    tpu.vector_store %arg3[%c0_11, %c1_12, %c0_13], %17 {strides = array<i32>} : memref<1x2x256xf32, #tpu.memory_space<vmem>>, vector<1x1x256xf32>,
    return
  }
  func.func @transform_0(%arg0: i32) -> (i32, i32) {
    %c0_i32 = arith.constant 0 : i32
    %c0_i32_0 = arith.constant 0 : i32
    %c0_i32_1 = arith.constant 0 : i32
    return %c0_i32, %c0_i32_0 : i32, i32
  }
  func.func @transform_1(%arg0: i32) -> (i32, i32, i32) {
    %c0_i32 = arith.constant 0 : i32
    %c0_i32_0 = arith.constant 0 : i32
    %c0_i32_1 = arith.constant 0 : i32
    return %arg0, %c0_i32, %c0_i32_0 : i32, i32, i32
  }
  func.func @transform_2(%arg0: i32) -> (i32, i32, i32) {
    %c0_i32 = arith.constant 0 : i32
    %c0_i32_0 = arith.constant 0 : i32
    %c0_i32_1 = arith.constant 0 : i32
    return %arg0, %c0_i32, %c0_i32_0 : i32, i32, i32
  }
}

module attributes {stable_mosaic.version = 11 : i64} {
  func.func @_dc_kernel(%arg0: i32, %arg1: memref<1x2x16x16xf32, #tpu.memory_space<vmem>>, %arg2: memref<1x2x16x16xf32, #tpu.memory_space<vmem>>, %arg3: memref<1x2x16x16xf32, #tpu.memory_space<vmem>>, %arg4: memref<1x1x1x16xf32, #tpu.memory_space<vmem>>, %arg5: memref<1xf32, #tpu.memory_space<smem>>, %arg6: memref<1x2x16x16xf32, #tpu.memory_space<vmem>>) attributes {dimension_semantics = [#tpu.dimension_semantics<parallel>], iteration_bounds = array<i64: 4>, scalar_prefetch = 0 : i64, scratch_operands = 0 : i64, tpu.core_type = #tpu.core_type<tc>, window_params = [{transform_indices = @transform_0, window_bounds = array<i64: 1, 2, 16, 16>}, {transform_indices = @transform_1, window_bounds = array<i64: 1, 2, 16, 16>}, {transform_indices = @transform_2, window_bounds = array<i64: 1, 2, 16, 16>}, {pipeline_mode = #tpu.pipeline_mode<synchronous>, transform_indices = @transform_3, window_bounds = array<i64: 1, 1, 1, 16>}, {transform_indices = @transform_4, window_bounds = array<i64: 1>}, {transform_indices = @transform_5, window_bounds = array<i64: 1, 2, 16, 16>}]} {
    %c0 = arith.constant 0 : index
    %c0_0 = arith.constant 0 : index
    %c0_1 = arith.constant 0 : index
    %c0_2 = arith.constant 0 : index
    %0 = vector.load %arg4[%c0, %c0_0, %c0_1, %c0_2] : memref<1x1x1x16xf32, #tpu.memory_space<vmem>>, vector<1x1x1x16xf32>
    %c0_3 = arith.constant 0 : index
    %1 = memref.load %arg5[%c0_3] : memref<1xf32, #tpu.memory_space<smem>>
    %2 = vector.broadcast %1 : f32 to vector<1x1x1x16xf32>
    %3 = arith.mulf %0, %2 : vector<1x1x1x16xf32>
    %c0_4 = arith.constant 0 : index
    %c0_5 = arith.constant 0 : index
    %c0_6 = arith.constant 0 : index
    %c0_7 = arith.constant 0 : index
    %4 = vector.load %arg1[%c0_4, %c0_5, %c0_6, %c0_7] : memref<1x2x16x16xf32, #tpu.memory_space<vmem>>, vector<1x2x16x16xf32>
    %c0_8 = arith.constant 0 : index
    %c0_9 = arith.constant 0 : index
    %c0_10 = arith.constant 0 : index
    %c0_11 = arith.constant 0 : index
    %5 = vector.load %arg1[%c0_8, %c0_9, %c0_10, %c0_11] : memref<1x2x16x16xf32, #tpu.memory_space<vmem>>, vector<1x2x16x16xf32>
    %c0_12 = arith.constant 0 : index
    %c0_13 = arith.constant 0 : index
    %c0_14 = arith.constant 0 : index
    %c0_15 = arith.constant 0 : index
    %6 = vector.load %arg2[%c0_12, %c0_13, %c0_14, %c0_15] : memref<1x2x16x16xf32, #tpu.memory_space<vmem>>, vector<1x2x16x16xf32>
    %7 = arith.subf %5, %6 : vector<1x2x16x16xf32>
    %8 = vector.broadcast %3 : vector<1x1x1x16xf32> to vector<1x2x16x16xf32>
    %9 = arith.mulf %8, %7 : vector<1x2x16x16xf32>
    %10 = arith.subf %4, %9 : vector<1x2x16x16xf32>
    %c0_16 = arith.constant 0 : index
    %c0_17 = arith.constant 0 : index
    %c0_18 = arith.constant 0 : index
    %c0_19 = arith.constant 0 : index
    %11 = vector.load %arg3[%c0_16, %c0_17, %c0_18, %c0_19] : memref<1x2x16x16xf32, #tpu.memory_space<vmem>>, vector<1x2x16x16xf32>
    %12 = arith.subf %10, %11 : vector<1x2x16x16xf32>
    %c0_20 = arith.constant 0 : index
    %c0_21 = arith.constant 0 : index
    %c0_22 = arith.constant 0 : index
    %c0_23 = arith.constant 0 : index
    %13 = vector.load %arg6[%c0_20, %c0_21, %c0_22, %c0_23] : memref<1x2x16x16xf32, #tpu.memory_space<vmem>>, vector<1x2x16x16xf32>
    tpu.vector_store %arg6[%c0_20, %c0_21, %c0_22, %c0_23], %12 {strides = array<i32>} : memref<1x2x16x16xf32, #tpu.memory_space<vmem>>, vector<1x2x16x16xf32>,
    return
  }
  func.func @transform_0(%arg0: i32) -> (i32, i32, i32, i32) {
    %c0_i32 = arith.constant 0 : i32
    %c0_i32_0 = arith.constant 0 : i32
    %c0_i32_1 = arith.constant 0 : i32
    %c0_i32_2 = arith.constant 0 : i32
    return %arg0, %c0_i32, %c0_i32_0, %c0_i32_1 : i32, i32, i32, i32
  }
  func.func @transform_1(%arg0: i32) -> (i32, i32, i32, i32) {
    %c0_i32 = arith.constant 0 : i32
    %c0_i32_0 = arith.constant 0 : i32
    %c0_i32_1 = arith.constant 0 : i32
    %c0_i32_2 = arith.constant 0 : i32
    return %arg0, %c0_i32, %c0_i32_0, %c0_i32_1 : i32, i32, i32, i32
  }
  func.func @transform_2(%arg0: i32) -> (i32, i32, i32, i32) {
    %c0_i32 = arith.constant 0 : i32
    %c0_i32_0 = arith.constant 0 : i32
    %c0_i32_1 = arith.constant 0 : i32
    %c0_i32_2 = arith.constant 0 : i32
    return %arg0, %c0_i32, %c0_i32_0, %c0_i32_1 : i32, i32, i32, i32
  }
  func.func @transform_3(%arg0: i32) -> (i32, i32, i32, i32) {
    %c0_i32 = arith.constant 0 : i32
    %c0_i32_0 = arith.constant 0 : i32
    %c0_i32_1 = arith.constant 0 : i32
    %c0_i32_2 = arith.constant 0 : i32
    %c0_i32_3 = arith.constant 0 : i32
    return %c0_i32, %c0_i32_0, %c0_i32_1, %c0_i32_2 : i32, i32, i32, i32
  }
  func.func @transform_4(%arg0: i32) -> i32 {
    %c0_i32 = arith.constant 0 : i32
    %c0_i32_0 = arith.constant 0 : i32
    return %c0_i32 : i32
  }
  func.func @transform_5(%arg0: i32) -> (i32, i32, i32, i32) {
    %c0_i32 = arith.constant 0 : i32
    %c0_i32_0 = arith.constant 0 : i32
    %c0_i32_1 = arith.constant 0 : i32
    %c0_i32_2 = arith.constant 0 : i32
    return %arg0, %c0_i32, %c0_i32_0, %c0_i32_1 : i32, i32, i32, i32
  }
}

module attributes {stable_mosaic.version = 11 : i64} {
  func.func @_dc_kernel(%arg0: i32, %arg1: memref<1x2x16x16xf32, #tpu.memory_space<vmem>>, %arg2: memref<1x2x16x16xf32, #tpu.memory_space<vmem>>, %arg3: memref<1x2x16x16xf32, #tpu.memory_space<vmem>>, %arg4: memref<1x1x1x16xf32, #tpu.memory_space<vmem>>, %arg5: memref<1xf32, #tpu.memory_space<smem>>, %arg6: memref<1x2x16x16xf32, #tpu.memory_space<vmem>>) attributes {dimension_semantics = [#tpu.dimension_semantics<parallel>], iteration_bounds = array<i64: 4>, scalar_prefetch = 0 : i64, scratch_operands = 0 : i64, tpu.core_type = #tpu.core_type<tc>, window_params = [{transform_indices = @transform_0, window_bounds = array<i64: 1, 2, 16, 16>}, {transform_indices = @transform_1, window_bounds = array<i64: 1, 2, 16, 16>}, {transform_indices = @transform_2, window_bounds = array<i64: 1, 2, 16, 16>}, {pipeline_mode = #tpu.pipeline_mode<synchronous>, transform_indices = @transform_3, window_bounds = array<i64: 1, 1, 1, 16>}, {transform_indices = @transform_4, window_bounds = array<i64: 1>}, {transform_indices = @transform_5, window_bounds = array<i64: 1, 2, 16, 16>}]} {
    %c0 = arith.constant 0 : index
    %c0_0 = arith.constant 0 : index
    %c0_1 = arith.constant 0 : index
    %c0_2 = arith.constant 0 : index
    %0 = vector.load %arg4[%c0, %c0_0, %c0_1, %c0_2] : memref<1x1x1x16xf32, #tpu.memory_space<vmem>>, vector<1x1x1x16xf32>
    %c0_3 = arith.constant 0 : index
    %1 = memref.load %arg5[%c0_3] : memref<1xf32, #tpu.memory_space<smem>>
    %2 = vector.broadcast %1 : f32 to vector<1x1x1x16xf32>
    %3 = arith.mulf %0, %2 : vector<1x1x1x16xf32>
    %c0_4 = arith.constant 0 : index
    %c0_5 = arith.constant 0 : index
    %c0_6 = arith.constant 0 : index
    %c0_7 = arith.constant 0 : index
    %4 = vector.load %arg1[%c0_4, %c0_5, %c0_6, %c0_7] : memref<1x2x16x16xf32, #tpu.memory_space<vmem>>, vector<1x2x16x16xf32>
    %c0_8 = arith.constant 0 : index
    %c0_9 = arith.constant 0 : index
    %c0_10 = arith.constant 0 : index
    %c0_11 = arith.constant 0 : index
    %5 = vector.load %arg1[%c0_8, %c0_9, %c0_10, %c0_11] : memref<1x2x16x16xf32, #tpu.memory_space<vmem>>, vector<1x2x16x16xf32>
    %c0_12 = arith.constant 0 : index
    %c0_13 = arith.constant 0 : index
    %c0_14 = arith.constant 0 : index
    %c0_15 = arith.constant 0 : index
    %6 = vector.load %arg2[%c0_12, %c0_13, %c0_14, %c0_15] : memref<1x2x16x16xf32, #tpu.memory_space<vmem>>, vector<1x2x16x16xf32>
    %7 = arith.subf %5, %6 : vector<1x2x16x16xf32>
    %8 = vector.broadcast %3 : vector<1x1x1x16xf32> to vector<1x2x16x16xf32>
    %9 = arith.mulf %8, %7 : vector<1x2x16x16xf32>
    %10 = arith.subf %4, %9 : vector<1x2x16x16xf32>
    %c0_16 = arith.constant 0 : index
    %c0_17 = arith.constant 0 : index
    %c0_18 = arith.constant 0 : index
    %c0_19 = arith.constant 0 : index
    %11 = vector.load %arg3[%c0_16, %c0_17, %c0_18, %c0_19] : memref<1x2x16x16xf32, #tpu.memory_space<vmem>>, vector<1x2x16x16xf32>
    %12 = arith.subf %10, %11 : vector<1x2x16x16xf32>
    %c0_20 = arith.constant 0 : index
    %c0_21 = arith.constant 0 : index
    %c0_22 = arith.constant 0 : index
    %c0_23 = arith.constant 0 : index
    %13 = vector.load %arg6[%c0_20, %c0_21, %c0_22, %c0_23] : memref<1x2x16x16xf32, #tpu.memory_space<vmem>>, vector<1x2x16x16xf32>
    tpu.vector_store %arg6[%c0_20, %c0_21, %c0_22, %c0_23], %12 {strides = array<i32>} : memref<1x2x16x16xf32, #tpu.memory_space<vmem>>, vector<1x2x16x16xf32>,
    return
  }
  func.func @transform_0(%arg0: i32) -> (i32, i32, i32, i32) {
    %c0_i32 = arith.constant 0 : i32
    %c0_i32_0 = arith.constant 0 : i32
    %c0_i32_1 = arith.constant 0 : i32
    %c0_i32_2 = arith.constant 0 : i32
    return %arg0, %c0_i32, %c0_i32_0, %c0_i32_1 : i32, i32, i32, i32
  }
  func.func @transform_1(%arg0: i32) -> (i32, i32, i32, i32) {
    %c0_i32 = arith.constant 0 : i32
    %c0_i32_0 = arith.constant 0 : i32
    %c0_i32_1 = arith.constant 0 : i32
    %c0_i32_2 = arith.constant 0 : i32
    return %arg0, %c0_i32, %c0_i32_0, %c0_i32_1 : i32, i32, i32, i32
  }
  func.func @transform_2(%arg0: i32) -> (i32, i32, i32, i32) {
    %c0_i32 = arith.constant 0 : i32
    %c0_i32_0 = arith.constant 0 : i32
    %c0_i32_1 = arith.constant 0 : i32
    %c0_i32_2 = arith.constant 0 : i32
    return %arg0, %c0_i32, %c0_i32_0, %c0_i32_1 : i32, i32, i32, i32
  }
  func.func @transform_3(%arg0: i32) -> (i32, i32, i32, i32) {
    %c0_i32 = arith.constant 0 : i32
    %c0_i32_0 = arith.constant 0 : i32
    %c0_i32_1 = arith.constant 0 : i32
    %c0_i32_2 = arith.constant 0 : i32
    %c0_i32_3 = arith.constant 0 : i32
    return %c0_i32, %c0_i32_0, %c0_i32_1, %c0_i32_2 : i32, i32, i32, i32
  }
  func.func @transform_4(%arg0: i32) -> i32 {
    %c0_i32 = arith.constant 0 : i32
    %c0_i32_0 = arith.constant 0 : i32
    return %c0_i32 : i32
  }
  func.func @transform_5(%arg0: i32) -> (i32, i32, i32, i32) {
    %c0_i32 = arith.constant 0 : i32
    %c0_i32_0 = arith.constant 0 : i32
    %c0_i32_1 = arith.constant 0 : i32
    %c0_i32_2 = arith.constant 0 : i32
    return %arg0, %c0_i32, %c0_i32_0, %c0_i32_1 : i32, i32, i32, i32
  }
}

module attributes {stable_mosaic.version = 11 : i64} {
  func.func @_rss_kernel(%arg0: i32, %arg1: memref<1x2x256xf32, #tpu.memory_space<vmem>>, %arg2: memref<1x256xf32, #tpu.memory_space<vmem>>) attributes {dimension_semantics = [#tpu.dimension_semantics<arbitrary>], iteration_bounds = array<i64: 4>, scalar_prefetch = 0 : i64, scratch_operands = 0 : i64, tpu.core_type = #tpu.core_type<tc>, window_params = [{transform_indices = @transform_0, window_bounds = array<i64: 1, 2, 256>}, {pipeline_mode = #tpu.pipeline_mode<synchronous>, transform_indices = @transform_1, window_bounds = array<i64: 1, 256>}]} {
    %c0_i32 = arith.constant 0 : i32
    %0 = arith.cmpi eq, %arg0, %c0_i32 : i32
    %1 = arith.extui %0 : i1 to i32
    %c0_i32_0 = arith.constant 0 : i32
    %2 = arith.cmpi ne, %1, %c0_i32_0 : i32
    scf.if %2 {
      %cst = arith.constant 0.000000e+00 : f32
      %18 = vector.broadcast %cst : f32 to vector<1x256xf32>
      %c0_8 = arith.constant 0 : index
      %c0_9 = arith.constant 0 : index
      %19 = vector.load %arg2[%c0_8, %c0_9] : memref<1x256xf32, #tpu.memory_space<vmem>>, vector<1x256xf32>
      tpu.vector_store %arg2[%c0_8, %c0_9], %18 {strides = array<i32>} : memref<1x256xf32, #tpu.memory_space<vmem>>, vector<1x256xf32>,
    } else {
    }
    %c0 = arith.constant 0 : index
    %c0_1 = arith.constant 0 : index
    %c0_2 = arith.constant 0 : index
    %3 = vector.load %arg1[%c0, %c0_1, %c0_2] : memref<1x2x256xf32, #tpu.memory_space<vmem>>, vector<1x2x256xf32>
    %4 = vector.shape_cast %3 : vector<1x2x256xf32> to vector<2x256xf32>
    %c0_3 = arith.constant 0 : index
    %c0_4 = arith.constant 0 : index
    %5 = vector.load %arg2[%c0_3, %c0_4] : memref<1x256xf32, #tpu.memory_space<vmem>>, vector<1x256xf32>
    %6 = vector.extract_strided_slice %4 {offsets = [0, 0], sizes = [1, 256], strides = [1, 1]} : vector<2x256xf32> to vector<1x256xf32>
    %7 = vector.extract_strided_slice %4 {offsets = [0, 0], sizes = [1, 256], strides = [1, 1]} : vector<2x256xf32> to vector<1x256xf32>
    %8 = arith.mulf %6, %7 : vector<1x256xf32>
    %9 = arith.addf %5, %8 : vector<1x256xf32>
    %10 = vector.extract_strided_slice %4 {offsets = [1, 0], sizes = [1, 256], strides = [1, 1]} : vector<2x256xf32> to vector<1x256xf32>
    %11 = vector.extract_strided_slice %4 {offsets = [1, 0], sizes = [1, 256], strides = [1, 1]} : vector<2x256xf32> to vector<1x256xf32>
    %12 = arith.mulf %10, %11 : vector<1x256xf32>
    %13 = arith.addf %9, %12 : vector<1x256xf32>
    %c0_5 = arith.constant 0 : index
    %c0_6 = arith.constant 0 : index
    %14 = vector.load %arg2[%c0_5, %c0_6] : memref<1x256xf32, #tpu.memory_space<vmem>>, vector<1x256xf32>
    tpu.vector_store %arg2[%c0_5, %c0_6], %13 {strides = array<i32>} : memref<1x256xf32, #tpu.memory_space<vmem>>, vector<1x256xf32>,
    %c3_i32 = arith.constant 3 : i32
    %15 = arith.cmpi eq, %arg0, %c3_i32 : i32
    %16 = arith.extui %15 : i1 to i32
    %c0_i32_7 = arith.constant 0 : i32
    %17 = arith.cmpi ne, %16, %c0_i32_7 : i32
    scf.if %17 {
      %c0_8 = arith.constant 0 : index
      %c0_9 = arith.constant 0 : index
      %18 = vector.load %arg2[%c0_8, %c0_9] : memref<1x256xf32, #tpu.memory_space<vmem>>, vector<1x256xf32>
      %19 = math.sqrt %18 : vector<1x256xf32>
      %c0_10 = arith.constant 0 : index
      %c0_11 = arith.constant 0 : index
      %20 = vector.load %arg2[%c0_10, %c0_11] : memref<1x256xf32, #tpu.memory_space<vmem>>, vector<1x256xf32>
      tpu.vector_store %arg2[%c0_10, %c0_11], %19 {strides = array<i32>} : memref<1x256xf32, #tpu.memory_space<vmem>>, vector<1x256xf32>,
    } else {
    }
    return
  }
  func.func @transform_0(%arg0: i32) -> (i32, i32, i32) {
    %c0_i32 = arith.constant 0 : i32
    %c0_i32_0 = arith.constant 0 : i32
    %c0_i32_1 = arith.constant 0 : i32
    return %arg0, %c0_i32, %c0_i32_0 : i32, i32, i32
  }
  func.func @transform_1(%arg0: i32) -> (i32, i32) {
    %c0_i32 = arith.constant 0 : i32
    %c0_i32_0 = arith.constant 0 : i32
    %c0_i32_1 = arith.constant 0 : i32
    return %c0_i32, %c0_i32_0 : i32, i32
  }
}

module attributes {stable_mosaic.version = 11 : i64} {
  func.func @_noise_kernel(%arg0: memref<1x256xf32, #tpu.memory_space<vmem>>, %arg1: memref<2x256xf32, #tpu.memory_space<vmem>>, %arg2: memref<1x8x9xbf16, #tpu.memory_space<vmem>>, %arg3: memref<8x1xf32, #tpu.memory_space<vmem>>, %arg4: memref<3x8x24xbf16, #tpu.memory_space<vmem>>, %arg5: memref<8x1xf32, #tpu.memory_space<vmem>>, %arg6: memref<3x1x24xbf16, #tpu.memory_space<vmem>>, %arg7: memref<1x1xf32, #tpu.memory_space<vmem>>, %arg8: memref<1x256xf32, #tpu.memory_space<vmem>>) attributes {dimension_semantics = [], scalar_prefetch = 0 : i64, scratch_operands = 0 : i64, tpu.core_type = #tpu.core_type<tc>} {
    %c0 = arith.constant 0 : index
    %c0_0 = arith.constant 0 : index
    %0 = vector.load %arg1[%c0, %c0_0] : memref<2x256xf32, #tpu.memory_space<vmem>>, vector<2x256xf32>
    %1 = tpu.iota {dimensions = array<i32: 1>} : vector<1x256xi32>
    %c16_i32 = arith.constant 16 : i32
    %2 = vector.broadcast %c16_i32 : i32 to vector<1x256xi32>
    %3 = arith.cmpi sge, %1, %2 : vector<1x256xi32>
    %4 = arith.extui %3 : vector<1x256xi1> to vector<1x256xi32>
    %5 = arith.sitofp %4 : vector<1x256xi32> to vector<1x256xf32>
    %c240_i32 = arith.constant 240 : i32
    %6 = vector.broadcast %c240_i32 : i32 to vector<1x256xi32>
    %7 = arith.cmpi slt, %1, %6 : vector<1x256xi32>
    %8 = arith.extui %7 : vector<1x256xi1> to vector<1x256xi32>
    %9 = arith.sitofp %8 : vector<1x256xi32> to vector<1x256xf32>
    %10 = vector.extract_strided_slice %0 {offsets = [0, 0], sizes = [1, 256], strides = [1, 1]} : vector<2x256xf32> to vector<1x256xf32>
    %11 = vector.extract_strided_slice %0 {offsets = [1, 0], sizes = [1, 256], strides = [1, 1]} : vector<2x256xf32> to vector<1x256xf32>
    %12 = arith.mulf %5, %10 : vector<1x256xf32>
    %13 = arith.mulf %5, %11 : vector<1x256xf32>
    %14 = arith.mulf %9, %10 : vector<1x256xf32>
    %15 = arith.mulf %9, %11 : vector<1x256xf32>
    %c0_1 = arith.constant 0 : index
    %c0_2 = arith.constant 0 : index
    %16 = vector.load %arg0[%c0_1, %c0_2] : memref<1x256xf32, #tpu.memory_space<vmem>>, vector<1x256xf32>
    %c17_i32 = arith.constant 17 : i32
    %17 = tpu.dynamic_rotate %16 by %c17_i32 dim 1 : vector<1x256xf32>, i32 -> vector<1x256xf32>
    %18 = arith.mulf %17, %12 : vector<1x256xf32>
    %c16_i32_3 = arith.constant 16 : i32
    %19 = tpu.dynamic_rotate %16 by %c16_i32_3 dim 1 : vector<1x256xf32>, i32 -> vector<1x256xf32>
    %20 = arith.mulf %19, %5 : vector<1x256xf32>
    %c15_i32 = arith.constant 15 : i32
    %21 = tpu.dynamic_rotate %16 by %c15_i32 dim 1 : vector<1x256xf32>, i32 -> vector<1x256xf32>
    %22 = arith.mulf %21, %13 : vector<1x256xf32>
    %c1_i32 = arith.constant 1 : i32
    %23 = tpu.dynamic_rotate %16 by %c1_i32 dim 1 : vector<1x256xf32>, i32 -> vector<1x256xf32>
    %24 = arith.mulf %23, %10 : vector<1x256xf32>
    %c255_i32 = arith.constant 255 : i32
    %25 = tpu.dynamic_rotate %16 by %c255_i32 dim 1 : vector<1x256xf32>, i32 -> vector<1x256xf32>
    %26 = arith.mulf %25, %11 : vector<1x256xf32>
    %c241_i32 = arith.constant 241 : i32
    %27 = tpu.dynamic_rotate %16 by %c241_i32 dim 1 : vector<1x256xf32>, i32 -> vector<1x256xf32>
    %28 = arith.mulf %27, %14 : vector<1x256xf32>
    %c240_i32_4 = arith.constant 240 : i32
    %29 = tpu.dynamic_rotate %16 by %c240_i32_4 dim 1 : vector<1x256xf32>, i32 -> vector<1x256xf32>
    %30 = arith.mulf %29, %9 : vector<1x256xf32>
    %c239_i32 = arith.constant 239 : i32
    %31 = tpu.dynamic_rotate %16 by %c239_i32 dim 1 : vector<1x256xf32>, i32 -> vector<1x256xf32>
    %32 = arith.mulf %31, %15 : vector<1x256xf32>
    %33 = tpu.concatenate %18, %20, %22, %24, %16, %26, %28, %30, %32 in 0 : vector<1x256xf32>, vector<1x256xf32>, vector<1x256xf32>, vector<1x256xf32>, vector<1x256xf32>, vector<1x256xf32>, vector<1x256xf32>, vector<1x256xf32>, vector<1x256xf32> -> vector<9x256xf32>
    %34 = arith.truncf %33 : vector<9x256xf32> to vector<9x256xbf16>
    %c0_5 = arith.constant 0 : index
    %c0_6 = arith.constant 0 : index
    %c0_7 = arith.constant 0 : index
    %35 = vector.load %arg2[%c0_5, %c0_6, %c0_7] : memref<1x8x9xbf16, #tpu.memory_space<vmem>>, vector<1x8x9xbf16>
    %36 = vector.shape_cast %35 : vector<1x8x9xbf16> to vector<8x9xbf16>
    %cst = arith.constant dense<0.000000e+00> : vector<8x256xf32>
    %37 = tpu.matmul %36, %34, %cst {dimension_numbers = #tpu.dot_dimension_numbers<[1], [0], [0], [1], [0, 0, 1, 1], [], []>} : vector<8x9xbf16>, vector<9x256xbf16>, vector<8x256xf32> -> vector<8x256xf32>
    %c0_8 = arith.constant 0 : index
    %c0_9 = arith.constant 0 : index
    %38 = vector.load %arg3[%c0_8, %c0_9] : memref<8x1xf32, #tpu.memory_space<vmem>>, vector<8x1xf32>
    %39 = vector.broadcast %38 : vector<8x1xf32> to vector<8x256xf32>
    %40 = arith.addf %37, %39 : vector<8x256xf32>
    %cst_10 = arith.constant 0.000000e+00 : f32
    %41 = vector.broadcast %cst_10 : f32 to vector<8x256xf32>
    %42 = arith.maximumf %40, %41 : vector<8x256xf32>
    %c17_i32_11 = arith.constant 17 : i32
    %43 = tpu.dynamic_rotate %42 by %c17_i32_11 dim 1 : vector<8x256xf32>, i32 -> vector<8x256xf32>
    %44 = vector.broadcast %12 : vector<1x256xf32> to vector<8x256xf32>
    %45 = arith.mulf %43, %44 : vector<8x256xf32>
    %c16_i32_12 = arith.constant 16 : i32
    %46 = tpu.dynamic_rotate %42 by %c16_i32_12 dim 1 : vector<8x256xf32>, i32 -> vector<8x256xf32>
    %47 = vector.broadcast %5 : vector<1x256xf32> to vector<8x256xf32>
    %48 = arith.mulf %46, %47 : vector<8x256xf32>
    %c15_i32_13 = arith.constant 15 : i32
    %49 = tpu.dynamic_rotate %42 by %c15_i32_13 dim 1 : vector<8x256xf32>, i32 -> vector<8x256xf32>
    %50 = vector.broadcast %13 : vector<1x256xf32> to vector<8x256xf32>
    %51 = arith.mulf %49, %50 : vector<8x256xf32>
    %52 = tpu.concatenate %45, %48, %51 in 0 : vector<8x256xf32>, vector<8x256xf32>, vector<8x256xf32> -> vector<24x256xf32>
    %53 = arith.truncf %52 : vector<24x256xf32> to vector<24x256xbf16>
    %c0_14 = arith.constant 0 : index
    %c0_15 = arith.constant 0 : index
    %c0_16 = arith.constant 0 : index
    %54 = vector.load %arg4[%c0_14, %c0_15, %c0_16] : memref<3x8x24xbf16, #tpu.memory_space<vmem>>, vector<1x8x24xbf16>
    %55 = vector.shape_cast %54 : vector<1x8x24xbf16> to vector<8x24xbf16>
    %cst_17 = arith.constant dense<0.000000e+00> : vector<8x256xf32>
    %56 = tpu.matmul %55, %53, %cst_17 {dimension_numbers = #tpu.dot_dimension_numbers<[1], [0], [0], [1], [0, 0, 1, 1], [], []>} : vector<8x24xbf16>, vector<24x256xbf16>, vector<8x256xf32> -> vector<8x256xf32>
    %c1_i32_18 = arith.constant 1 : i32
    %57 = tpu.dynamic_rotate %42 by %c1_i32_18 dim 1 : vector<8x256xf32>, i32 -> vector<8x256xf32>
    %58 = vector.broadcast %10 : vector<1x256xf32> to vector<8x256xf32>
    %59 = arith.mulf %57, %58 : vector<8x256xf32>
    %c255_i32_19 = arith.constant 255 : i32
    %60 = tpu.dynamic_rotate %42 by %c255_i32_19 dim 1 : vector<8x256xf32>, i32 -> vector<8x256xf32>
    %61 = vector.broadcast %11 : vector<1x256xf32> to vector<8x256xf32>
    %62 = arith.mulf %60, %61 : vector<8x256xf32>
    %63 = tpu.concatenate %59, %42, %62 in 0 : vector<8x256xf32>, vector<8x256xf32>, vector<8x256xf32> -> vector<24x256xf32>
    %64 = arith.truncf %63 : vector<24x256xf32> to vector<24x256xbf16>
    %c1 = arith.constant 1 : index
    %c0_20 = arith.constant 0 : index
    %c0_21 = arith.constant 0 : index
    %65 = vector.load %arg4[%c1, %c0_20, %c0_21] : memref<3x8x24xbf16, #tpu.memory_space<vmem>>, vector<1x8x24xbf16>
    %66 = vector.shape_cast %65 : vector<1x8x24xbf16> to vector<8x24xbf16>
    %cst_22 = arith.constant dense<0.000000e+00> : vector<8x256xf32>
    %67 = tpu.matmul %66, %64, %cst_22 {dimension_numbers = #tpu.dot_dimension_numbers<[1], [0], [0], [1], [0, 0, 1, 1], [], []>} : vector<8x24xbf16>, vector<24x256xbf16>, vector<8x256xf32> -> vector<8x256xf32>
    %68 = arith.addf %56, %67 : vector<8x256xf32>
    %c241_i32_23 = arith.constant 241 : i32
    %69 = tpu.dynamic_rotate %42 by %c241_i32_23 dim 1 : vector<8x256xf32>, i32 -> vector<8x256xf32>
    %70 = vector.broadcast %14 : vector<1x256xf32> to vector<8x256xf32>
    %71 = arith.mulf %69, %70 : vector<8x256xf32>
    %c240_i32_24 = arith.constant 240 : i32
    %72 = tpu.dynamic_rotate %42 by %c240_i32_24 dim 1 : vector<8x256xf32>, i32 -> vector<8x256xf32>
    %73 = vector.broadcast %9 : vector<1x256xf32> to vector<8x256xf32>
    %74 = arith.mulf %72, %73 : vector<8x256xf32>
    %c239_i32_25 = arith.constant 239 : i32
    %75 = tpu.dynamic_rotate %42 by %c239_i32_25 dim 1 : vector<8x256xf32>, i32 -> vector<8x256xf32>
    %76 = vector.broadcast %15 : vector<1x256xf32> to vector<8x256xf32>
    %77 = arith.mulf %75, %76 : vector<8x256xf32>
    %78 = tpu.concatenate %71, %74, %77 in 0 : vector<8x256xf32>, vector<8x256xf32>, vector<8x256xf32> -> vector<24x256xf32>
    %79 = arith.truncf %78 : vector<24x256xf32> to vector<24x256xbf16>
    %c2 = arith.constant 2 : index
    %c0_26 = arith.constant 0 : index
    %c0_27 = arith.constant 0 : index
    %80 = vector.load %arg4[%c2, %c0_26, %c0_27] : memref<3x8x24xbf16, #tpu.memory_space<vmem>>, vector<1x8x24xbf16>
    %81 = vector.shape_cast %80 : vector<1x8x24xbf16> to vector<8x24xbf16>
    %cst_28 = arith.constant dense<0.000000e+00> : vector<8x256xf32>
    %82 = tpu.matmul %81, %79, %cst_28 {dimension_numbers = #tpu.dot_dimension_numbers<[1], [0], [0], [1], [0, 0, 1, 1], [], []>} : vector<8x24xbf16>, vector<24x256xbf16>, vector<8x256xf32> -> vector<8x256xf32>
    %83 = arith.addf %68, %82 : vector<8x256xf32>
    %c0_29 = arith.constant 0 : index
    %c0_30 = arith.constant 0 : index
    %84 = vector.load %arg5[%c0_29, %c0_30] : memref<8x1xf32, #tpu.memory_space<vmem>>, vector<8x1xf32>
    %85 = vector.broadcast %84 : vector<8x1xf32> to vector<8x256xf32>
    %86 = arith.addf %83, %85 : vector<8x256xf32>
    %cst_31 = arith.constant 0.000000e+00 : f32
    %87 = vector.broadcast %cst_31 : f32 to vector<8x256xf32>
    %88 = arith.maximumf %86, %87 : vector<8x256xf32>
    %c17_i32_32 = arith.constant 17 : i32
    %89 = tpu.dynamic_rotate %88 by %c17_i32_32 dim 1 : vector<8x256xf32>, i32 -> vector<8x256xf32>
    %90 = vector.broadcast %12 : vector<1x256xf32> to vector<8x256xf32>
    %91 = arith.mulf %89, %90 : vector<8x256xf32>
    %c16_i32_33 = arith.constant 16 : i32
    %92 = tpu.dynamic_rotate %88 by %c16_i32_33 dim 1 : vector<8x256xf32>, i32 -> vector<8x256xf32>
    %93 = vector.broadcast %5 : vector<1x256xf32> to vector<8x256xf32>
    %94 = arith.mulf %92, %93 : vector<8x256xf32>
    %c15_i32_34 = arith.constant 15 : i32
    %95 = tpu.dynamic_rotate %88 by %c15_i32_34 dim 1 : vector<8x256xf32>, i32 -> vector<8x256xf32>
    %96 = vector.broadcast %13 : vector<1x256xf32> to vector<8x256xf32>
    %97 = arith.mulf %95, %96 : vector<8x256xf32>
    %98 = tpu.concatenate %91, %94, %97 in 0 : vector<8x256xf32>, vector<8x256xf32>, vector<8x256xf32> -> vector<24x256xf32>
    %99 = arith.truncf %98 : vector<24x256xf32> to vector<24x256xbf16>
    %c0_35 = arith.constant 0 : index
    %c0_36 = arith.constant 0 : index
    %c0_37 = arith.constant 0 : index
    %100 = vector.load %arg6[%c0_35, %c0_36, %c0_37] : memref<3x1x24xbf16, #tpu.memory_space<vmem>>, vector<1x1x24xbf16>
    %101 = vector.shape_cast %100 : vector<1x1x24xbf16> to vector<1x24xbf16>
    %cst_38 = arith.constant dense<0.000000e+00> : vector<1x256xf32>
    %102 = tpu.matmul %101, %99, %cst_38 {dimension_numbers = #tpu.dot_dimension_numbers<[1], [0], [0], [1], [0, 0, 1, 1], [], []>} : vector<1x24xbf16>, vector<24x256xbf16>, vector<1x256xf32> -> vector<1x256xf32>
    %c1_i32_39 = arith.constant 1 : i32
    %103 = tpu.dynamic_rotate %88 by %c1_i32_39 dim 1 : vector<8x256xf32>, i32 -> vector<8x256xf32>
    %104 = vector.broadcast %10 : vector<1x256xf32> to vector<8x256xf32>
    %105 = arith.mulf %103, %104 : vector<8x256xf32>
    %c255_i32_40 = arith.constant 255 : i32
    %106 = tpu.dynamic_rotate %88 by %c255_i32_40 dim 1 : vector<8x256xf32>, i32 -> vector<8x256xf32>
    %107 = vector.broadcast %11 : vector<1x256xf32> to vector<8x256xf32>
    %108 = arith.mulf %106, %107 : vector<8x256xf32>
    %109 = tpu.concatenate %105, %88, %108 in 0 : vector<8x256xf32>, vector<8x256xf32>, vector<8x256xf32> -> vector<24x256xf32>
    %110 = arith.truncf %109 : vector<24x256xf32> to vector<24x256xbf16>
    %c1_41 = arith.constant 1 : index
    %c0_42 = arith.constant 0 : index
    %c0_43 = arith.constant 0 : index
    %111 = vector.load %arg6[%c1_41, %c0_42, %c0_43] : memref<3x1x24xbf16, #tpu.memory_space<vmem>>, vector<1x1x24xbf16>
    %112 = vector.shape_cast %111 : vector<1x1x24xbf16> to vector<1x24xbf16>
    %cst_44 = arith.constant dense<0.000000e+00> : vector<1x256xf32>
    %113 = tpu.matmul %112, %110, %cst_44 {dimension_numbers = #tpu.dot_dimension_numbers<[1], [0], [0], [1], [0, 0, 1, 1], [], []>} : vector<1x24xbf16>, vector<24x256xbf16>, vector<1x256xf32> -> vector<1x256xf32>
    %114 = arith.addf %102, %113 : vector<1x256xf32>
    %c241_i32_45 = arith.constant 241 : i32
    %115 = tpu.dynamic_rotate %88 by %c241_i32_45 dim 1 : vector<8x256xf32>, i32 -> vector<8x256xf32>
    %116 = vector.broadcast %14 : vector<1x256xf32> to vector<8x256xf32>
    %117 = arith.mulf %115, %116 : vector<8x256xf32>
    %c240_i32_46 = arith.constant 240 : i32
    %118 = tpu.dynamic_rotate %88 by %c240_i32_46 dim 1 : vector<8x256xf32>, i32 -> vector<8x256xf32>
    %119 = vector.broadcast %9 : vector<1x256xf32> to vector<8x256xf32>
    %120 = arith.mulf %118, %119 : vector<8x256xf32>
    %c239_i32_47 = arith.constant 239 : i32
    %121 = tpu.dynamic_rotate %88 by %c239_i32_47 dim 1 : vector<8x256xf32>, i32 -> vector<8x256xf32>
    %122 = vector.broadcast %15 : vector<1x256xf32> to vector<8x256xf32>
    %123 = arith.mulf %121, %122 : vector<8x256xf32>
    %124 = tpu.concatenate %117, %120, %123 in 0 : vector<8x256xf32>, vector<8x256xf32>, vector<8x256xf32> -> vector<24x256xf32>
    %125 = arith.truncf %124 : vector<24x256xf32> to vector<24x256xbf16>
    %c2_48 = arith.constant 2 : index
    %c0_49 = arith.constant 0 : index
    %c0_50 = arith.constant 0 : index
    %126 = vector.load %arg6[%c2_48, %c0_49, %c0_50] : memref<3x1x24xbf16, #tpu.memory_space<vmem>>, vector<1x1x24xbf16>
    %127 = vector.shape_cast %126 : vector<1x1x24xbf16> to vector<1x24xbf16>
    %cst_51 = arith.constant dense<0.000000e+00> : vector<1x256xf32>
    %128 = tpu.matmul %127, %125, %cst_51 {dimension_numbers = #tpu.dot_dimension_numbers<[1], [0], [0], [1], [0, 0, 1, 1], [], []>} : vector<1x24xbf16>, vector<24x256xbf16>, vector<1x256xf32> -> vector<1x256xf32>
    %129 = arith.addf %114, %128 : vector<1x256xf32>
    %c0_52 = arith.constant 0 : index
    %c0_53 = arith.constant 0 : index
    %130 = vector.load %arg7[%c0_52, %c0_53] : memref<1x1xf32, #tpu.memory_space<vmem>>, vector<1x1xf32>
    %131 = vector.broadcast %130 : vector<1x1xf32> to vector<1x256xf32>
    %132 = arith.addf %129, %131 : vector<1x256xf32>
    %c0_54 = arith.constant 0 : index
    %c0_55 = arith.constant 0 : index
    %133 = vector.load %arg8[%c0_54, %c0_55] : memref<1x256xf32, #tpu.memory_space<vmem>>, vector<1x256xf32>
    tpu.vector_store %arg8[%c0_54, %c0_55], %132 {strides = array<i32>} : memref<1x256xf32, #tpu.memory_space<vmem>>, vector<1x256xf32>,
    return
  }
}

</mosaic_0001>

<bundles_post_ra>
// kernel: varnoise_forward.55
= control target key start
LH: loop header
LB: loop body
LE: loop exit
PB: predicated region body
PF: predicated region fallthrough
CT: control target
= control target key end

     0   :  { %s271_s9 = smov 0   ;;  %s291_s0 = inlined_call_operand.vmem [shape: f32[4,2,256], index: 0, kind: input, shape index: {}, may-alias: {0,2}]   ;;  %s292_s1 = inlined_call_operand.vmem [shape: f32[1,256], index: 1, kind: input, shape index: {}]   ;;  %s293_s2 = inlined_call_operand.vmem [shape: f32[4,2,256], index: 2, kind: output, shape index: {}, may-alias: {0,2}]  }
   0x1 LB: > { %s223_s10 = sadd.s32 4294967295, %s253_s9   ;;  %p227_p0 = scmp.ge.s32.totalorder %s253_s9, 1  ;;  %s253_s9 = sphi %s271_s9, %s12_s9  }
   0x2   : > { %p112_p1 = scmp.lt.s32.totalorder %s253_s9, 5 }
   0x4   : > { %p113_p2 = pnand %p227_p0, %p112_p1 }
   0x5   : > { %p134_p3 = scmp.lt.s32.totalorder (!%p113_p2), %s223_s10, 3 }
   0x6   : > { %116 = sbr.rel (%p113_p2) target bundleno = 37 (0x25), region = 28 }
   0xb   : > { %v144_v0 = vld [vmem:[%s292_s1] sm:$0x3]  ;;  %v149_v2 = vlaneseq  ;;  %v255_v4 = vmov 1983009808   ;;  %s295_s10 = smov (!%p134_p3, %s223_s10), 3 }
   0xc   : > { %v145_v1 = vadd.f32 1e-12, %v144_v0  ;;  %v159_v5 = vunpack.c.l.s4 %v255_v4  ;;  %s234_s13 = sshll.u32 %s295_s10, 2 }
   0xd   : > { %v150_v3 = vshrl.u32 %v149_v2, 7  ;;  %s138_s16 = scalar_lea.vmem %s291_s0, %s234_s13  ;;  %s143_s19 = scalar_lea.vmem %s293_s2, %s234_s13 }
   0xe   : > { %245 = vrsqrt.f32 %v145_v1  ;;  %v160_v8 = vunpack.c.0.s8 %v159_v5  ;;  %v147_v14 = vld [vmem:[%s138_s16] sm:$0xf] }
   0xf   : > { %v151_v6 = vsub.s32 0, %v150_v3  ;;  %v155_v7 = vsub.s32 1, %v150_v3 }
  0x10   : > { %v163_v12 = vsub.s32 %v160_v8, %v150_v3 }
  0x1b   : > { %v246_v9 = vpop.eup %245 }
  0x1c   : > { %v152_v10 = vrot.slane %v246_v9, %v151_v6  ;;  %v156_v11 = vrot.slane %v246_v9, %v155_v7 }
  0x1e   : > { %v157_v13 = vcombine.low %v152_v10, %v156_v11 }
  0x20   : > { %v164_v15 = vrot.slane %v157_v13, %v163_v12 }
  0x22   : > { %v166_v16 = vmul.f32 %v164_v15, %v147_v14 }
  0x24   : > { %167 = vst [vmem:[%s143_s19] sm:$0xf] %v166_v16 }
  0x25 PF: > { %s12_s9 = sadd.s32 1, %s253_s9  }
  0x26   : > { %p9_p4 = scmp.ge.s32.totalorder %s12_s9, 6  }
  0x28   :  { %11 = sbr.rel (!%p9_p4) target bundleno = 1 (0x1), region = 58 }

// kernel: varnoise_forward.54
= control target key start
LH: loop header
LB: loop body
LE: loop exit
PB: predicated region body
PF: predicated region fallthrough
CT: control target
= control target key end

     0   :  { %s200_s6 = smov 0   ;;  %s223_s0 = inlined_call_operand.vmem [shape: f32[4,2,256], index: 0, kind: input, shape index: {}]   ;;  %s224_s1 = inlined_call_operand.vmem [shape: f32[1,256], index: 1, kind: output, shape index: {}]  }
   0x1 LB: > { %s160_s7 = sadd.s32 4294967295, %s186_s6   ;;  %p163_p0 = scmp.ge.s32.totalorder %s186_s6, 1  ;;  %s186_s6 = sphi %s200_s6, %s11_s6  }
   0x2   : > { %p82_p1 = scmp.lt.s32.totalorder %s186_s6, 5 }
   0x4   : > { %p83_p2 = pnand %p163_p0, %p82_p1 }
   0x5   : > { %p97_p3 = scmp.lt.s32.totalorder (!%p83_p2), %s160_s7, 3  ;;  %p166_p4 = scmp.ne.s32.totalorder (!%p83_p2), %s160_s7, 0 }
   0x6   : > { %86 = sbr.rel (%p83_p2) target bundleno = 35 (0x23), region = 24 }
   0xb   : > { %s98_s8 = scalar_select %p97_p3, %s160_s7, 3 }
   0xc   : > { %105 = sbr.rel (%p166_p4) target bundleno = 21 (0x15), region = 28 }
   0xd   : > { %s169_s9 = sshll.u32 %s98_s8, 2 }
   0xe   : > { %s101_s12 = scalar_lea.vmem %s223_s0, %s169_s9 }
  0x11   : > { %v106_v0 = vlaneseq  ;;  %v188_v1 = vmov 0.0  }
  0x13   : > { %vm108_vm0 = vcmp.lt.s32.totalorder %v106_v0, 256 }
  0x14   : > { %110 = vst.msk [vmem:[%s224_s1] sm:$0x3] %vm108_vm0, %v188_v1 }
  0x15 PF: > { %v111_v2 = vld [vmem:[%s101_s12] sm:$0xf]  ;;  %v118_v3 = vlaneseq  ;;  %v189_v4 = vmov 1966171168  }
  0x16   : > { %v116_v5 = vunpack.c.l.s4 %v189_v4  ;;  %v113_v7 = vmul.f32 %v111_v2, %v111_v2 }
  0x17   : > { %v119_v6 = vshrl.u32 %v118_v3, 7  ;;  %vm129_vm1 = vcmp.lt.s32.totalorder %v118_v3, 256 }
  0x18   : > { %v117_v8 = vunpack.c.0.s8 %v116_v5 }
  0x1a   : > { %v120_v9 = vsub.s32 %v117_v8, %v119_v6 }
  0x1b   : > { %v112_v10 = vld [vmem:[%s224_s1] sm:$0x3] }
  0x1c   : > { %v121_v11 = vrot.slane %v113_v7, %v120_v9 }
  0x1e   : > { %v123_v12 = vadd.f32 %v121_v11, %v112_v10  ;;  %v124_v13 = vcombine.high %v121_v11, %v121_v11 }
  0x20   : > { %v126_v14 = vadd.f32 %v124_v13, %v123_v12 }
  0x22   : > { %131 = vst.msk [vmem:[%s224_s1] sm:$0x3] %vm129_vm1, %v126_v14 }
  0x23 PF: > { %s11_s6 = sadd.s32 1, %s186_s6  }
  0x24   : > { %p8_p5 = scmp.ge.s32.totalorder %s11_s6, 6  }
  0x26   :  { %10 = sbr.rel (!%p8_p5) target bundleno = 1 (0x1), region = 54 }

// kernel: varnoise_forward.56
= control target key start
LH: loop header
LB: loop body
LE: loop exit
PB: predicated region body
PF: predicated region fallthrough
CT: control target
= control target key end

     0   :  { %s267_s9 = smov 0   ;;  %s299_s0 = inlined_call_operand.vmem [shape: f32[4,2,256], index: 0, kind: input, shape index: {}]   ;;  %s300_s1 = inlined_call_operand.vmem [shape: f32[4,2,256], index: 1, kind: input, shape index: {}]   ;;  %s301_s2 = inlined_call_operand.vmem [shape: f32[2,256], index: 2, kind: output, shape index: {}]  }
   0x1 LB: > { %s217_s10 = sadd.s32 4294967295, %s249_s9   ;;  %p220_p0 = scmp.ge.s32.totalorder %s249_s9, 1  ;;  %s249_s9 = sphi %s267_s9, %s12_s9  }
   0x2   : > { %p117_p1 = scmp.lt.s32.totalorder %s249_s9, 5 }
   0x4   : > { %p118_p2 = pnand %p220_p0, %p117_p1 }
   0x5   : > { %p139_p3 = scmp.lt.s32.totalorder (!%p118_p2), %s217_s10, 3  ;;  %p225_p4 = scmp.ne.s32.totalorder (!%p118_p2), %s217_s10, 0 }
   0x6   : > { %121 = sbr.rel (%p118_p2) target bundleno = 29 (0x1d), region = 28 }
   0xb   : > { %s140_s11 = scalar_select %p139_p3, %s217_s10, 3 }
   0xc   : > { %152 = sbr.rel (%p225_p4) target bundleno = 19 (0x13), region = 32 }
   0xd   : > { %s232_s12 = sshll.u32 %s140_s11, 2 }
   0xe   : > { %s143_s15 = scalar_lea.vmem %s299_s0, %s232_s12  ;;  %s148_s18 = scalar_lea.vmem %s300_s1, %s232_s12 }
  0x11   : > { %v251_v0 = vmov 0.0  }
  0x12   : > { %153 = vst [vmem:[%s301_s2] sm:$0xf] %v251_v0 }
  0x13 PF: > { %v154_v1 = vld [vmem:[%s143_s15] ss:$2 sm:$0x3]  ;;  %v226_v2 = vld [vmem:[%s143_s15 + $0x1] ss:$2 sm:$0x3]  ;;  %v165_v5 = vlaneseq }
  0x14   : > { %v157_v3 = vld [vmem:[%s148_s18] ss:$2 sm:$0x3]  ;;  %v227_v4 = vld [vmem:[%s148_s18 + $0x1] ss:$2 sm:$0x3] }
  0x15   : > { %v161_v6 = vmul.f32 %v157_v3, %v154_v1  ;;  %v162_v7 = vmul.f32 %v227_v4, %v226_v2  ;;  %v172_v8 = vmul.f32 %v226_v2, %v157_v3  ;;  %v173_v10 = vmul.f32 %v227_v4, %v154_v1 }
  0x16   : > { %vm167_vm0 = vcmp.lt.s32.totalorder %v165_v5, 256 }
  0x17   : > { %v163_v11 = vadd.f32 %v162_v7, %v161_v6  ;;  %v174_v13 = vsub.f32 %v172_v8, %v173_v10 }
  0x19   : > { %v160_v9 = vld [vmem:[%s301_s2] ss:$2 sm:$0x3]  ;;  %v228_v12 = vld [vmem:[%s301_s2 + $0x1] ss:$2 sm:$0x3] }
  0x1a   : > { %v164_v14 = vadd.f32 %v163_v11, %v160_v9  ;;  %v175_v15 = vadd.f32 %v228_v12, %v174_v13 }
  0x1c   : > { %169 = vst.msk [vmem:[%s301_s2] ss:$2 sm:$0x3] %vm167_vm0, %v164_v14  ;;  %229 = vst.msk [vmem:[%s301_s2 + $0x1] ss:$2 sm:$0x3] %vm167_vm0, %v175_v15 }
  0x1d PF: > { %s12_s9 = sadd.s32 1, %s249_s9  }
  0x1e   : > { %p9_p5 = scmp.ge.s32.totalorder %s12_s9, 6  }
  0x20   :  { %11 = sbr.rel (!%p9_p5) target bundleno = 1 (0x1), region = 64 }

// kernel: varnoise_forward.53
= control target key start
LH: loop header
LB: loop body
LE: loop exit
PB: predicated region body
PF: predicated region fallthrough
CT: control target
= control target key end

     0   :  { %s954_s21 = smov 0   ;;  %s1227_s0 = inlined_call_operand.vmem [shape: f32[4,2,256], index: 0, kind: input, shape index: {}]   ;;  %s1228_s1 = inlined_call_operand.vmem [shape: f32[2,256], index: 1, kind: input, shape index: {}]   ;;  %s1229_s2 = inlined_call_operand.vmem [shape: bf16[1,8,18], index: 2, kind: input, shape index: {}]   ;;  %s1230_s3 = inlined_call_operand.vmem [shape: f32[8,1], index: 3, kind: input, shape index: {}]   ;;  %s1231_s4 = inlined_call_operand.vmem [shape: bf16[3,2,24], index: 4, kind: input, shape index: {}]   ;;  %s1232_s5 = inlined_call_operand.vmem [shape: f32[2,1], index: 5, kind: input, shape index: {}]   ;;  %s1233_s6 = inlined_call_operand.vmem [shape: f32[4,2,256], index: 6, kind: output, shape index: {}]  }
   0x1 LB: > { %s855_s22 = sadd.s32 4294967295, %s907_s21   ;;  %p859_p0 = scmp.ge.s32.totalorder %s907_s21, 1  ;;  %s907_s21 = sphi %s954_s21, %s16_s21  }
   0x2   : > { %p212_p1 = scmp.lt.s32.totalorder %s907_s21, 5 }
   0x4   : > { %p213_p2 = pnand %p859_p0, %p212_p1 }
   0x5   : > { %p242_p3 = scmp.lt.s32.totalorder (!%p213_p2), %s855_s22, 3  ;;  %s909_s27 = smov (!%p213_p2), 16  }
   0x6   : > { %216 = sbr.rel (%p213_p2) target bundleno = 725 (0x2d5), region = 44  ;;  %s910_s28 = smov (!%p213_p2), 127  }
   0x7   : > { %s911_s29 = smov (!%p213_p2), 15   ;;  %s912_s30 = smov (!%p213_p2), 113  }
   0x8   : > { %s913_s7 = smov (!%p213_p2), 111   ;;  %s914_s8 = smov (!%p213_p2), 17  }
   0x9   : > { %s915_s9 = smov (!%p213_p2), 1   ;;  %s917_s10 = smov (!%p213_p2), 112  }
   0xb   : > { %s1235_s22 = smov (!%p242_p3, %s855_s22), 3  ;;  %v916_v2 = vmov 0   ;;  %v486_v3 = vld [vmem:[%s1230_s3] sm:$0xff]  ;;  %v254_v4 = vlaneseq  ;;  %v918_v18 = vmov 0.0   ;;  %vm496_vm8 = vcmask 1040384  }
   0xc   : > { %s880_s23 = sshll.u32 %s1235_s22, 2  ;;  %535 = vmatprep.mubr.bf16.mxu0 %v916_v2  ;;  %900 = vset.pattern.permute.xlu0 %v916_v2  ;;  %v253_v13 = vld [vmem:[%s1228_s1] sm:$0xf]  ;;  %vm466_vm9 = vcmask 1041408   ;;  %vm469_vm10 = vcmask 1043456   ;;  %vm472_vm13 = vcmask 1045504  }
   0xd   : > { %s246_s26 = scalar_lea.vmem %s1227_s0, %s880_s23  ;;  %639 = vmatprep.mubr.bf16.mxu1 %v916_v2  ;;  %v1016_v7 = vand.u32 127, %v254_v4  ;;  %v271_v9 = vshrl.u32 %v254_v4, 7  ;;  %vm492_vm14 = vcmask 146432   ;;  %vm597_vm15 = vcmask 195584  }
   0xe   : > { %v970_v0 = vld.sshfl [vmem:[%s246_s26] sm:$0x33 pattern:$0x76325410] }
   0xf   : > { %327 = vrot.lane.b32.xlu1 %v970_v0, %s909_s27  ;;  %370 = vrot.lane.b32.xlu0 %v970_v0, %s910_s28  ;;  %v978_v1 = vcombine.high %v970_v0, %v970_v0  ;;  %v256_v8 = vadd.s32 128, %v1016_v7  ;;  %v288_v12 = vsub.s32 3, %v271_v9  ;;  %v284_v14 = vsub.s32 1, %v271_v9 }
  0x10   : > { %vm257_vm1 = vcmp.ge.s32.totalorder %v1016_v7, 16  ;;  %v276_v20 = vsub.s32 2, %v271_v9  ;;  %v272_v21 = vsub.s32 0, %v271_v9  ;;  %vm417_vm2 = vcmp.lt.s32.totalorder %v1016_v7, 111 }
  0x11   : > { %vm264_vm0 = vcmp.lt.s32.totalorder %v256_v8, 240  ;;  %v289_v15 = vrot.slane %v253_v13, %v288_v12  ;;  %v285_v23 = vrot.slane %v253_v13, %v284_v14  ;;  %v1030_v24 = vsel %vm257_vm1, 1.0, %v918_v18 }
  0x12   : > { %v1027_v19 = vsel %vm264_vm0, 1.0, %v918_v18  ;;  %v273_v26 = vrot.slane %v253_v13, %v272_v21  ;;  %v277_v28 = vrot.slane %v253_v13, %v276_v20  ;;  %vm331_vm3 = vcmp.lt.s32.totalorder %v1016_v7, 16 }
  0x13   : > { %336 = vrot.lane.b32.xlu0 %v970_v0, %s911_s29  ;;  %329 = vrot.lane.b32.xlu1 %v978_v1, %s909_s27  ;;  %v297_v22 = vmul.f32 %v1027_v19, %v289_v15  ;;  %v1033_v29 = vrot.slane %v285_v23, %v272_v21  ;;  %v292_v31 = vmul.f32 %v1030_v24, %v285_v23  ;;  %vm340_vm4 = vcmp.lt.s32.totalorder %v1016_v7, 15 }
  0x14   : > { %v1040_v32 = vrot.slane %v289_v15, %v272_v21  ;;  %vm374_vm5 = vcmp.lt.s32.totalorder %v1016_v7, 127  ;;  %v1043_v33 = vrot.slane %v273_v26, %v272_v21  ;;  %v295_v36 = vmul.f32 %v1027_v19, %v277_v28 }
  0x15   : > { %v1035_v30 = vrot.slane %v297_v22, %v272_v21  ;;  %v280_v39 = vmul.f32 %v1030_v24, %v273_v26  ;;  %v1051_v40 = vrot.slane %v285_v23, %v284_v14  ;;  %vm391_vm6 = vcmp.lt.s32.totalorder %v1016_v7, 113 }
  0x16   : > { %v1056_v43 = vrot.slane %v292_v31, %v272_v21  ;;  %v1058_v44 = vrot.slane %v289_v15, %v284_v14  ;;  %vm314_vm7 = vcmp.lt.s32.totalorder %v1016_v7, 17  ;;  %v1068_v52 = vrot.slane %v295_v36, %v272_v21 }
  0x17   : > { %338 = vrot.lane.b32.xlu1 %v978_v1, %s911_s29  ;;  %372 = vrot.lane.b32.xlu0 %v978_v1, %s910_s28  ;;  %v1072_v54 = vrot.slane %v280_v39, %v272_v21  ;;  %v1076_v56 = vrot.slane %v277_v28, %v272_v21  ;;  %vm357_vm11 = vcmp.lt.s32.totalorder %v1016_v7, 1  ;;  %vm408_vm12 = vcmp.lt.s32.totalorder %v1016_v7, 112 }
  0x1b   : > { %389 = vrot.lane.b32.xlu1 %v978_v1, %s912_s30  ;;  %387 = vrot.lane.b32.xlu0 %v970_v0, %s912_s30 }
  0x1f   : > { %415 = vrot.lane.b32.xlu1 %v978_v1, %s913_s7  ;;  %413 = vrot.lane.b32.xlu0 %v970_v0, %s913_s7 }
  0x23   : > { %312 = vrot.lane.b32.xlu1 %v978_v1, %s914_s8  ;;  %310 = vrot.lane.b32.xlu0 %v970_v0, %s914_s8 }
  0x27   : > { %355 = vrot.lane.b32.xlu1 %v978_v1, %s915_s9  ;;  %353 = vrot.lane.b32.xlu0 %v970_v0, %s915_s9 }
  0x2b   : > { %406 = vrot.lane.b32.xlu1 %v978_v1, %s917_s10  ;;  %404 = vrot.lane.b32.xlu0 %v970_v0, %s917_s10 }
  0x2f   : > { %489 = vperm.xlu0 %900, %v486_v3  }
  0x81   : > { %v1014_v5 = vpop.permute.xlu1 %327  ;;  %v371_v6 = vpop.permute.xlu0 %370 }
  0x85   : > { %v1019_v10 = vpop.permute.xlu0 %336  ;;  %v330_v11 = vpop.permute.xlu1 %329 }
  0x86   : > { %v333_v45 = vsel %vm331_vm3, %v330_v11, %v1014_v5  ;;  %v332_v58 = vsel %vm331_vm3, %v1014_v5, %v330_v11 }
  0x87   : > { %v334_v59 = vmul.f32 %v1030_v24, %v333_v45  ;;  %v433_v18 = vrot.slane %v332_v58, 6 }
  0x89   : > { %v1024_v16 = vpop.permute.xlu1 %338  ;;  %v373_v17 = vpop.permute.xlu0 %372  ;;  %v432_v26 = vrot.slane %v334_v59, 6 }
  0x8a   : > { %v375_v46 = vsel %vm374_vm5, %v371_v6, %v373_v17  ;;  %v376_v51 = vsel %vm374_vm5, %v373_v17, %v371_v6  ;;  %v341_v62 = vsel %vm340_vm4, %v1019_v10, %v1024_v16  ;;  %v342_v8 = vsel %vm340_vm4, %v1024_v16, %v1019_v10 }
  0x8b   : > { %v385_v60 = vmul.f32 %v1051_v40, %v375_v46  ;;  %v386_v63 = vmul.f32 %v1058_v44, %v376_v51  ;;  %v352_v15 = vmul.f32 %v1040_v32, %v341_v62  ;;  %v351_v20 = vmul.f32 %v1056_v43, %v342_v8 }
  0x8d   : > { %v390_v25 = vpop.permute.xlu1 %389  ;;  %v388_v27 = vpop.permute.xlu0 %387  ;;  %v450_v17 = vrot.slane %v385_v60, 6  ;;  %v451_v21 = vrot.slane %v386_v63, 6  ;;  %v438_v45 = vrot.slane %v351_v20, 4 }
  0x8e   : > { %v392_v53 = vsel %vm391_vm6, %v388_v27, %v390_v25  ;;  %v393_v55 = vsel %vm391_vm6, %v390_v25, %v388_v27 }
  0x8f   : > { %v402_v3 = vmul.f32 %v392_v53, %v1043_v33  ;;  %v403_v9 = vmul.f32 %v1068_v52, %v393_v55  ;;  %v475_v39 = vsel %vm466_vm9, %v970_v0, %v450_v17  ;;  %v476_v46 = vsel %vm466_vm9, %v978_v1, %v451_v21  ;;  %v485_v1 = vld [vmem:[%s1229_s2] sm:$0xf] }
  0x91   : > { %v416_v34 = vpop.permute.xlu1 %415  ;;  %v414_v35 = vpop.permute.xlu0 %413  ;;  %v456_v22 = vrot.slane %v402_v3, 4  ;;  %v457_v27 = vrot.slane %v403_v9, 4  ;;  %v780_v9 = vld [vmem:[%s1232_s5] sm:$0x3] }
  0x92   : > { %v418_v37 = vsel %vm417_vm2, %v414_v35, %v416_v34  ;;  %v419_v38 = vsel %vm417_vm2, %v416_v34, %v414_v35 }
  0x93   : > { %v428_v41 = vmul.f32 %v1033_v29, %v418_v37  ;;  %v429_v42 = vmul.f32 %v1035_v30, %v419_v38  ;;  %v439_v38 = vrot.slane %v352_v15, 4 }
  0x95   : > { %v313_v47 = vpop.permute.xlu1 %312  ;;  %v311_v48 = vpop.permute.xlu0 %310  ;;  %v484_v49 = vpack.c.bf16 %v429_v42, %v429_v42  ;;  %v483_v50 = vpack.c.bf16 %v428_v41, %v428_v41 }
  0x96   : > { %v315_v61 = vsel %vm314_vm7, %v311_v48, %v313_v47  ;;  %v316_v4 = vsel %vm314_vm7, %v313_v47, %v311_v48  ;;  %v477_v48 = vsel %vm469_vm10, %v475_v39, %v456_v22  ;;  %v869_v39 = vld [vmem:[%s1231_s4 + $0x1] sm:$0x1] }
  0x97   : > { %867 = vmatprep.subr.msk.bf16.mxu0 %vm496_vm8, %v484_v49  ;;  %v498_v57 = vsel %vm496_vm8, %v483_v50, 0  ;;  %v326_v13 = vmul.f32 %v1076_v56, %v315_v61  ;;  %v325_v10 = vmul.f32 %v1072_v54, %v316_v4  ;;  %v478_v50 = vsel %vm469_vm10, %v476_v46, %v457_v27 }
  0x98   : > { %516 = vmatpush1.bf16.msra.mxu0 %v498_v57 }
  0x99   : > { %v356_v5 = vpop.permute.xlu1 %355  ;;  %v354_v6 = vpop.permute.xlu0 %353  ;;  %v468_v34 = vsel %vm466_vm9, %v326_v13, %v433_v18  ;;  %v467_v41 = vsel %vm466_vm9, %v325_v10, %v432_v26 }
  0x9a   : > { %v358_v11 = vsel %vm357_vm11, %v354_v6, %v356_v5  ;;  %v359_v12 = vsel %vm357_vm11, %v356_v5, %v354_v6  ;;  %v471_v49 = vsel %vm469_vm10, %v468_v34, %v439_v38  ;;  %v470_v55 = vsel %vm469_vm10, %v467_v41, %v438_v45 }
  0x9b   : > { %v369_v14 = vmul.f32 %v358_v11, %v1076_v56  ;;  %v368_v16 = vmul.f32 %v1043_v33, %v359_v12 }
  0x9d   : > { %v407_v23 = vpop.permute.xlu1 %406  ;;  %v405_v25 = vpop.permute.xlu0 %404  ;;  %v445_v35 = vrot.slane %v369_v14, 2  ;;  %v444_v42 = vrot.slane %v368_v16, 2 }
  0x9e   : > { %v409_v28 = vsel %vm408_vm12, %v405_v25, %v407_v23  ;;  %v410_v31 = vsel %vm408_vm12, %v407_v23, %v405_v25 }
  0x9f   : > { %v412_v36 = vmul.f32 %v1027_v19, %v410_v31  ;;  %v462_v37 = vrot.slane %v409_v28, 2  ;;  %v474_v53 = vsel %vm472_vm13, %v471_v49, %v445_v35  ;;  %v473_v58 = vsel %vm472_vm13, %v470_v55, %v444_v42 }
  0xa1   : > { %v463_v47 = vrot.slane %v412_v36, 2  ;;  %v479_v51 = vsel %vm472_vm13, %v477_v48, %v462_v37 }
  0xa2   : > { %v481_v59 = vpack.c.bf16 %v479_v51, %v473_v58 }
  0xa3   : > { %v480_v0 = vsel %vm472_vm13, %v478_v50, %v463_v47 }
  0xa4   : > { %v482_v57 = vpack.c.bf16 %v480_v0, %v474_v53 }
  0xa6   : > { %517 = vmatprep.subr.bf16.mxu0 %v482_v57 }
  0xa7   : > { %518 = vmatpush1.bf16.msra.mxu0 %v481_v59 }
  0xaa   : > { %868 = vmatmul.mubr.msk.bf16.vlgmr.msra.gmra.mxu0 %vm492_vm14, %v485_v1  ;;  %v490_v60 = vpop.permute.xlu0 %489 }
  0xab   : > { %689 = vmatprep.mubr.bf16.mxu0 %v916_v2 }
 0x16a   : > { %v537_v61 = vpop.f32.mrf.mxu0 }
 0x16b   : > { %v538_v62 = vadd.f32 %v537_v61, %v490_v60 }
 0x16c   : > { %v539_v63 = vpop.f32.mrf.mxu0 }
 0x16d   : > { %v544_v3 = vmax.f32 %v538_v62, 0.0  ;;  %v540_v4 = vadd.f32 %v539_v63, %v490_v60 }
 0x16e   : > { %v541_v5 = vpop.f32.mrf.mxu0 }
 0x16f   : > { %575 = vrot.lane.b32.xlu0 %v544_v3, %s915_s9  ;;  %583 = vrot.lane.b32.xlu1 %v544_v3, %s910_s28  ;;  %v545_v8 = vmax.f32 %v540_v4, 0.0 }
 0x170   : > { %v542_v6 = vpop.f32.mrf.mxu0 }
 0x173   : > { %562 = vrot.lane.b32.xlu0 %v544_v3, %s911_s29  ;;  %585 = vrot.lane.b32.xlu1 %v545_v8, %s910_s28 }
 0x177   : > { %714 = vrot.lane.b32.xlu0 %v544_v3, %s913_s7  ;;  %577 = vrot.lane.b32.xlu1 %v545_v8, %s915_s9 }
 0x17b   : > { %546 = vrot.lane.b32.xlu0 %v544_v3, %s914_s8  ;;  %564 = vrot.lane.b32.xlu1 %v545_v8, %s911_s29 }
 0x17f   : > { %554 = vrot.lane.b32.xlu0 %v544_v3, %s909_s27  ;;  %716 = vrot.lane.b32.xlu1 %v545_v8, %s913_s7 }
 0x183   : > { %698 = vrot.lane.b32.xlu0 %v544_v3, %s912_s30  ;;  %548 = vrot.lane.b32.xlu1 %v545_v8, %s914_s8 }
 0x187   : > { %706 = vrot.lane.b32.xlu0 %v544_v3, %s917_s10  ;;  %556 = vrot.lane.b32.xlu1 %v545_v8, %s909_s27 }
 0x18b   : > { %783 = vperm.xlu0 %900, %v780_v9   ;;  %700 = vrot.lane.b32.xlu1 %v545_v8, %s912_s30  ;;  %s251_s30 = scalar_lea.vmem %s1233_s6, %s880_s23 }
 0x18f   : > { %708 = vrot.lane.b32.xlu1 %v545_v8, %s917_s10 }
 0x1e1   : > { %v576_v11 = vpop.permute.xlu0 %575  ;;  %v584_v12 = vpop.permute.xlu1 %583 }
 0x1e5   : > { %v563_v13 = vpop.permute.xlu0 %562  ;;  %v586_v14 = vpop.permute.xlu1 %585 }
 0x1e6   : > { %v587_v15 = vsel %vm374_vm5, %v584_v12, %v586_v14  ;;  %v588_v17 = vsel %vm374_vm5, %v586_v14, %v584_v12  ;;  %v874_v14 = vld [vmem:[%s1231_s4 + $0x2] sm:$0x1] }
 0x1e7   : > { %v589_v10 = vmul.f32 %v587_v15, %v1051_v40  ;;  %v590_v16 = vmul.f32 %v588_v17, %v1058_v44 }
 0x1e9   : > { %v715_v18 = vpop.permute.xlu0 %714  ;;  %v578_v20 = vpop.permute.xlu1 %577  ;;  %v594_v21 = vpack.c.bf16 %v590_v16, %v590_v16  ;;  %v593_v22 = vpack.c.bf16 %v589_v10, %v589_v10 }
 0x1ea   : > { %v579_v23 = vsel %vm357_vm11, %v576_v11, %v578_v20  ;;  %v580_v25 = vsel %vm357_vm11, %v578_v20, %v576_v11 }
 0x1eb   : > { %v581_v26 = vmul.f32 %v580_v25, %v1043_v33  ;;  %v582_v27 = vmul.f32 %v579_v23, %v1076_v56  ;;  %870 = vmatprep.subr.msk.bf16.mxu1 %vm469_vm10, %v594_v21  ;;  %v602_v40 = vsel %vm469_vm10, %v593_v22, 0 }
 0x1ec   : > { %620 = vmatpush1.bf16.msra.mxu1 %v602_v40 }
 0x1ed   : > { %v565_v44 = vpop.permute.xlu1 %564  ;;  %v592_v28 = vpack.c.bf16 %v545_v8, %v582_v27  ;;  %v591_v31 = vpack.c.bf16 %v544_v3, %v581_v26  ;;  %v547_v36 = vpop.permute.xlu0 %546 }
 0x1ee   : > { %v566_v34 = vsel %vm340_vm4, %v563_v13, %v565_v44  ;;  %v567_v35 = vsel %vm340_vm4, %v565_v44, %v563_v13 }
 0x1ef   : > { %v568_v37 = vmul.f32 %v567_v35, %v1056_v43  ;;  %v569_v38 = vmul.f32 %v566_v34, %v1040_v32  ;;  %621 = vmatprep.subr.bf16.mxu1 %v592_v28 }
 0x1f0   : > { %622 = vmatpush1.bf16.msra.mxu1 %v591_v31 }
 0x1f1   : > { %v572_v41 = vpack.c.bf16 %v568_v37, %v568_v37  ;;  %v573_v42 = vpack.c.bf16 %v569_v38, %v569_v38  ;;  %v717_v45 = vpop.permute.xlu1 %716  ;;  %v555_v49 = vpop.permute.xlu0 %554 }
 0x1f2   : > { %v718_v46 = vsel %vm417_vm2, %v715_v18, %v717_v45  ;;  %v719_v47 = vsel %vm417_vm2, %v717_v45, %v715_v18 }
 0x1f3   : > { %v720_v43 = vmul.f32 %v718_v46, %v1033_v29  ;;  %v721_v32 = vmul.f32 %v719_v47, %v1035_v30  ;;  %872 = vmatprep.subr.msk.bf16.mxu0 %vm469_vm10, %v573_v42  ;;  %v652_v48 = vsel %vm469_vm10, %v572_v41, 0  ;;  %871 = vmatmul.mubr.msk.bf16.vlgmr.msra.gmra.mxu1 %vm597_vm15, %v869_v39 }
 0x1f4   : > { %670 = vmatpush1.bf16.msra.mxu0 %v652_v48  ;;  %769 = vmatprep.mubr.bf16.mxu1 %v916_v2 }
 0x1f5   : > { %v724_v50 = vpack.c.bf16 %v720_v43, %v720_v43  ;;  %v725_v51 = vpack.c.bf16 %v721_v32, %v721_v32  ;;  %v549_v53 = vpop.permute.xlu1 %548  ;;  %v699_v59 = vpop.permute.xlu0 %698 }
 0x1f6   : > { %v550_v0 = vsel %vm314_vm7, %v547_v36, %v549_v53  ;;  %v551_v30 = vsel %vm314_vm7, %v549_v53, %v547_v36 }
 0x1f7   : > { %875 = vmatprep.subr.msk.bf16.mxu1 %vm469_vm10, %v725_v51  ;;  %v732_v29 = vsel %vm469_vm10, %v724_v50, 0  ;;  %v553_v55 = vmul.f32 %v550_v0, %v1076_v56  ;;  %v552_v1 = vmul.f32 %v551_v30, %v1072_v54  ;;  %v574_v56 = vld [vmem:[%s1231_s4] sm:$0x1] }
 0x1f8   : > { %750 = vmatpush1.bf16.msra.mxu1 %v732_v29 }
 0x1f9   : > { %v557_v57 = vpop.permute.xlu1 %556  ;;  %v707_v4 = vpop.permute.xlu0 %706 }
 0x1fa   : > { %v558_v2 = vsel %vm331_vm3, %v555_v49, %v557_v57  ;;  %v559_v58 = vsel %vm331_vm3, %v557_v57, %v555_v49 }
 0x1fb   : > { %v560_v60 = vmul.f32 %v1030_v24, %v559_v58  ;;  %v571_v61 = vpack.c.bf16 %v558_v2, %v553_v55 }
 0x1fd   : > { %v570_v62 = vpack.c.bf16 %v560_v60, %v552_v1  ;;  %671 = vmatprep.subr.bf16.mxu0 %v571_v61  ;;  %v701_v63 = vpop.permute.xlu1 %700 }
 0x1fe   : > { %v703_v3 = vsel %vm391_vm6, %v701_v63, %v699_v59  ;;  %v702_v5 = vsel %vm391_vm6, %v699_v59, %v701_v63 }
 0x1ff   : > { %672 = vmatpush1.bf16.msra.mxu0 %v570_v62  ;;  %v705_v54 = vmul.f32 %v703_v3, %v1068_v52  ;;  %v704_v11 = vmul.f32 %v702_v5, %v1043_v33 }
 0x201   : > { %v709_v6 = vpop.permute.xlu1 %708 }
 0x202   : > { %v711_v24 = vsel %vm408_vm12, %v709_v6, %v707_v4  ;;  %873 = vmatmul.mubr.msk.bf16.vlgmr.msra.gmra.mxu0 %vm597_vm15, %v574_v56  ;;  %v710_v8 = vsel %vm408_vm12, %v707_v4, %v709_v6 }
 0x203   : > { %v713_v9 = vmul.f32 %v1027_v19, %v711_v24  ;;  %v722_v13 = vpack.c.bf16 %v710_v8, %v704_v11 }
 0x205   : > { %v723_v12 = vpack.c.bf16 %v713_v9, %v705_v54 }
 0x206   : > { %v784_v26 = vpop.permute.xlu0 %783 }
 0x207   : > { %751 = vmatprep.subr.bf16.mxu1 %v723_v12 }
 0x208   : > { %752 = vmatpush1.bf16.msra.mxu1 %v722_v13 }
 0x20b   : > { %876 = vmatmul.mubr.msk.bf16.vlgmr.msra.gmra.mxu1 %vm597_vm15, %v874_v14 }
 0x2b3   : > { %v641_v15 = vpop.f32.mrf.mxu1 }
 0x2b5   : > { %v643_v17 = vpop.f32.mrf.mxu1 }
 0x2b7   : > { %v645_v52 = vpop.f32.mrf.mxu1 }
 0x2b9   : > { %v646_v7 = vpop.f32.mrf.mxu1 }
 0x2c2   : > { %v691_v10 = vpop.f32.mrf.mxu0 }
 0x2c3   : > { %v692_v33 = vadd.f32 %v691_v10, %v641_v15 }
 0x2c4   : > { %v693_v16 = vpop.f32.mrf.mxu0 }
 0x2c5   : > { %v694_v21 = vadd.f32 %v693_v16, %v643_v17 }
 0x2c6   : > { %v695_v19 = vpop.f32.mrf.mxu0 }
 0x2c8   : > { %v696_v18 = vpop.f32.mrf.mxu0 }
 0x2cb   : > { %v771_v20 = vpop.f32.mrf.mxu1 }
 0x2cc   : > { %v778_v22 = vadd.f32 %v771_v20, %v692_v33 }
 0x2cd   : > { %v773_v23 = vpop.f32.mrf.mxu1 }
 0x2ce   : > { %v779_v25 = vadd.f32 %v773_v23, %v694_v21  ;;  %v786_v40 = vadd.f32 %v784_v26, %v778_v22 }
 0x2cf   : > { %v775_v27 = vpop.f32.mrf.mxu1 }
 0x2d0   : > { %v787_v44 = vadd.f32 %v784_v26, %v779_v25 }
 0x2d1   : > { %v776_v28 = vpop.f32.mrf.mxu1 }
 0x2d2   : > { %v790_v31 = vcombine.low %v786_v40, %v787_v44 }
 0x2d4   : > { %877 = vst.sshfl [vmem:[%s251_s30] sm:$0x33 pattern:$0x76325410] %v790_v31 }
 0x2d5 PF: > { %s16_s21 = sadd.s32 1, %s907_s21  }
 0x2d6   : > { %p13_p4 = scmp.ge.s32.totalorder %s16_s21, 6  }
 0x2d8   :  { %15 = sbr.rel (!%p13_p4) target bundleno = 1 (0x1), region = 76 }

// kernel: varnoise_forward.58
= control target key start
LH: loop header
LB: loop body
LE: loop exit
PB: predicated region body
PF: predicated region fallthrough
CT: control target
= control target key end

     0   :  { %s265_s9 = smov 0   ;;  %s282_s0 = inlined_call_operand.vmem [shape: f32[2,256], index: 0, kind: input, shape index: {}]   ;;  %s283_s1 = inlined_call_operand.vmem [shape: f32[4,2,256], index: 1, kind: input, shape index: {}]   ;;  %s284_s2 = inlined_call_operand.vmem [shape: f32[4,2,256], index: 2, kind: output, shape index: {}]  }
   0x1 LB: > { %s218_s10 = sadd.s32 4294967295, %s248_s9   ;;  %p222_p0 = scmp.ge.s32.totalorder %s248_s9, 1  ;;  %s248_s9 = sphi %s265_s9, %s12_s9  }
   0x2   : > { %p112_p1 = scmp.lt.s32.totalorder %s248_s9, 5 }
   0x4   : > { %p113_p2 = pnand %p222_p0, %p112_p1 }
   0x5   : > { %p134_p3 = scmp.lt.s32.totalorder (!%p113_p2), %s218_s10, 3 }
   0x6   : > { %116 = sbr.rel (%p113_p2) target bundleno = 20 (0x14), region = 28 }
   0xb   : > { %s286_s10 = smov (!%p134_p3, %s218_s10), 3  ;;  %v144_v0 = vld [vmem:[%s282_s0] ss:$2 sm:$0x3]  ;;  %v153_v2 = vlaneseq }
   0xc   : > { %s232_s13 = sshll.u32 %s286_s10, 2  ;;  %v227_v1 = vld [vmem:[%s282_s0 + $0x1] ss:$2 sm:$0x3] }
   0xd   : > { %s138_s18 = scalar_lea.vmem %s283_s1, %s232_s13  ;;  %s143_s21 = scalar_lea.vmem %s284_s2, %s232_s13  ;;  %vm155_vm0 = vcmp.lt.s32.totalorder %v153_v2, 256 }
   0xe   : > { %v147_v3 = vld [vmem:[%s138_s18] ss:$2 sm:$0x3]  ;;  %v228_v4 = vld [vmem:[%s138_s18 + $0x1] ss:$2 sm:$0x3] }
   0xf   : > { %v150_v5 = vmul.f32 %v147_v3, %v144_v0  ;;  %v151_v6 = vmul.f32 %v228_v4, %v227_v1  ;;  %v158_v7 = vmul.f32 %v227_v1, %v147_v3  ;;  %v159_v8 = vmul.f32 %v228_v4, %v144_v0 }
  0x11   : > { %v152_v9 = vsub.f32 %v150_v5, %v151_v6  ;;  %v160_v10 = vadd.f32 %v159_v8, %v158_v7 }
  0x13   : > { %157 = vst.msk [vmem:[%s143_s21] ss:$2 sm:$0x3] %vm155_vm0, %v152_v9  ;;  %229 = vst.msk [vmem:[%s143_s21 + $0x1] ss:$2 sm:$0x3] %vm155_vm0, %v160_v10 }
  0x14 PF: > { %s12_s9 = sadd.s32 1, %s248_s9  }
  0x15   : > { %p9_p4 = scmp.ge.s32.totalorder %s12_s9, 6  }
  0x17   :  { %11 = sbr.rel (!%p9_p4) target bundleno = 1 (0x1), region = 61 }

// kernel: varnoise_forward.57
= control target key start
LH: loop header
LB: loop body
LE: loop exit
PB: predicated region body
PF: predicated region fallthrough
CT: control target
= control target key end

     0   :  { %s930_s23 = smov 16   ;;  %s931_s24 = smov 127   ;;  %v1661_v2 = vmov 0   ;;  %v25_v6 = vlaneseq  ;;  %v939_v20 = vmov 0.0   ;;  %vm292_vm8 = vcmask 1040384   ;;  %s1654_s0 = inlined_call_operand.vmem [shape: f32[2,256], index: 0, kind: input, shape index: {}]   ;;  %s1655_s2 = inlined_call_operand.vmem [shape: bf16[1,18,18], index: 2, kind: input, shape index: {}]   ;;  %s1656_s3 = inlined_call_operand.vmem [shape: f32[18,1], index: 3, kind: input, shape index: {}]   ;;  %s1657_s1 = inlined_call_operand.vmem [shape: f32[2,256], index: 1, kind: input, shape index: {}]   ;;  %s1658_s5 = inlined_call_operand.vmem [shape: f32[2,1], index: 5, kind: input, shape index: {}]   ;;  %s1659_s4 = inlined_call_operand.vmem [shape: bf16[3,2,54], index: 4, kind: input, shape index: {}]   ;;  %s1660_s6 = inlined_call_operand.vmem [shape: f32[2,256], index: 6, kind: output, shape index: {}]  }
   0x1   :  { %v978_v0 = vld.sshfl [vmem:[%s1654_s0] sm:$0x33 pattern:$0x76325410]  ;;  %s932_s0 = smov 15   ;;  %s933_s25 = smov 113   ;;  %331 = vmatprep.mubr.bf16.mxu0 %v1661_v2  ;;  %927 = vset.pattern.permute.xlu1 %v1661_v2 }
   0x2   :  { %98 = vrot.lane.b32.xlu1 %v978_v0, %s930_s23  ;;  %141 = vrot.lane.b32.xlu0 %v978_v0, %s931_s24  ;;  %v986_v1 = vcombine.high %v978_v0, %v978_v0  ;;  %s934_s26 = smov 111   ;;  %s935_s27 = smov 17   ;;  %v261_v3 = vld [vmem:[%s1656_s3 + $0x10] sm:$0x3]  ;;  %v260_v4 = vld [vmem:[%s1656_s3 + $0x8] sm:$0xff]  ;;  %v1031_v9 = vand.u32 127, %v25_v6 }
   0x3   :  { %s936_s28 = smov 1   ;;  %926 = vset.pattern.permute.xlu0 %v1661_v2  ;;  %634 = vmatprep.mubr.bf16.mxu1 %v1661_v2  ;;  %s938_s29 = smov 112   ;;  %v259_v5 = vld [vmem:[%s1656_s3] sm:$0xff]  ;;  %v42_v10 = vshrl.u32 %v25_v6, 7  ;;  %vm237_vm9 = vcmask 1041408   ;;  %vm240_vm11 = vcmask 1043456  }
   0x4   :  { %v27_v11 = vadd.s32 128, %v1031_v9  ;;  %v24_v15 = vld [vmem:[%s1657_s1] sm:$0xf]  ;;  %vm28_vm1 = vcmp.ge.s32.totalorder %v1031_v9, 16  ;;  %vm188_vm2 = vcmp.lt.s32.totalorder %v1031_v9, 111  ;;  %vm102_vm3 = vcmp.lt.s32.totalorder %v1031_v9, 16 }
   0x5   :  { %v59_v13 = vsub.s32 3, %v42_v10  ;;  %v55_v16 = vsub.s32 1, %v42_v10  ;;  %v47_v22 = vsub.s32 2, %v42_v10  ;;  %v43_v23 = vsub.s32 0, %v42_v10 }
   0x6   :  { %100 = vrot.lane.b32.xlu1 %v986_v1, %s930_s23  ;;  %143 = vrot.lane.b32.xlu0 %v986_v1, %s931_s24  ;;  %vm35_vm0 = vcmp.lt.s32.totalorder %v27_v11, 240  ;;  %v1045_v25 = vsel %vm28_vm1, 1.0, %v939_v20  ;;  %vm145_vm4 = vcmp.lt.s32.totalorder %v1031_v9, 127  ;;  %vm111_vm5 = vcmp.lt.s32.totalorder %v1031_v9, 15 }
   0x7   :  { %v60_v17 = vrot.slane %v24_v15, %v59_v13  ;;  %v1042_v21 = vsel %vm35_vm0, 1.0, %v939_v20  ;;  %v44_v26 = vrot.slane %v24_v15, %v43_v23  ;;  %v56_v27 = vrot.slane %v24_v15, %v55_v16 }
   0x8   :  { %v48_v30 = vrot.slane %v24_v15, %v47_v22  ;;  %vm162_vm6 = vcmp.lt.s32.totalorder %v1031_v9, 113  ;;  %vm85_vm7 = vcmp.lt.s32.totalorder %v1031_v9, 17  ;;  %vm128_vm10 = vcmp.lt.s32.totalorder %v1031_v9, 1 }
   0x9   :  { %v68_v24 = vmul.f32 %v1042_v21, %v60_v17  ;;  %v1048_v31 = vrot.slane %v56_v27, %v43_v23  ;;  %v63_v33 = vmul.f32 %v1045_v25, %v56_v27  ;;  %v1055_v34 = vrot.slane %v44_v26, %v43_v23 }
   0xa   :  { %109 = vrot.lane.b32.xlu1 %v986_v1, %s932_s0  ;;  %107 = vrot.lane.b32.xlu0 %v978_v0, %s932_s0  ;;  %v51_v37 = vmul.f32 %v1045_v25, %v44_v26  ;;  %v1060_v38 = vrot.slane %v56_v27, %v55_v16  ;;  %v66_v39 = vmul.f32 %v1042_v21, %v48_v30  ;;  %vm179_vm12 = vcmp.lt.s32.totalorder %v1031_v9, 112 }
   0xb   :  { %v1050_v32 = vrot.slane %v68_v24, %v43_v23  ;;  %v1067_v42 = vrot.slane %v60_v17, %v55_v16  ;;  %v1069_v43 = vrot.slane %v60_v17, %v43_v23  ;;  %v1073_v46 = vrot.slane %v63_v33, %v43_v23 }
   0xc   :  { %v1075_v47 = vrot.slane %v48_v30, %v43_v23  ;;  %v1085_v55 = vrot.slane %v66_v39, %v43_v23  ;;  %v1089_v57 = vrot.slane %v51_v37, %v43_v23  ;;  %vm243_vm13 = vcmask 1045504  }
   0xd   :  { %vm285_vm14 = vcmask 146432   ;;  %vm595_vm15 = vcmask 1042432   ;;  %vm591_vm0 = vcmask 441344  }
   0xe   :  { %160 = vrot.lane.b32.xlu1 %v986_v1, %s933_s25  ;;  %158 = vrot.lane.b32.xlu0 %v978_v0, %s933_s25 }
  0x12   :  { %186 = vrot.lane.b32.xlu1 %v986_v1, %s934_s26  ;;  %184 = vrot.lane.b32.xlu0 %v978_v0, %s934_s26 }
  0x16   :  { %83 = vrot.lane.b32.xlu1 %v986_v1, %s935_s27  ;;  %81 = vrot.lane.b32.xlu0 %v978_v0, %s935_s27 }
  0x1a   :  { %126 = vrot.lane.b32.xlu1 %v986_v1, %s936_s28  ;;  %124 = vrot.lane.b32.xlu0 %v978_v0, %s936_s28 }
  0x1e   :  { %177 = vrot.lane.b32.xlu1 %v986_v1, %s938_s29  ;;  %175 = vrot.lane.b32.xlu0 %v978_v0, %s938_s29 }
  0x22   :  { %274 = vperm.xlu1 %927, %v261_v3   ;;  %269 = vperm.xlu0 %926, %v260_v4  }
  0x26   :  { %264 = vperm.xlu1 %927, %v259_v5  }
  0x74   :  { %v1029_v7 = vpop.permute.xlu1 %98  ;;  %v142_v8 = vpop.permute.xlu0 %141 }
  0x78   :  { %v101_v12 = vpop.permute.xlu1 %100  ;;  %v144_v14 = vpop.permute.xlu0 %143 }
  0x79   :  { %v104_v48 = vsel %vm102_vm3, %v101_v12, %v1029_v7  ;;  %v146_v49 = vsel %vm145_vm4, %v142_v8, %v144_v14  ;;  %v147_v54 = vsel %vm145_vm4, %v144_v14, %v142_v8  ;;  %v103_v60 = vsel %vm102_vm3, %v1029_v7, %v101_v12 }
  0x7a   :  { %v105_v61 = vmul.f32 %v1045_v25, %v104_v48  ;;  %v156_v62 = vmul.f32 %v1060_v38, %v146_v49  ;;  %v157_v3 = vmul.f32 %v1067_v42, %v147_v54  ;;  %v204_v20 = vrot.slane %v103_v60, 6 }
  0x7c   :  { %v1037_v18 = vpop.permute.xlu1 %109  ;;  %v1039_v19 = vpop.permute.xlu0 %107  ;;  %v221_v16 = vrot.slane %v156_v62, 6  ;;  %v222_v22 = vrot.slane %v157_v3, 6  ;;  %v929_v62 = vld [vmem:[%s1655_s2 + $0x8] ss:$0 sps:$4 sm:$0x11]  }
  0x7d   :  { %v112_v4 = vsel %vm111_vm5, %v1039_v19, %v1037_v18  ;;  %v113_v10 = vsel %vm111_vm5, %v1037_v18, %v1039_v19 }
  0x7e   :  { %v123_v17 = vmul.f32 %v1069_v43, %v112_v4  ;;  %v122_v23 = vmul.f32 %v1073_v46, %v113_v10  ;;  %v247_v48 = vsel %vm237_vm9, %v986_v1, %v222_v22 }
  0x80   :  { %v161_v28 = vpop.permute.xlu1 %160  ;;  %v159_v29 = vpop.permute.xlu0 %158  ;;  %v209_v49 = vrot.slane %v122_v23, 4 }
  0x81   :  { %v163_v56 = vsel %vm162_vm6, %v159_v29, %v161_v28  ;;  %v164_v58 = vsel %vm162_vm6, %v161_v28, %v159_v29  ;;  %v203_v28 = vrot.slane %v105_v61, 6  ;;  %v928_v61 = vld [vmem:[%s1655_s2] sm:$0xff]  }
  0x82   :  { %v173_v5 = vmul.f32 %v163_v56, %v1055_v34  ;;  %v174_v11 = vmul.f32 %v1085_v55, %v164_v58 }
  0x84   :  { %v187_v35 = vpop.permute.xlu1 %186  ;;  %v185_v36 = vpop.permute.xlu0 %184  ;;  %v227_v24 = vrot.slane %v173_v5, 4  ;;  %v228_v29 = vrot.slane %v174_v11, 4 }
  0x85   :  { %v189_v40 = vsel %vm188_vm2, %v185_v36, %v187_v35  ;;  %v190_v41 = vsel %vm188_vm2, %v187_v35, %v185_v36 }
  0x86   :  { %v199_v44 = vmul.f32 %v1048_v31, %v189_v40  ;;  %v200_v45 = vmul.f32 %v1050_v32, %v190_v41  ;;  %v246_v40 = vsel %vm237_vm9, %v978_v0, %v221_v16  ;;  %v210_v41 = vrot.slane %v123_v17, 4 }
  0x88   :  { %v84_v50 = vpop.permute.xlu1 %83  ;;  %v82_v51 = vpop.permute.xlu0 %81  ;;  %v255_v52 = vpack.c.bf16 %v200_v45, %v200_v45  ;;  %v254_v53 = vpack.c.bf16 %v199_v44, %v199_v44 }
  0x89   :  { %v86_v63 = vsel %vm85_vm7, %v82_v51, %v84_v50  ;;  %v87_v6 = vsel %vm85_vm7, %v84_v50, %v82_v51  ;;  %v248_v51 = vsel %vm240_vm11, %v246_v40, %v227_v24 }
  0x8a   :  { %904 = vmatprep.subr.msk.bf16.mxu0 %vm292_vm8, %v255_v52  ;;  %v294_v59 = vsel %vm292_vm8, %v254_v53, 0  ;;  %v97_v14 = vmul.f32 %v1075_v47, %v86_v63  ;;  %v96_v18 = vmul.f32 %v1089_v57, %v87_v6  ;;  %v249_v53 = vsel %vm240_vm11, %v247_v48, %v228_v29 }
  0x8b   :  { %312 = vmatpush1.bf16.msra.mxu0 %v294_v59 }
  0x8c   :  { %v127_v7 = vpop.permute.xlu1 %126  ;;  %v125_v8 = vpop.permute.xlu0 %124  ;;  %v239_v35 = vsel %vm237_vm9, %v97_v14, %v204_v20  ;;  %v238_v44 = vsel %vm237_vm9, %v96_v18, %v203_v28  ;;  %v875_v28 = vld [vmem:[%s1658_s5] sm:$0x3] }
  0x8d   :  { %v129_v12 = vsel %vm128_vm10, %v125_v8, %v127_v7  ;;  %v130_v13 = vsel %vm128_vm10, %v127_v7, %v125_v8  ;;  %v242_v52 = vsel %vm240_vm11, %v239_v35, %v210_v41  ;;  %v241_v58 = vsel %vm240_vm11, %v238_v44, %v209_v49 }
  0x8e   :  { %v140_v15 = vmul.f32 %v129_v12, %v1075_v47  ;;  %v139_v19 = vmul.f32 %v1055_v34, %v130_v13 }
  0x90   :  { %v178_v26 = vpop.permute.xlu1 %177  ;;  %v176_v27 = vpop.permute.xlu0 %175  ;;  %v216_v36 = vrot.slane %v140_v15, 2  ;;  %v215_v45 = vrot.slane %v139_v19, 2 }
  0x91   :  { %v180_v30 = vsel %vm179_vm12, %v176_v27, %v178_v26  ;;  %v181_v33 = vsel %vm179_vm12, %v178_v26, %v176_v27 }
  0x92   :  { %v183_v37 = vmul.f32 %v1042_v21, %v181_v33  ;;  %v233_v39 = vrot.slane %v180_v30, 2  ;;  %v245_v56 = vsel %vm243_vm13, %v242_v52, %v216_v36  ;;  %v244_v60 = vsel %vm243_vm13, %v241_v58, %v215_v45 }
  0x94   :  { %v234_v50 = vrot.slane %v183_v37, 2  ;;  %v250_v54 = vsel %vm243_vm13, %v248_v51, %v233_v39 }
  0x95   :  { %v252_v1 = vpack.c.bf16 %v250_v54, %v244_v60 }
  0x96   :  { %v251_v0 = vsel %vm243_vm13, %v249_v53, %v234_v50 }
  0x97   :  { %v253_v59 = vpack.c.bf16 %v251_v0, %v245_v56 }
  0x99   :  { %313 = vmatprep.subr.bf16.mxu0 %v253_v59 }
  0x9a   :  { %314 = vmatpush1.bf16.msra.mxu0 %v252_v1 }
  0x9d   :  { %905 = vmatmul.mubr.msk.bf16.vlgmr.msra.gmra.mxu0 %vm285_vm14, %v928_v61  ;;  %v275_v63 = vpop.permute.xlu1 %274  ;;  %v270_v17 = vpop.permute.xlu0 %269 }
  0x9e   :  { %341 = vmatprep.mubr.bf16.mxu0 %v1661_v2 }
  0xa1   :  { %v265_v3 = vpop.permute.xlu1 %264 }
  0xa5   :  { %906 = vmatmul.mubr.msk.bf16.gmra.mxu0 %vm285_vm14, %v929_v62 }
  0xa6   :  { %684 = vmatprep.mubr.bf16.mxu0 %v1661_v2 }
 0x15d   :  { %v333_v4 = vpop.f32.mrf.mxu0 }
 0x15e   :  { %v334_v5 = vadd.f32 %v333_v4, %v265_v3 }
 0x15f   :  { %v335_v6 = vpop.f32.mrf.mxu0 }
 0x160   :  { %v1152_v7 = vmax.f32 %v334_v5, 0.0  ;;  %v336_v8 = vadd.f32 %v335_v6, %v265_v3 }
 0x161   :  { %v337_v10 = vpop.f32.mrf.mxu0 }
 0x162   :  { %v1154_v11 = vmax.f32 %v336_v8, 0.0  ;;  %509 = vrot.lane.b32.xlu0 %v1152_v7, %s931_s24  ;;  %v338_v18 = vadd.f32 %v337_v10, %v270_v17 }
 0x163   :  { %v339_v12 = vpop.f32.mrf.mxu0 }
 0x164   :  { %515 = vrot.lane.b32.xlu1 %v1154_v11, %s931_s24  ;;  %v1176_v19 = vmax.f32 %v338_v18, 0.0  ;;  %v340_v20 = vadd.f32 %v339_v12, %v270_v17 }
 0x165   :  { %v343_v13 = vpop.f32.mrf.mxu0 }
 0x166   :  { %485 = vrot.lane.b32.xlu0 %v1152_v7, %s936_s28  ;;  %v1182_v22 = vmax.f32 %v340_v20, 0.0  ;;  %v344_v23 = vadd.f32 %v343_v13, %v275_v63  ;;  %v541_v20 = vrot.slane %v1176_v19, 6 }
 0x167   :  { %v345_v14 = vpop.f32.mrf.mxu0 }
 0x168   :  { %410 = vrot.lane.b32.xlu1 %v1154_v11, %s932_s0  ;;  %v1188_v24 = vmax.f32 %v344_v23, 0.0  ;;  %v346_v26 = vadd.f32 %v345_v14, %v275_v63  ;;  %v543_v18 = vrot.slane %v1182_v22, 6 }
 0x169   :  { %v347_v15 = vpop.f32.mrf.mxu0 }
 0x16a   :  { %404 = vrot.lane.b32.xlu0 %v1152_v7, %s932_s0  ;;  %v1218_v27 = vmax.f32 %v346_v26, 0.0  ;;  %v545_v23 = vrot.slane %v1188_v24, 6 }
 0x16b   :  { %v348_v16 = vpop.f32.mrf.mxu0 }
 0x16c   :  { %747 = vrot.lane.b32.xlu1 %v1154_v11, %s934_s26  ;;  %v547_v16 = vrot.slane %v1218_v27, 6 }
 0x16e   :  { %741 = vrot.lane.b32.xlu0 %v1152_v7, %s934_s26 }
 0x170   :  { %386 = vrot.lane.b32.xlu1 %v1154_v11, %s930_s23 }
 0x172   :  { %380 = vrot.lane.b32.xlu0 %v1152_v7, %s930_s23 }
 0x174   :  { %723 = vrot.lane.b32.xlu1 %v1154_v11, %s938_s29 }
 0x176   :  { %717 = vrot.lane.b32.xlu0 %v1152_v7, %s938_s29 }
 0x178   :  { %487 = vrot.lane.b32.xlu1 %v1176_v19, %s936_s28 }
 0x17a   :  { %491 = vrot.lane.b32.xlu0 %v1154_v11, %s936_s28 }
 0x17c   :  { %493 = vrot.lane.b32.xlu1 %v1182_v22, %s936_s28 }
 0x17e   :  { %511 = vrot.lane.b32.xlu0 %v1176_v19, %s931_s24 }
 0x180   :  { %513 = vrot.lane.b32.xlu1 %v1188_v24, %s931_s24 }
 0x182   :  { %406 = vrot.lane.b32.xlu0 %v1176_v19, %s932_s0 }
 0x184   :  { %358 = vrot.lane.b32.xlu1 %v1176_v19, %s935_s27 }
 0x186   :  { %743 = vrot.lane.b32.xlu0 %v1176_v19, %s934_s26 }
 0x188   :  { %364 = vrot.lane.b32.xlu1 %v1182_v22, %s935_s27 }
 0x18a   :  { %382 = vrot.lane.b32.xlu0 %v1176_v19, %s930_s23 }
 0x18c   :  { %408 = vrot.lane.b32.xlu1 %v1188_v24, %s932_s0 }
 0x18e   :  { %719 = vrot.lane.b32.xlu0 %v1176_v19, %s938_s29 }
 0x190   :  { %745 = vrot.lane.b32.xlu1 %v1188_v24, %s934_s26 }
 0x192   :  { %517 = vrot.lane.b32.xlu0 %v1182_v22, %s931_s24 }
 0x194   :  { %384 = vrot.lane.b32.xlu1 %v1188_v24, %s930_s23 }
 0x196   :  { %412 = vrot.lane.b32.xlu0 %v1182_v22, %s932_s0 }
 0x198   :  { %721 = vrot.lane.b32.xlu1 %v1188_v24, %s938_s29 }
 0x19a   :  { %749 = vrot.lane.b32.xlu0 %v1182_v22, %s934_s26 }
 0x19c   :  { %519 = vrot.lane.b32.xlu1 %v1218_v27, %s931_s24 }
 0x19e   :  { %388 = vrot.lane.b32.xlu0 %v1182_v22, %s930_s23 }
 0x1a0   :  { %495 = vrot.lane.b32.xlu1 %v1218_v27, %s936_s28 }
 0x1a2   :  { %725 = vrot.lane.b32.xlu0 %v1182_v22, %s938_s29 }
 0x1a4   :  { %414 = vrot.lane.b32.xlu1 %v1218_v27, %s932_s0 }
 0x1a6   :  { %489 = vrot.lane.b32.xlu0 %v1188_v24, %s936_s28 }
 0x1a8   :  { %751 = vrot.lane.b32.xlu1 %v1218_v27, %s934_s26 }
 0x1aa   :  { %356 = vrot.lane.b32.xlu0 %v1152_v7, %s935_s27 }
 0x1ac   :  { %390 = vrot.lane.b32.xlu1 %v1218_v27, %s930_s23 }
 0x1ae   :  { %362 = vrot.lane.b32.xlu0 %v1154_v11, %s935_s27 }
 0x1b0   :  { %727 = vrot.lane.b32.xlu1 %v1218_v27, %s938_s29 }
 0x1b2   :  { %360 = vrot.lane.b32.xlu0 %v1188_v24, %s935_s27 }
 0x1b4   :  { %366 = vrot.lane.b32.xlu1 %v1218_v27, %s935_s27 }
 0x1b6   :  { %697 = vrot.lane.b32.xlu0 %v1188_v24, %s933_s25 }
 0x1b8   :  { %703 = vrot.lane.b32.xlu1 %v1218_v27, %s933_s25 }
 0x1ba   :  { %693 = vrot.lane.b32.xlu0 %v1152_v7, %s933_s25 }
 0x1bc   :  { %695 = vrot.lane.b32.xlu1 %v1176_v19, %s933_s25 }
 0x1be   :  { %699 = vrot.lane.b32.xlu0 %v1154_v11, %s933_s25 }
 0x1c0   :  { %701 = vrot.lane.b32.xlu1 %v1182_v22, %s933_s25 }
 0x1c2   :  { %878 = vperm.xlu0 %926, %v875_v28   ;;  %v1663_v28 = vrot.slane %v1154_v11, 6 }
 0x1d4   :  { %v510_v29 = vpop.permute.xlu0 %509 }
 0x1d6   :  { %v516_v30 = vpop.permute.xlu1 %515 }
 0x1d7   :  { %v524_v5 = vsel %vm145_vm4, %v516_v30, %v510_v29  ;;  %v521_v8 = vsel %vm145_vm4, %v510_v29, %v516_v30  ;;  %v1662_v29 = vrot.slane %v1152_v7, 6 }
 0x1d8   :  { %v1263_v33 = vpop.permute.xlu0 %485  ;;  %v1304_v12 = vmul.f32 %v524_v5, %v1067_v42  ;;  %v1309_v14 = vmul.f32 %v521_v8, %v1060_v38 }
 0x1da   :  { %v411_v35 = vpop.permute.xlu1 %410  ;;  %v562_v17 = vrot.slane %v1304_v12, 4  ;;  %v561_v30 = vrot.slane %v1309_v14, 4 }
 0x1dc   :  { %v405_v36 = vpop.permute.xlu0 %404 }
 0x1dd   :  { %v416_v37 = vsel %vm111_vm5, %v405_v36, %v411_v35  ;;  %v419_v39 = vsel %vm111_vm5, %v411_v35, %v405_v36 }
 0x1de   :  { %v748_v40 = vpop.permute.xlu1 %747  ;;  %v1322_v35 = vmul.f32 %v419_v39, %v1073_v46  ;;  %v1329_v19 = vmul.f32 %v416_v37, %v1069_v43  ;;  %v1349_v37 = vsel %vm237_vm9, %v1662_v29, %v541_v20 }
 0x1e0   :  { %v742_v41 = vpop.permute.xlu0 %741  ;;  %v456_v5 = vrot.slane %v1322_v35, 4 }
 0x1e1   :  { %v753_v44 = vsel %vm188_vm2, %v742_v41, %v748_v40  ;;  %v756_v45 = vsel %vm188_vm2, %v748_v40, %v742_v41  ;;  %v548_v40 = vsel %vm237_vm9, %v543_v18, %v547_v16  ;;  %v546_v41 = vsel %vm237_vm9, %v541_v20, %v545_v23 }
 0x1e2   :  { %v387_v48 = vpop.permute.xlu1 %386  ;;  %v1332_v24 = vmul.f32 %v753_v44, %v1048_v31  ;;  %v1338_v39 = vsel %vm240_vm11, %v548_v40, %v562_v17 }
 0x1e4   :  { %v381_v49 = vpop.permute.xlu0 %380  ;;  %v793_v16 = vrot.slane %v1332_v24, 4 }
 0x1e5   :  { %v1275_v50 = vsel %vm102_vm3, %v381_v49, %v387_v48  ;;  %v395_v51 = vsel %vm102_vm3, %v387_v48, %v381_v49  ;;  %v1344_v48 = vsel %vm237_vm9, %v1663_v28, %v543_v18 }
 0x1e6   :  { %v724_v52 = vpop.permute.xlu1 %723  ;;  %v1377_v23 = vmul.f32 %v1045_v25, %v395_v51 }
 0x1e8   :  { %v718_v53 = vpop.permute.xlu0 %717 }
 0x1e9   :  { %v1281_v54 = vsel %vm179_vm12, %v718_v53, %v724_v52  ;;  %v1285_v56 = vsel %vm179_vm12, %v724_v52, %v718_v53 }
 0x1ea   :  { %v488_v0 = vpop.permute.xlu1 %487  ;;  %v1412_v29 = vmul.f32 %v1042_v21, %v1285_v56 }
 0x1ec   :  { %v492_v58 = vpop.permute.xlu0 %491 }
 0x1ed   :  { %v497_v8 = vsel %vm128_vm10, %v1263_v33, %v492_v58  ;;  %v500_v14 = vsel %vm128_vm10, %v492_v58, %v1263_v33 }
 0x1ee   :  { %v494_v59 = vpop.permute.xlu1 %493 }
 0x1ef   :  { %v498_v44 = vsel %vm128_vm10, %v488_v0, %v494_v59  ;;  %v501_v49 = vsel %vm128_vm10, %v494_v59, %v488_v0  ;;  %v457_v0 = vrot.slane %v1329_v19, 4  ;;  %v1371_v59 = vmul.f32 %v756_v45, %v1050_v32  ;;  %v907_v19 = vld [vmem:[%s1659_s4 + $0x1] sm:$0x1] }
 0x1f0   :  { %v512_v60 = vpop.permute.xlu0 %511  ;;  %v1380_v33 = vmul.f32 %v501_v49, %v1055_v34  ;;  %v1383_v58 = vmul.f32 %v498_v44, %v1075_v47 }
 0x1f2   :  { %v514_v1 = vpop.permute.xlu1 %513 }
 0x1f4   :  { %v407_v61 = vpop.permute.xlu0 %406 }
 0x1f6   :  { %v1287_v62 = vpop.permute.xlu1 %358 }
 0x1f8   :  { %v1289_v63 = vpop.permute.xlu0 %743 }
 0x1fa   :  { %v1291_v3 = vpop.permute.xlu1 %364 }
 0x1fb   :  { %v369_v56 = vsel %vm85_vm7, %v1287_v62, %v1291_v3  ;;  %v1445_v12 = vsel %vm85_vm7, %v1291_v3, %v1287_v62 }
 0x1fc   :  { %v1293_v4 = vpop.permute.xlu0 %382 }
 0x1fe   :  { %v1297_v6 = vpop.permute.xlu1 %408 }
 0x200   :  { %v1301_v10 = vpop.permute.xlu0 %719 }
 0x202   :  { %v1306_v13 = vpop.permute.xlu1 %745 }
 0x204   :  { %v518_v15 = vpop.permute.xlu0 %517 }
 0x205   :  { %v522_v27 = vsel %vm145_vm4, %v512_v60, %v518_v15  ;;  %v525_v22 = vsel %vm145_vm4, %v518_v15, %v512_v60  ;;  %v1367_v15 = vsel %vm240_vm11, %v546_v41, %v561_v30 }
 0x206   :  { %v1316_v26 = vpop.permute.xlu1 %384  ;;  %v529_v52 = vmul.f32 %v522_v27, %v1060_v38  ;;  %v530_v53 = vmul.f32 %v525_v22, %v1067_v42  ;;  %v1388_v27 = vmul.f32 %v500_v14, %v1055_v34  ;;  %v1391_v22 = vmul.f32 %v497_v8, %v1075_v47 }
 0x208   :  { %v413_v36 = vpop.permute.xlu0 %412  ;;  %v563_v40 = vrot.slane %v529_v52, 4  ;;  %v565_v41 = vrot.slane %v530_v53, 4 }
 0x209   :  { %v420_v18 = vsel %vm111_vm5, %v413_v36, %v407_v61  ;;  %v417_v45 = vsel %vm111_vm5, %v407_v61, %v413_v36 }
 0x20a   :  { %v1357_v60 = vpop.permute.xlu1 %721  ;;  %v1394_v51 = vmul.f32 %v420_v18, %v1073_v46  ;;  %v1405_v8 = vmul.f32 %v417_v45, %v1069_v43  ;;  %v564_v18 = vsel %vm240_vm11, %v561_v30, %v563_v40 }
 0x20c   :  { %v750_v20 = vpop.permute.xlu0 %749 }
 0x20d   :  { %v754_v44 = vsel %vm188_vm2, %v1289_v63, %v750_v20 }
 0x20e   :  { %v520_v2 = vpop.permute.xlu1 %519 }
 0x20f   :  { %v523_v49 = vsel %vm145_vm4, %v514_v1, %v520_v2  ;;  %v526_v61 = vsel %vm145_vm4, %v520_v2, %v514_v1  ;;  %v757_v1 = vsel %vm188_vm2, %v750_v20, %v1289_v63  ;;  %v566_v2 = vsel %vm240_vm11, %v562_v17, %v565_v41 }
 0x210   :  { %v531_v52 = vmul.f32 %v523_v49, %v1060_v38  ;;  %v532_v53 = vmul.f32 %v526_v61, %v1067_v42  ;;  %v389_v14 = vpop.permute.xlu0 %388  ;;  %v1422_v38 = vmul.f32 %v754_v44, %v1048_v31  ;;  %v458_v61 = vrot.slane %v1394_v51, 4 }
 0x211   :  { %v460_v63 = vrot.slane %v1405_v8, 4  ;;  %v396_v20 = vsel %vm102_vm3, %v389_v14, %v1293_v4  ;;  %v1448_v17 = vmul.f32 %v757_v1, %v1050_v32  ;;  %v1451_v8 = vmul.f32 %v369_v56, %v1075_v47 }
 0x212   :  { %v567_v42 = vrot.slane %v531_v52, 4  ;;  %v569_v45 = vrot.slane %v532_v53, 4  ;;  %v496_v49 = vpop.permute.xlu1 %495  ;;  %v795_v36 = vrot.slane %v1422_v38, 4 }
 0x214   :  { %v1437_v44 = vpop.permute.xlu0 %725  ;;  %v570_v52 = vsel %vm240_vm11, %v565_v41, %v569_v45  ;;  %v568_v53 = vsel %vm240_vm11, %v563_v40, %v567_v42  ;;  %v586_v41 = vpack.c.bf16 %v566_v2, %v1338_v39  ;;  %v585_v40 = vpack.c.bf16 %v564_v18, %v1367_v15 }
 0x215   :  { %v588_v30 = vpack.c.bf16 %v570_v52, %v570_v52  ;;  %v587_v51 = vpack.c.bf16 %v568_v53, %v568_v53  ;;  %v1457_v42 = vmul.f32 %v1045_v25, %v396_v20  ;;  %v1470_v39 = vsel %vm240_vm11, %v456_v5, %v458_v61 }
 0x216   :  { %v415_v28 = vpop.permute.xlu1 %414  ;;  %v1477_v45 = vsel %vm240_vm11, %v457_v0, %v460_v63 }
 0x217   :  { %v418_v62 = vsel %vm111_vm5, %v1297_v6, %v415_v28  ;;  %v421_v3 = vsel %vm111_vm5, %v415_v28, %v1297_v6  ;;  %908 = vmatprep.subr.msk.bf16.mxu1 %vm595_vm15, %v588_v30  ;;  %v597_v1 = vsel %vm595_vm15, %v587_v51, 0  ;;  %v797_v6 = vrot.slane %v1448_v17, 4 }
 0x218   :  { %v426_v15 = vmul.f32 %v421_v3, %v1073_v46  ;;  %v427_v18 = vmul.f32 %v418_v62, %v1069_v43  ;;  %611 = vmatpush1.bf16.msra.mxu1 %v597_v1  ;;  %v490_v2 = vpop.permute.xlu0 %489  ;;  %v1483_v28 = vsel %vm102_vm3, %v1293_v4, %v389_v14  ;;  %v1496_v4 = vsel %vm240_vm11, %v793_v16, %v795_v36 }
 0x219   :  { %v499_v56 = vsel %vm128_vm10, %v490_v2, %v496_v49  ;;  %v502_v43 = vsel %vm128_vm10, %v496_v49, %v490_v2  ;;  %612 = vmatprep.subr.bf16.mxu1 %v586_v41  ;;  %v436_v14 = vrot.slane %v1457_v42, 6  ;;  %v1664_v3 = vrot.slane %v1154_v11, 6 }
 0x21a   :  { %v462_v46 = vrot.slane %v426_v15, 4  ;;  %v464_v20 = vrot.slane %v427_v18, 4  ;;  %v507_v52 = vmul.f32 %v502_v43, %v1055_v34  ;;  %v508_v53 = vmul.f32 %v499_v56, %v1075_v47  ;;  %v752_v30 = vpop.permute.xlu1 %751 }
 0x21b   :  { %v755_v49 = vsel %vm188_vm2, %v1306_v13, %v752_v30  ;;  %v758_v17 = vsel %vm188_vm2, %v752_v30, %v1306_v13  ;;  %v1665_v2 = vrot.slane %v1152_v7, 6  ;;  %v438_v43 = vrot.slane %v1483_v28, 6 }
 0x21c   :  { %v763_v51 = vmul.f32 %v755_v49, %v1048_v31  ;;  %v764_v41 = vmul.f32 %v758_v17, %v1050_v32  ;;  %613 = vmatpush1.bf16.msra.mxu1 %v585_v40  ;;  %v1507_v62 = vpop.permute.xlu0 %356  ;;  %v578_v1 = vsel %vm237_vm9, %v508_v53, %v1664_v3  ;;  %v465_v42 = vsel %vm240_vm11, %v460_v63, %v464_v20 }
 0x21d   :  { %v584_v15 = vpack.c.bf16 %v1344_v48, %v578_v1  ;;  %v483_v18 = vpack.c.bf16 %v465_v42, %v465_v42  ;;  %v577_v13 = vsel %vm237_vm9, %v507_v52, %v1665_v2  ;;  %v463_v31 = vsel %vm240_vm11, %v458_v61, %v462_v46 }
 0x21e   :  { %v733_v32 = vsel %vm179_vm12, %v1437_v44, %v1301_v10  ;;  %v801_v11 = vrot.slane %v764_v41, 4  ;;  %v391_v40 = vpop.permute.xlu1 %390  ;;  %v583_v56 = vpack.c.bf16 %v1349_v37, %v577_v13  ;;  %v482_v63 = vpack.c.bf16 %v463_v31, %v463_v31 }
 0x21f   :  { %v799_v48 = vrot.slane %v763_v51, 4  ;;  %v394_v7 = vsel %vm102_vm3, %v1316_v26, %v391_v40  ;;  %v397_v61 = vsel %vm102_vm3, %v391_v40, %v1316_v26  ;;  %614 = vmatprep.subr.bf16.mxu1 %v584_v15  ;;  %910 = vmatprep.subr.msk.bf16.mxu0 %vm595_vm15, %v483_v18  ;;  %v435_v53 = vrot.slane %v1275_v50, 6 }
 0x220   :  { %v402_v46 = vmul.f32 %v1045_v25, %v397_v61  ;;  %v442_v20 = vrot.slane %v394_v7, 6  ;;  %615 = vmatpush1.bf16.msra.mxu1 %v583_v56  ;;  %v647_v37 = vsel %vm595_vm15, %v482_v63, 0  ;;  %v363_v52 = vpop.permute.xlu0 %362  ;;  %v802_v28 = vsel %vm240_vm11, %v797_v6, %v801_v11 }
 0x221   :  { %v1539_v30 = vsel %vm179_vm12, %v1301_v10, %v1437_v44  ;;  %v1542_v26 = vmul.f32 %v1042_v21, %v733_v32  ;;  %661 = vmatpush1.bf16.msra.mxu0 %v647_v37  ;;  %v1666_v25 = vpack.c.bf16 %v1383_v58, %v1391_v22  ;;  %v1667_v49 = vrot.slane %v1371_v59, 4 }
 0x222   :  { %v1668_v50 = vrot.slane %v1377_v23, 6  ;;  %v440_v41 = vrot.slane %v402_v46, 6  ;;  %v443_v10 = vsel %vm237_vm9, %v438_v43, %v442_v20  ;;  %v728_v44 = vpop.permute.xlu1 %727  ;;  %v820_v3 = vpack.c.bf16 %v802_v28, %v802_v28 }
 0x223   :  { %616 = vmatprep.subr.bf16.mxu1 %v1666_v25  ;;  %v798_v17 = vsel %vm240_vm11, %v1667_v49, %v797_v6  ;;  %v731_v1 = vsel %vm179_vm12, %v1357_v60, %v728_v44  ;;  %v734_v58 = vsel %vm179_vm12, %v728_v44, %v1357_v60  ;;  %v475_v22 = vsel %vm240_vm11, %v443_v10, %v457_v0 }
 0x224   :  { %v1553_v51 = vsel %vm237_vm9, %v1668_v50, %v436_v14  ;;  %v800_v6 = vsel %vm240_vm11, %v795_v36, %v799_v48  ;;  %v773_v42 = vrot.slane %v1539_v30, 6  ;;  %v441_v15 = vsel %vm237_vm9, %v436_v14, %v440_v41  ;;  %v361_v60 = vpop.permute.xlu0 %360 }
 0x225   :  { %v740_v18 = vmul.f32 %v1042_v21, %v734_v58  ;;  %v777_v2 = vrot.slane %v731_v1, 6  ;;  %v1669_v13 = vpack.c.bf16 %v1380_v33, %v1388_v27  ;;  %v775_v0 = vrot.slane %v1542_v26, 6 }
 0x226   :  { %v481_v36 = vpack.c.bf16 %v1477_v45, %v475_v22  ;;  %v474_v21 = vsel %vm240_vm11, %v441_v15, %v456_v5  ;;  %v819_v38 = vpack.c.bf16 %v800_v6, %v800_v6  ;;  %v368_v33 = vsel %vm85_vm7, %v1507_v62, %v363_v52  ;;  %v367_v31 = vpop.permute.xlu1 %366 }
 0x227   :  { %617 = vmatpush1.bf16.msra.mxu1 %v1669_v13  ;;  %v778_v27 = vsel %vm237_vm9, %v773_v42, %v777_v2  ;;  %v779_v14 = vrot.slane %v740_v18, 6  ;;  %v480_v32 = vpack.c.bf16 %v1470_v39, %v474_v21  ;;  %v370_v11 = vsel %vm85_vm7, %v361_v60, %v367_v31 }
 0x228   :  { %913 = vmatprep.subr.msk.bf16.mxu1 %vm595_vm15, %v820_v3  ;;  %v373_v45 = vsel %vm85_vm7, %v367_v31, %v361_v60  ;;  %662 = vmatprep.subr.bf16.mxu0 %v481_v36  ;;  %v827_v35 = vsel %vm595_vm15, %v819_v38, 0  ;;  %v811_v5 = vsel %vm240_vm11, %v778_v27, %v793_v16  ;;  %v771_v40 = vrot.slane %v1281_v54, 6  ;;  %v698_v63 = vpop.permute.xlu0 %697  ;;  %v912_v36 = vld [vmem:[%s1659_s4 + $0x2] sm:$0x1] }
 0x229   :  { %v378_v56 = vmul.f32 %v373_v45, %v1089_v57  ;;  %v379_v39 = vmul.f32 %v370_v11, %v1075_v47  ;;  %663 = vmatpush1.bf16.msra.mxu0 %v480_v32  ;;  %v780_v48 = vsel %vm237_vm9, %v775_v0, %v779_v14  ;;  %v371_v7 = vsel %vm85_vm7, %v363_v52, %v1507_v62 }
 0x22a   :  { %909 = vmatmul.mubr.msk.bf16.vlgmr.msra.gmra.mxu1 %vm591_vm0, %v907_v19  ;;  %v375_v61 = vmul.f32 %v368_v33, %v1075_v47  ;;  %v1670_v24 = vmov %v1667_v49  ;;  %v439_v54 = vsel %vm237_vm9, %v435_v53, %v438_v43  ;;  %v1671_v46 = vmov 0   ;;  %v704_v28 = vpop.permute.xlu1 %703 }
 0x22b   :  { %841 = vmatpush1.bf16.msra.mxu1 %v827_v35  ;;  %v812_v16 = vsel %vm240_vm11, %v780_v48, %v1670_v24  ;;  %864 = vmatprep.mubr.bf16.mxu1 %v1671_v46  ;;  %v1672_v20 = vmov %v1668_v50  ;;  %v473_v26 = vsel %vm237_vm9, %v379_v39, %v435_v53  ;;  %v817_v62 = vpack.c.bf16 %v1496_v4, %v811_v5 }
 0x22c   :  { %v472_v37 = vsel %vm237_vm9, %v378_v56, %v1672_v20  ;;  %v818_v30 = vpack.c.bf16 %v798_v17, %v812_v16  ;;  %v707_v47 = vsel %vm162_vm6, %v698_v63, %v704_v28  ;;  %v710_v59 = vsel %vm162_vm6, %v704_v28, %v698_v63  ;;  %v694_v53 = vpop.permute.xlu0 %693 }
 0x22d   :  { %v479_v52 = vpack.c.bf16 %v439_v54, %v473_v26  ;;  %v478_v43 = vpack.c.bf16 %v1553_v51, %v472_v37  ;;  %v772_v25 = vrot.slane %v1412_v29, 6  ;;  %v374_v23 = vmul.f32 %v371_v7, %v1089_v57 }
 0x22e   :  { %v715_v49 = vmul.f32 %v707_v47, %v1055_v34  ;;  %v716_v17 = vmul.f32 %v710_v59, %v1085_v55  ;;  %842 = vmatprep.subr.bf16.mxu1 %v818_v30  ;;  %v376_v4 = vmul.f32 %v1445_v12, %v1089_v57  ;;  %v477_v50 = vpack.c.bf16 %v1451_v8, %v375_v61  ;;  %v696_v29 = vpop.permute.xlu1 %695  ;;  %v484_v8 = vld [vmem:[%s1659_s4] sm:$0x1] }
 0x22f   :  { %664 = vmatprep.subr.bf16.mxu0 %v479_v52  ;;  %843 = vmatpush1.bf16.msra.mxu1 %v817_v62  ;;  %v774_v41 = vsel %vm237_vm9, %v771_v40, %v773_v42  ;;  %v776_v10 = vsel %vm237_vm9, %v772_v25, %v775_v0 }
 0x230   :  { %v809_v51 = vsel %vm237_vm9, %v715_v49, %v771_v40  ;;  %665 = vmatpush1.bf16.msra.mxu0 %v478_v43  ;;  %v810_v44 = vsel %vm237_vm9, %v716_v17, %v772_v25  ;;  %v476_v58 = vpack.c.bf16 %v376_v4, %v374_v23  ;;  %v700_v22 = vpop.permute.xlu0 %699 }
 0x231   :  { %666 = vmatprep.subr.bf16.mxu0 %v477_v50  ;;  %v816_v3 = vpack.c.bf16 %v776_v10, %v810_v44  ;;  %v815_v1 = vpack.c.bf16 %v774_v41, %v809_v51  ;;  %v705_v57 = vsel %vm162_vm6, %v694_v53, %v700_v22  ;;  %v708_v12 = vsel %vm162_vm6, %v700_v22, %v694_v53 }
 0x232   :  { %v702_v6 = vpop.permute.xlu1 %701  ;;  %v711_v18 = vmul.f32 %v705_v57, %v1055_v34  ;;  %v712_v2 = vmul.f32 %v708_v12, %v1085_v55 }
 0x233   :  { %844 = vmatprep.subr.bf16.mxu1 %v816_v3  ;;  %v706_v42 = vsel %vm162_vm6, %v696_v29, %v702_v6  ;;  %v709_v15 = vsel %vm162_vm6, %v702_v6, %v696_v29 }
 0x234   :  { %667 = vmatpush1.bf16.msra.mxu0 %v476_v58  ;;  %845 = vmatpush1.bf16.msra.mxu1 %v815_v1  ;;  %v713_v13 = vmul.f32 %v706_v42, %v1055_v34  ;;  %v714_v60 = vmul.f32 %v709_v15, %v1085_v55 }
 0x236   :  { %v813_v19 = vpack.c.bf16 %v713_v13, %v711_v18  ;;  %v814_v0 = vpack.c.bf16 %v714_v60, %v712_v2 }
 0x237   :  { %911 = vmatmul.mubr.msk.bf16.vlgmr.msra.gmra.mxu0 %vm591_vm0, %v484_v8 }
 0x238   :  { %846 = vmatprep.subr.bf16.mxu1 %v814_v0 }
 0x239   :  { %847 = vmatpush1.bf16.msra.mxu1 %v813_v19 }
 0x23c   :  { %914 = vmatmul.mubr.msk.bf16.vlgmr.msra.gmra.mxu1 %vm591_vm0, %v912_v36 }
 0x23d   :  { %v879_v40 = vpop.permute.xlu0 %878 }
 0x2ea   :  { %v636_v9 = vpop.f32.mrf.mxu1 }
 0x2ec   :  { %v638_v21 = vpop.f32.mrf.mxu1 }
 0x2ee   :  { %v640_v38 = vpop.f32.mrf.mxu1 }
 0x2f0   :  { %v641_v33 = vpop.f32.mrf.mxu1 }
 0x2f7   :  { %v686_v27 = vpop.f32.mrf.mxu0 }
 0x2f8   :  { %v687_v55 = vadd.f32 %v686_v27, %v636_v9 }
 0x2f9   :  { %v688_v34 = vpop.f32.mrf.mxu0 }
 0x2fa   :  { %v689_v11 = vadd.f32 %v688_v34, %v638_v21 }
 0x2fb   :  { %v690_v14 = vpop.f32.mrf.mxu0 }
 0x2fc   :  { %v866_v32 = vpop.f32.mrf.mxu1 }
 0x2fd   :  { %v691_v31 = vpop.f32.mrf.mxu0  ;;  %v873_v45 = vadd.f32 %v866_v32, %v687_v55 }
 0x2fe   :  { %v868_v35 = vpop.f32.mrf.mxu1 }
 0x2ff   :  { %v874_v5 = vadd.f32 %v868_v35, %v689_v11  ;;  %v881_v39 = vadd.f32 %v879_v40, %v873_v45 }
 0x300   :  { %v870_v56 = vpop.f32.mrf.mxu1 }
 0x301   :  { %v882_v63 = vadd.f32 %v879_v40, %v874_v5 }
 0x302   :  { %v871_v48 = vpop.f32.mrf.mxu1 }
 0x303   :  { %v885_v7 = vcombine.low %v881_v39, %v882_v63 }
 0x305   :  { %915 = vst.sshfl [vmem:[%s1660_s6] sm:$0x33 pattern:$0x76325410] %v885_v7 }

// kernel: varnoise_forward.59
= control target key start
LH: loop header
LB: loop body
LE: loop exit
PB: predicated region body
PF: predicated region fallthrough
CT: control target
= control target key end

     0   :  { %s456_s20 = smov 0   ;;  %s488_s0 = inlined_call_operand.vmem [shape: f32[4,2,16,16], index: 0, kind: input, shape index: {}, may-alias: {0,1}]   ;;  %s489_s1 = inlined_call_operand.vmem [shape: f32[4,2,16,16], index: 1, kind: input, shape index: {}, may-alias: {0,1}]   ;;  %s490_s2 = inlined_call_operand.vmem [shape: f32[4,2,16,16], index: 2, kind: input, shape index: {}]   ;;  %s491_s3 = inlined_call_operand.vmem [shape: f32[1,1,1,16], index: 3, kind: input, shape index: {}]   ;;  %s492_s4 = inlined_call_operand.<no memory space> [shape: f32[1], index: 4, kind: input, shape index: {}]   ;;  %s493_s5 = inlined_call_operand.vmem [shape: f32[4,2,16,16], index: 5, kind: output, shape index: {}]  }
   0x1   :  { %10 = sst [smem:[#allocation2]] %s492_s4 }
   0x2 LB: > { %s388_s21 = sadd.s32 4294967295, %s421_s20   ;;  %p392_p0 = scmp.ge.s32.totalorder %s421_s20, 1  ;;  %s421_s20 = sphi %s456_s20, %s16_s20  }
   0x3   : > { %p208_p1 = scmp.lt.s32.totalorder %s421_s20, 5 }
   0x5   : > { %p209_p2 = pnand %p392_p0, %p208_p1 }
   0x6   : > { %p246_p3 = scmp.lt.s32.totalorder (!%p209_p2), %s388_s21, 3  ;;  %s267_s22 = sld [smem:[#allocation2]] (!%p209_p2) }
   0x7   : > { %212 = sbr.rel (%p209_p2) target bundleno = 28 (0x1c), region = 40 }
   0xc   : > { %v283_v0 = vlaneseq  ;;  %s495_s21 = smov (!%p246_p3, %s388_s21), 3  ;;  %v266_v2 = vld [vmem:[%s491_s3] sm:$0x1]  ;;  %v268_v4 = vstv %s267_s22  ;;  %vm304_vm0 = vcmask 130048  }
   0xd   : > { %s464_s4 = sshll.u32 %s495_s21, 5  ;;  %v269_v8 = vmul.f32 %v268_v4, %v266_v2 }
   0xe   : > { %v284_v1 = vshrl.u32 %v283_v0, 7  ;;  %s250_s27 = scalar_lea.vmem %s488_s0, %s464_s4  ;;  %s255_s30 = scalar_lea.vmem %s489_s1, %s464_s4 }
   0xf   : > { %v270_v5 = vld [vmem:[%s250_s27] sm:$0xff]  ;;  %v271_v7 = vld [vmem:[%s250_s27 + $0x8] sm:$0xff]  ;;  %v272_v12 = vld [vmem:[%s250_s27 + $0x10] sm:$0xff]  ;;  %s260_s8 = scalar_lea.vmem %s490_s2, %s464_s4  ;;  %s265_s11 = scalar_lea.vmem %s493_s5, %s464_s4 }
  0x10   : > { %v285_v3 = vsub.s32 0, %v284_v1  ;;  %v274_v6 = vld [vmem:[%s255_s30] sm:$0xff]  ;;  %v275_v10 = vld [vmem:[%s255_s30 + $0x8] sm:$0xff]  ;;  %v276_v13 = vld [vmem:[%s255_s30 + $0x10] sm:$0xff] }
  0x11   : > { %v278_v9 = vsub.f32 %v270_v5, %v274_v6  ;;  %v279_v11 = vsub.f32 %v271_v7, %v275_v10  ;;  %v280_v15 = vsub.f32 %v272_v12, %v276_v13  ;;  %v273_v16 = vld [vmem:[%s250_s27 + $0x18] sm:$0xff]  ;;  %v296_v22 = vld [vmem:[%s260_s8] sm:$0xff]  ;;  %v297_v23 = vld [vmem:[%s260_s8 + $0x8] sm:$0xff] }
  0x12   : > { %v286_v14 = vrot.slane %v269_v8, %v285_v3  ;;  %v277_v17 = vld [vmem:[%s255_s30 + $0x18] sm:$0xff]  ;;  %v298_v24 = vld [vmem:[%s260_s8 + $0x10] sm:$0xff] }
  0x13   : > { %v281_v18 = vsub.f32 %v273_v16, %v277_v17  ;;  %v299_v29 = vld [vmem:[%s260_s8 + $0x18] sm:$0xff] }
  0x14   : > { %v288_v19 = vmul.f32 %v286_v14, %v278_v9  ;;  %v289_v20 = vmul.f32 %v286_v14, %v279_v11  ;;  %v290_v21 = vmul.f32 %v286_v14, %v280_v15 }
  0x15   : > { %v291_v25 = vmul.f32 %v286_v14, %v281_v18 }
  0x16   : > { %v292_v26 = vsub.f32 %v270_v5, %v288_v19  ;;  %v293_v27 = vsub.f32 %v271_v7, %v289_v20  ;;  %v294_v28 = vsub.f32 %v272_v12, %v290_v21 }
  0x17   : > { %v295_v30 = vsub.f32 %v273_v16, %v291_v25 }
  0x18   : > { %v300_v31 = vsub.f32 %v292_v26, %v296_v22  ;;  %v301_v32 = vsub.f32 %v293_v27, %v297_v23  ;;  %v302_v33 = vsub.f32 %v294_v28, %v298_v24 }
  0x19   : > { %v303_v34 = vsub.f32 %v295_v30, %v299_v29 }
  0x1a   : > { %305 = vst.msk [vmem:[%s265_s11] sm:$0xff] %vm304_vm0, %v300_v31  ;;  %306 = vst.msk [vmem:[%s265_s11 + $0x8] sm:$0xff] %vm304_vm0, %v301_v32 }
  0x1b   : > { %307 = vst.msk [vmem:[%s265_s11 + $0x10] sm:$0xff] %vm304_vm0, %v302_v33  ;;  %308 = vst.msk [vmem:[%s265_s11 + $0x18] sm:$0xff] %vm304_vm0, %v303_v34 }
  0x1c PF: > { %s16_s20 = sadd.s32 1, %s421_s20  }
  0x1d   : > { %p13_p4 = scmp.ge.s32.totalorder %s16_s20, 6  }
  0x1f   :  { %15 = sbr.rel (!%p13_p4) target bundleno = 2 (0x2), region = 76 }

// kernel: varnoise_forward.63
= control target key start
LH: loop header
LB: loop body
LE: loop exit
PB: predicated region body
PF: predicated region fallthrough
CT: control target
= control target key end

     0   :  { %s456_s20 = smov 0   ;;  %s488_s0 = inlined_call_operand.vmem [shape: f32[4,2,16,16], index: 0, kind: input, shape index: {}, may-alias: {0,5}]   ;;  %s489_s1 = inlined_call_operand.vmem [shape: f32[4,2,16,16], index: 1, kind: input, shape index: {}]   ;;  %s490_s2 = inlined_call_operand.vmem [shape: f32[4,2,16,16], index: 2, kind: input, shape index: {}]   ;;  %s491_s3 = inlined_call_operand.vmem [shape: f32[1,1,1,16], index: 3, kind: input, shape index: {}]   ;;  %s492_s4 = inlined_call_operand.<no memory space> [shape: f32[1], index: 4, kind: input, shape index: {}]   ;;  %s493_s5 = inlined_call_operand.vmem [shape: f32[4,2,16,16], index: 5, kind: output, shape index: {}, may-alias: {0,5}]  }
   0x1   :  { %10 = sst [smem:[#allocation2]] %s492_s4 }
   0x2 LB: > { %s388_s21 = sadd.s32 4294967295, %s421_s20   ;;  %p392_p0 = scmp.ge.s32.totalorder %s421_s20, 1  ;;  %s421_s20 = sphi %s456_s20, %s16_s20  }
   0x3   : > { %p208_p1 = scmp.lt.s32.totalorder %s421_s20, 5 }
   0x5   : > { %p209_p2 = pnand %p392_p0, %p208_p1 }
   0x6   : > { %p246_p3 = scmp.lt.s32.totalorder (!%p209_p2), %s388_s21, 3  ;;  %s267_s22 = sld [smem:[#allocation2]] (!%p209_p2) }
   0x7   : > { %212 = sbr.rel (%p209_p2) target bundleno = 28 (0x1c), region = 40 }
   0xc   : > { %v283_v0 = vlaneseq  ;;  %s495_s21 = smov (!%p246_p3, %s388_s21), 3  ;;  %v266_v2 = vld [vmem:[%s491_s3] sm:$0x1]  ;;  %v268_v4 = vstv %s267_s22  ;;  %vm304_vm0 = vcmask 130048  }
   0xd   : > { %s464_s4 = sshll.u32 %s495_s21, 5  ;;  %v269_v8 = vmul.f32 %v268_v4, %v266_v2 }
   0xe   : > { %v284_v1 = vshrl.u32 %v283_v0, 7  ;;  %s250_s27 = scalar_lea.vmem %s488_s0, %s464_s4  ;;  %s255_s30 = scalar_lea.vmem %s489_s1, %s464_s4 }
   0xf   : > { %v270_v5 = vld [vmem:[%s250_s27] sm:$0xff]  ;;  %v271_v6 = vld [vmem:[%s250_s27 + $0x8] sm:$0xff]  ;;  %v272_v7 = vld [vmem:[%s250_s27 + $0x10] sm:$0xff]  ;;  %s260_s8 = scalar_lea.vmem %s490_s2, %s464_s4  ;;  %s265_s11 = scalar_lea.vmem %s493_s5, %s464_s4 }
  0x10   : > { %v285_v3 = vsub.s32 0, %v284_v1  ;;  %v273_v9 = vld [vmem:[%s250_s27 + $0x18] sm:$0xff]  ;;  %v274_v10 = vld [vmem:[%s255_s30] sm:$0xff]  ;;  %v275_v11 = vld [vmem:[%s255_s30 + $0x8] sm:$0xff] }
  0x11   : > { %v276_v12 = vld [vmem:[%s255_s30 + $0x10] sm:$0xff]  ;;  %v277_v13 = vld [vmem:[%s255_s30 + $0x18] sm:$0xff]  ;;  %v278_v14 = vsub.f32 %v270_v5, %v274_v10  ;;  %v279_v15 = vsub.f32 %v271_v6, %v275_v11  ;;  %v296_v23 = vld [vmem:[%s260_s8] sm:$0xff] }
  0x12   : > { %v280_v16 = vsub.f32 %v272_v7, %v276_v12  ;;  %v281_v17 = vsub.f32 %v273_v9, %v277_v13  ;;  %v286_v18 = vrot.slane %v269_v8, %v285_v3  ;;  %v297_v24 = vld [vmem:[%s260_s8 + $0x8] sm:$0xff]  ;;  %v298_v25 = vld [vmem:[%s260_s8 + $0x10] sm:$0xff]  ;;  %v299_v26 = vld [vmem:[%s260_s8 + $0x18] sm:$0xff] }
  0x14   : > { %v288_v19 = vmul.f32 %v286_v18, %v278_v14  ;;  %v289_v20 = vmul.f32 %v286_v18, %v279_v15  ;;  %v290_v21 = vmul.f32 %v286_v18, %v280_v16  ;;  %v291_v22 = vmul.f32 %v286_v18, %v281_v17 }
  0x16   : > { %v292_v27 = vsub.f32 %v270_v5, %v288_v19  ;;  %v293_v28 = vsub.f32 %v271_v6, %v289_v20  ;;  %v294_v29 = vsub.f32 %v272_v7, %v290_v21  ;;  %v295_v30 = vsub.f32 %v273_v9, %v291_v22 }
  0x18   : > { %v300_v31 = vsub.f32 %v292_v27, %v296_v23  ;;  %v301_v32 = vsub.f32 %v293_v28, %v297_v24  ;;  %v302_v33 = vsub.f32 %v294_v29, %v298_v25  ;;  %v303_v34 = vsub.f32 %v295_v30, %v299_v26 }
  0x1a   : > { %305 = vst.msk [vmem:[%s265_s11] sm:$0xff] %vm304_vm0, %v300_v31  ;;  %306 = vst.msk [vmem:[%s265_s11 + $0x8] sm:$0xff] %vm304_vm0, %v301_v32 }
  0x1b   : > { %307 = vst.msk [vmem:[%s265_s11 + $0x10] sm:$0xff] %vm304_vm0, %v302_v33  ;;  %308 = vst.msk [vmem:[%s265_s11 + $0x18] sm:$0xff] %vm304_vm0, %v303_v34 }
  0x1c PF: > { %s16_s20 = sadd.s32 1, %s421_s20  }
  0x1d   : > { %p13_p4 = scmp.ge.s32.totalorder %s16_s20, 6  }
  0x1f   :  { %15 = sbr.rel (!%p13_p4) target bundleno = 2 (0x2), region = 76 }

// kernel: varnoise_forward.104
= control target key start
LH: loop header
LB: loop body
LE: loop exit
PB: predicated region body
PF: predicated region fallthrough
CT: control target
= control target key end

     0   :  { %s216_s6 = smov 0   ;;  %s251_s0 = inlined_call_operand.vmem [shape: f32[4,2,256], index: 0, kind: input, shape index: {}]   ;;  %s252_s1 = inlined_call_operand.vmem [shape: f32[1,256], index: 1, kind: output, shape index: {}]  }
   0x1 LB: > { %s222_s7 = sadd.s32 4294967295, %s202_s6   ;;  %p176_p0 = scmp.ge.s32.totalorder %s202_s6, 1  ;;  %s202_s6 = sphi %s216_s6, %s11_s6  }
   0x2   : > { %p82_p1 = scmp.lt.s32.totalorder %s202_s6, 5 }
   0x4   : > { %p83_p2 = pnand %p176_p0, %p82_p1 }
   0x5   : > { %p97_p3 = scmp.lt.s32.totalorder (!%p83_p2), %s222_s7, 3  ;;  %p179_p4 = scmp.ne.s32.totalorder (!%p83_p2), %s222_s7, 0 }
   0x6   : > { %86 = sbr.rel (%p83_p2) target bundleno = 61 (0x3d), region = 24 }
   0xb   : > { %s98_s8 = scalar_select %p97_p3, %s222_s7, 3 }
   0xc   : > { %105 = sbr.rel (%p179_p4) target bundleno = 21 (0x15), region = 28 }
   0xd   : > { %s183_s9 = sshll.u32 %s98_s8, 2 }
   0xe   : > { %s101_s12 = scalar_lea.vmem %s251_s0, %s183_s9 }
  0x11   : > { %v106_v0 = vlaneseq  ;;  %v204_v1 = vmov 0.0  }
  0x13   : > { %vm108_vm0 = vcmp.lt.s32.totalorder %v106_v0, 256 }
  0x14   : > { %110 = vst.msk [vmem:[%s252_s1] sm:$0x3] %vm108_vm0, %v204_v1 }
  0x15 PF: > { %v111_v2 = vld [vmem:[%s101_s12] sm:$0xf]  ;;  %v118_v3 = vlaneseq  ;;  %v205_v4 = vmov 1966171168   ;;  %p180_p5 = scmp.ne.s32.totalorder %s222_s7, 3 }
  0x16   : > { %v116_v5 = vunpack.c.l.s4 %v205_v4  ;;  %v113_v7 = vmul.f32 %v111_v2, %v111_v2 }
  0x17   : > { %v119_v6 = vshrl.u32 %v118_v3, 7  ;;  %vm129_vm1 = vcmp.lt.s32.totalorder %v118_v3, 256 }
  0x18   : > { %v117_v8 = vunpack.c.0.s8 %v116_v5 }
  0x1a   : > { %v120_v9 = vsub.s32 %v117_v8, %v119_v6 }
  0x1b   : > { %v112_v10 = vld [vmem:[%s252_s1] sm:$0x3] }
  0x1c   : > { %v121_v11 = vrot.slane %v113_v7, %v120_v9 }
  0x1e   : > { %v123_v12 = vadd.f32 %v121_v11, %v112_v10  ;;  %v124_v13 = vcombine.high %v121_v11, %v121_v11  ;;  %135 = sbr.rel (%p180_p5) target bundleno = 61 (0x3d), region = 32 }
  0x20   : > { %v126_v14 = vadd.f32 %v124_v13, %v123_v12 }
  0x22   : > { %131 = vst.msk [vmem:[%s252_s1] sm:$0x3] %vm129_vm1, %v126_v14 }
  0x29   : > { %v136_v15 = vld [vmem:[%s252_s1] sm:$0x3] }
  0x2a   : > { %194 = vrsqrt.f32 %v136_v15  ;;  %vm139_vm2 = vcmp.eq.f32.partialorder %v136_v15, inf  ;;  %v142_v17 = vand.u32 2147483648, %v136_v15  ;;  %vm141_vm3 = vcmp.eq.f32.partialorder %v136_v15, 0.0 }
  0x37   : > { %v195_v16 = vpop.eup %194 }
  0x38   : > { %v138_v18 = vmul.f32 %v195_v16, %v136_v15 }
  0x3a   : > { %v140_v19 = vsel %vm139_vm2, %v136_v15, %v138_v18 }
  0x3b   : > { %v143_v20 = vsel %vm141_vm3, %v142_v17, %v140_v19 }
  0x3c   : > { %144 = vst.msk [vmem:[%s252_s1] sm:$0x3] %vm129_vm1, %v143_v20 }
  0x3d PF: > { %s11_s6 = sadd.s32 1, %s202_s6  }
  0x3e   : > { %p8_p6 = scmp.ge.s32.totalorder %s11_s6, 6  }
  0x40   :  { %10 = sbr.rel (!%p8_p6) target bundleno = 1 (0x1), region = 58 }

// kernel: varnoise_forward.105
= control target key start
LH: loop header
LB: loop body
LE: loop exit
PB: predicated region body
PF: predicated region fallthrough
CT: control target
= control target key end

     0   :  { %v33_v0 = vlaneseq  ;;  %s879_s29 = smov 15   ;;  %s880_s30 = smov 16   ;;  %v886_v7 = vmov 0   ;;  %v888_v22 = vmov 0.0   ;;  %vm197_vm7 = vcmask 1040384   ;;  %s1323_s0 = inlined_call_operand.vmem [shape: f32[1,256], index: 0, kind: input, shape index: {}]   ;;  %s1324_s3 = inlined_call_operand.vmem [shape: f32[8,1], index: 3, kind: input, shape index: {}]   ;;  %s1325_s1 = inlined_call_operand.vmem [shape: f32[2,256], index: 1, kind: input, shape index: {}]   ;;  %s1326_s2 = inlined_call_operand.vmem [shape: bf16[1,8,9], index: 2, kind: input, shape index: {}]   ;;  %s1327_s5 = inlined_call_operand.vmem [shape: f32[8,1], index: 5, kind: input, shape index: {}]   ;;  %s1328_s4 = inlined_call_operand.vmem [shape: bf16[3,8,24], index: 4, kind: input, shape index: {}]   ;;  %s1329_s7 = inlined_call_operand.<no memory space> [shape: f32[1,1], index: 7, kind: input, shape index: {}]   ;;  %s1330_s6 = inlined_call_operand.vmem [shape: bf16[3,1,24], index: 6, kind: input, shape index: {}]   ;;  %s1331_s8 = inlined_call_operand.vmem [shape: f32[1,256], index: 8, kind: output, shape index: {}]  }
   0x1   :  { %v77_v2 = vld [vmem:[%s1323_s0] sm:$0x3]  ;;  %s881_s0 = smov 17   ;;  %s882_s9 = smov 1   ;;  %271 = vmatprep.mubr.bf16.mxu0 %v886_v7  ;;  %877 = vset.pattern.permute.xlu0 %v886_v7  ;;  %vm200_vm8 = vcmask 1041408   ;;  %vm203_vm10 = vcmask 1042432  }
   0x2   :  { %v937_v1 = vshrl.u32 %v33_v0, 7  ;;  %s883_s10 = smov 127   ;;  %s884_s11 = smov 113   ;;  %407 = vmatprep.mubr.bf16.mxu1 %v886_v7  ;;  %878 = vset.pattern.permute.xlu1 %v886_v7  ;;  %v221_v8 = vld [vmem:[%s1324_s3] sm:$0xff]  ;;  %v994_v11 = vand.u32 127, %v33_v0  ;;  %vm206_vm11 = vcmask 1043456  }
   0x3   :  { %s885_s12 = smov 112   ;;  %s887_s13 = smov 111   ;;  %v32_v14 = vld [vmem:[%s1325_s1] sm:$0xf]  ;;  %vm209_vm13 = vcmask 1044480   ;;  %vm212_vm14 = vcmask 1045504  }
   0x4   :  { %v943_v3 = vsub.s32 0, %v937_v1  ;;  %v946_v4 = vsub.s32 1, %v937_v1  ;;  %vm36_vm0 = vcmp.ge.s32.totalorder %v994_v11, 16  ;;  %v67_v15 = vsub.s32 3, %v937_v1 }
   0x5   :  { %vm102_vm1 = vcmp.lt.s32.totalorder %v994_v11, 16  ;;  %v55_v17 = vsub.s32 2, %v937_v1  ;;  %v35_v21 = vadd.s32 128, %v994_v11  ;;  %v1010_v23 = vsel %vm36_vm0, 1.0, %v888_v22 }
   0x6   :  { %v949_v5 = vrot.slane %v77_v2, %v943_v3  ;;  %v956_v6 = vrot.slane %v77_v2, %v946_v4  ;;  %v1003_v16 = vrot.slane %v32_v14, %v943_v3  ;;  %v1007_v18 = vrot.slane %v32_v14, %v946_v4 }
   0x7   :  { %vm111_vm2 = vcmp.lt.s32.totalorder %v994_v11, 15  ;;  %vm93_vm3 = vcmp.lt.s32.totalorder %v994_v11, 17  ;;  %vm120_vm4 = vcmp.lt.s32.totalorder %v994_v11, 1  ;;  %v1017_v25 = vrot.slane %v32_v14, %v67_v15 }
   0x8   :  { %107 = vrot.lane.b32.xlu1 %v949_v5, %s879_s29  ;;  %98 = vrot.lane.b32.xlu0 %v949_v5, %s880_s30  ;;  %v1019_v26 = vrot.slane %v32_v14, %v55_v17  ;;  %v1023_v27 = vmul.f32 %v1010_v23, %v1003_v16  ;;  %v1027_v28 = vmul.f32 %v1010_v23, %v1007_v18  ;;  %vm43_vm5 = vcmp.lt.s32.totalorder %v35_v21, 240 }
   0x9   :  { %vm129_vm6 = vcmp.lt.s32.totalorder %v994_v11, 127  ;;  %v1047_v41 = vsel %vm43_vm5, 1.0, %v888_v22  ;;  %vm138_vm9 = vcmp.lt.s32.totalorder %v994_v11, 113  ;;  %vm147_vm12 = vcmp.lt.s32.totalorder %v994_v11, 112 }
   0xa   :  { %v1059_v52 = vmul.f32 %v1047_v41, %v1019_v26  ;;  %vm156_vm15 = vcmp.lt.s32.totalorder %v994_v11, 111  ;;  %vm215_vm0 = vcmask 1046528   ;;  %vm227_vm5 = vcmask 72704  }
   0xc   :  { %109 = vrot.lane.b32.xlu1 %v956_v6, %s879_s29  ;;  %100 = vrot.lane.b32.xlu0 %v956_v6, %s880_s30 }
  0x10   :  { %91 = vrot.lane.b32.xlu1 %v956_v6, %s881_s0  ;;  %89 = vrot.lane.b32.xlu0 %v949_v5, %s881_s0 }
  0x14   :  { %118 = vrot.lane.b32.xlu1 %v956_v6, %s882_s9  ;;  %116 = vrot.lane.b32.xlu0 %v949_v5, %s882_s9 }
  0x18   :  { %127 = vrot.lane.b32.xlu1 %v956_v6, %s883_s10  ;;  %125 = vrot.lane.b32.xlu0 %v949_v5, %s883_s10 }
  0x1c   :  { %136 = vrot.lane.b32.xlu1 %v956_v6, %s884_s11  ;;  %134 = vrot.lane.b32.xlu0 %v949_v5, %s884_s11 }
  0x20   :  { %145 = vrot.lane.b32.xlu1 %v956_v6, %s885_s12  ;;  %143 = vrot.lane.b32.xlu0 %v949_v5, %s885_s12 }
  0x24   :  { %154 = vrot.lane.b32.xlu1 %v956_v6, %s887_s13  ;;  %152 = vrot.lane.b32.xlu0 %v949_v5, %s887_s13 }
  0x28   :  { %224 = vperm.xlu0 %877, %v221_v8  }
  0x7a   :  { %v108_v9 = vpop.permute.xlu1 %107  ;;  %v99_v10 = vpop.permute.xlu0 %98 }
  0x7e   :  { %v110_v12 = vpop.permute.xlu1 %109  ;;  %v101_v13 = vpop.permute.xlu0 %100 }
  0x7f   :  { %v104_v24 = vsel %vm102_vm1, %v101_v13, %v99_v10  ;;  %v113_v29 = vsel %vm111_vm2, %v110_v12, %v108_v9  ;;  %v112_v37 = vsel %vm111_vm2, %v108_v9, %v110_v12  ;;  %v103_v38 = vsel %vm102_vm1, %v99_v10, %v101_v13 }
  0x80   :  { %v105_v33 = vmul.f32 %v1010_v23, %v104_v24  ;;  %v114_v42 = vmul.f32 %v113_v29, %v1027_v28  ;;  %v115_v47 = vmul.f32 %v112_v37, %v1017_v25  ;;  %v164_v51 = vrot.slane %v103_v38, 7 }
  0x82   :  { %v92_v19 = vpop.permute.xlu1 %91  ;;  %v90_v20 = vpop.permute.xlu0 %89  ;;  %v163_v48 = vrot.slane %v105_v33, 7  ;;  %v169_v56 = vrot.slane %v114_v42, 6  ;;  %v170_v62 = vrot.slane %v115_v47, 6 }
  0x83   :  { %v95_v30 = vsel %vm93_vm3, %v92_v19, %v90_v20  ;;  %v94_v34 = vsel %vm93_vm3, %v90_v20, %v92_v19 }
  0x84   :  { %v96_v39 = vmul.f32 %v95_v30, %v1023_v27  ;;  %v97_v43 = vmul.f32 %v94_v34, %v1019_v26 }
  0x86   :  { %v119_v31 = vpop.permute.xlu1 %118  ;;  %v117_v32 = vpop.permute.xlu0 %116  ;;  %v198_v53 = vsel %vm197_vm7, %v96_v39, %v163_v48  ;;  %v199_v57 = vsel %vm197_vm7, %v97_v43, %v164_v51  ;;  %vm365_vm7 = vcmask 195584  }
  0x87   :  { %v121_v35 = vsel %vm120_vm4, %v117_v32, %v119_v31  ;;  %v122_v36 = vsel %vm120_vm4, %v119_v31, %v117_v32  ;;  %v201_v8 = vsel %vm200_vm8, %v198_v53, %v169_v56  ;;  %v202_v12 = vsel %vm200_vm8, %v199_v57, %v170_v62 }
  0x88   :  { %v123_v40 = vmul.f32 %v122_v36, %v1003_v16  ;;  %v124_v44 = vmul.f32 %v121_v35, %v1019_v26  ;;  %v1084_v31 = vmul.f32 %v1047_v41, %v1017_v25 }
  0x8a   :  { %v128_v45 = vpop.permute.xlu1 %127  ;;  %v126_v46 = vpop.permute.xlu0 %125  ;;  %v175_v54 = vrot.slane %v123_v40, 5  ;;  %v176_v58 = vrot.slane %v124_v44, 5  ;;  %v889_v40 = vmov 65535  }
  0x8b   :  { %v130_v49 = vsel %vm129_vm6, %v126_v46, %v128_v45  ;;  %v131_v50 = vsel %vm129_vm6, %v128_v45, %v126_v46  ;;  %v231_v42 = vsel %vm206_vm11, 4294967295, %v889_v40 }
  0x8c   :  { %v132_v55 = vmul.f32 %v130_v49, %v1007_v18  ;;  %v133_v59 = vmul.f32 %v131_v50, %v1017_v25  ;;  %v204_v13 = vsel %vm203_vm10, %v201_v8, %v175_v54  ;;  %v205_v15 = vsel %vm203_vm10, %v202_v12, %v176_v58  ;;  %v564_v8 = vld [vmem:[%s1327_s5] sm:$0xff] }
  0x8d   :  { %v207_v32 = vsel %vm206_vm11, %v204_v13, %v949_v5  ;;  %v208_v34 = vsel %vm206_vm11, %v205_v15, %v956_v6  ;;  %v232_v48 = vsel %vm209_vm13, %v231_v42, 0  ;;  %v1128_v12 = vrot.slane %v1007_v18, %v946_v4 }
  0x8e   :  { %v137_v60 = vpop.permute.xlu1 %136  ;;  %v135_v61 = vpop.permute.xlu0 %134  ;;  %v181_v14 = vrot.slane %v132_v55, 3  ;;  %v182_v17 = vrot.slane %v133_v59, 3  ;;  %v220_v55 = vld [vmem:[%s1326_s2] sm:$0xf]  ;;  %v1132_v13 = vrot.slane %v1017_v25, %v946_v4 }
  0x8f   :  { %v139_v63 = vsel %vm138_vm9, %v135_v61, %v137_v60  ;;  %v140_v2 = vsel %vm138_vm9, %v137_v60, %v135_v61 }
  0x90   :  { %v141_v9 = vmul.f32 %v139_v63, %v1003_v16  ;;  %v142_v10 = vmul.f32 %v140_v2, %v1059_v52  ;;  %v210_v35 = vsel %vm209_vm13, %v207_v32, %v181_v14  ;;  %v211_v39 = vsel %vm209_vm13, %v208_v34, %v182_v17 }
  0x92   :  { %v187_v19 = vrot.slane %v141_v9, 2  ;;  %v146_v20 = vpop.permute.xlu1 %145  ;;  %v144_v21 = vpop.permute.xlu0 %143  ;;  %v188_v22 = vrot.slane %v142_v10, 2 }
  0x93   :  { %v148_v24 = vsel %vm147_vm12, %v144_v21, %v146_v20  ;;  %v149_v29 = vsel %vm147_vm12, %v146_v20, %v144_v21  ;;  %v1141_v21 = vrot.slane %v1019_v26, %v943_v3  ;;  %v1154_v26 = vrot.slane %v1027_v28, %v943_v3 }
  0x94   :  { %v151_v30 = vmul.f32 %v1047_v41, %v149_v29  ;;  %v193_v33 = vrot.slane %v148_v24, 1  ;;  %v213_v43 = vsel %vm212_vm14, %v210_v35, %v187_v19  ;;  %v214_v6 = vsel %vm212_vm14, %v211_v39, %v188_v22 }
  0x95   :  { %v1145_v22 = vrot.slane %v1003_v16, %v943_v3 }
  0x96   :  { %v194_v36 = vrot.slane %v151_v30, 1  ;;  %v155_v37 = vpop.permute.xlu1 %154  ;;  %v153_v38 = vpop.permute.xlu0 %152  ;;  %v216_v49 = vsel %vm215_vm0, %v213_v43, %v193_v33 }
  0x97   :  { %v157_v5 = vsel %vm156_vm15, %v153_v38, %v155_v37  ;;  %v158_v44 = vsel %vm156_vm15, %v155_v37, %v153_v38  ;;  %v1162_v37 = vrot.slane %v1017_v25, %v943_v3  ;;  %v1172_v25 = vrot.slane %v1007_v18, %v943_v3 }
  0x98   :  { %v159_v45 = vmul.f32 %v157_v5, %v1007_v18  ;;  %v160_v46 = vmul.f32 %v158_v44, %v1084_v31  ;;  %v217_v47 = vsel %vm215_vm0, %v214_v6, %v194_v36  ;;  %v1176_v6 = vrot.slane %v1084_v31, %v943_v3 }
  0x9a   :  { %v219_v50 = vpack.c.bf16 %v160_v46, %v217_v47  ;;  %v218_v51 = vpack.c.bf16 %v159_v45, %v216_v49  ;;  %v849_v45 = vld [vmem:[%s1328_s4 + $0x4] sm:$0xf] }
  0x9c   :  { %v237_v53 = vand.u32 %v232_v48, %v219_v50  ;;  %v234_v54 = vand.u32 %v232_v48, %v218_v51 }
  0x9e   :  { %253 = vmatprep.subr.bf16.mxu0 %v237_v53 }
  0x9f   :  { %254 = vmatpush1.bf16.msra.mxu0 %v234_v54 }
  0xa2   :  { %848 = vmatmul.mubr.msk.bf16.vlgmr.msra.gmra.mxu0 %vm227_vm5, %v220_v55 }
  0xa3   :  { %457 = vmatprep.mubr.bf16.mxu0 %v886_v7  ;;  %v225_v56 = vpop.permute.xlu0 %224 }
 0x162   :  { %v273_v57 = vpop.f32.mrf.mxu0 }
 0x163   :  { %v274_v58 = vadd.f32 %v273_v57, %v225_v56 }
 0x164   :  { %v275_v59 = vpop.f32.mrf.mxu0 }
 0x165   :  { %v280_v60 = vmax.f32 %v274_v58, 0.0  ;;  %v276_v61 = vadd.f32 %v275_v59, %v225_v56  ;;  %v1195_v58 = vrot.slane %v1023_v27, %v943_v3 }
 0x166   :  { %v277_v62 = vpop.f32.mrf.mxu0 }
 0x167   :  { %327 = vrot.lane.b32.xlu0 %v280_v60, %s882_s9  ;;  %343 = vrot.lane.b32.xlu1 %v280_v60, %s883_s10  ;;  %v281_v2 = vmax.f32 %v276_v61, 0.0 }
 0x168   :  { %v278_v63 = vpop.f32.mrf.mxu0 }
 0x16b   :  { %306 = vrot.lane.b32.xlu0 %v280_v60, %s879_s29  ;;  %345 = vrot.lane.b32.xlu1 %v281_v2, %s883_s10 }
 0x16f   :  { %490 = vrot.lane.b32.xlu0 %v280_v60, %s887_s13  ;;  %329 = vrot.lane.b32.xlu1 %v281_v2, %s882_s9 }
 0x173   :  { %282 = vrot.lane.b32.xlu0 %v280_v60, %s881_s0  ;;  %308 = vrot.lane.b32.xlu1 %v281_v2, %s879_s29 }
 0x177   :  { %298 = vrot.lane.b32.xlu0 %v280_v60, %s880_s30  ;;  %492 = vrot.lane.b32.xlu1 %v281_v2, %s887_s13 }
 0x17b   :  { %466 = vrot.lane.b32.xlu0 %v280_v60, %s884_s11  ;;  %284 = vrot.lane.b32.xlu1 %v281_v2, %s881_s0 }
 0x17f   :  { %482 = vrot.lane.b32.xlu0 %v280_v60, %s885_s12  ;;  %300 = vrot.lane.b32.xlu1 %v281_v2, %s880_s30 }
 0x183   :  { %567 = vperm.xlu0 %877, %v564_v8   ;;  %468 = vrot.lane.b32.xlu1 %v281_v2, %s884_s11 }
 0x187   :  { %484 = vrot.lane.b32.xlu1 %v281_v2, %s885_s12 }
 0x1d9   :  { %v328_v9 = vpop.permute.xlu0 %327  ;;  %v344_v10 = vpop.permute.xlu1 %343 }
 0x1dd   :  { %v307_v14 = vpop.permute.xlu0 %306  ;;  %v346_v15 = vpop.permute.xlu1 %345 }
 0x1de   :  { %v347_v17 = vsel %vm129_vm6, %v344_v10, %v346_v15  ;;  %v348_v19 = vsel %vm129_vm6, %v346_v15, %v344_v10 }
 0x1df   :  { %v357_v20 = vmul.f32 %v1128_v12, %v347_v17  ;;  %v358_v4 = vmul.f32 %v1132_v13, %v348_v19  ;;  %v1210_v17 = vrot.slane %v1059_v52, %v943_v3  ;;  %v326_v19 = vld [vmem:[%s1328_s4] sm:$0xf] }
 0x1e1   :  { %v491_v24 = vpop.permute.xlu0 %490  ;;  %v330_v29 = vpop.permute.xlu1 %329  ;;  %v362_v30 = vpack.c.bf16 %v358_v4, %v358_v4  ;;  %v361_v32 = vpack.c.bf16 %v357_v20, %v357_v20 }
 0x1e2   :  { %v331_v33 = vsel %vm120_vm4, %v328_v9, %v330_v29  ;;  %v332_v34 = vsel %vm120_vm4, %v330_v29, %v328_v9 }
 0x1e3   :  { %v341_v35 = vmul.f32 %v1145_v22, %v332_v34  ;;  %v342_v16 = vmul.f32 %v331_v33, %v1141_v21  ;;  %850 = vmatprep.subr.msk.bf16.mxu1 %vm206_vm11, %v362_v30  ;;  %v370_v36 = vsel %vm206_vm11, %v361_v32, 0 }
 0x1e4   :  { %388 = vmatpush1.bf16.msra.mxu1 %v370_v36  ;;  %v854_v36 = vld [vmem:[%s1328_s4 + $0x8] sm:$0xf] }
 0x1e5   :  { %v309_v38 = vpop.permute.xlu1 %308  ;;  %v360_v39 = vpack.c.bf16 %v281_v2, %v342_v16  ;;  %v359_v40 = vpack.c.bf16 %v280_v60, %v341_v35  ;;  %v283_v43 = vpop.permute.xlu0 %282 }
 0x1e6   :  { %v310_v28 = vsel %vm111_vm2, %v307_v14, %v309_v38  ;;  %v311_v42 = vsel %vm111_vm2, %v309_v38, %v307_v14 }
 0x1e7   :  { %v320_v5 = vmul.f32 %v1154_v26, %v311_v42  ;;  %v321_v44 = vmul.f32 %v1162_v37, %v310_v28  ;;  %389 = vmatprep.subr.bf16.mxu1 %v360_v39 }
 0x1e8   :  { %390 = vmatpush1.bf16.msra.mxu1 %v359_v40 }
 0x1e9   :  { %v324_v46 = vpack.c.bf16 %v320_v5, %v320_v5  ;;  %v325_v47 = vpack.c.bf16 %v321_v44, %v321_v44  ;;  %v493_v48 = vpop.permute.xlu1 %492  ;;  %v299_v53 = vpop.permute.xlu0 %298 }
 0x1ea   :  { %v494_v49 = vsel %vm156_vm15, %v491_v24, %v493_v48  ;;  %v495_v18 = vsel %vm156_vm15, %v493_v48, %v491_v24 }
 0x1eb   :  { %v504_v50 = vmul.f32 %v1172_v25, %v494_v49  ;;  %v505_v31 = vmul.f32 %v1176_v6, %v495_v18  ;;  %852 = vmatprep.subr.msk.bf16.mxu0 %vm206_vm11, %v325_v47  ;;  %v420_v51 = vsel %vm206_vm11, %v324_v46, 0  ;;  %851 = vmatmul.mubr.msk.bf16.vlgmr.msra.gmra.mxu1 %vm365_vm7, %v849_v45 }
 0x1ec   :  { %438 = vmatpush1.bf16.msra.mxu0 %v420_v51  ;;  %553 = vmatprep.mubr.bf16.mxu1 %v886_v7 }
 0x1ed   :  { %v508_v54 = vpack.c.bf16 %v504_v50, %v504_v50  ;;  %v509_v55 = vpack.c.bf16 %v505_v31, %v505_v31  ;;  %v285_v56 = vpop.permute.xlu1 %284  ;;  %v467_v8 = vpop.permute.xlu0 %466 }
 0x1ee   :  { %v286_v57 = vsel %vm93_vm3, %v283_v43, %v285_v56  ;;  %v287_v60 = vsel %vm93_vm3, %v285_v56, %v283_v43 }
 0x1ef   :  { %855 = vmatprep.subr.msk.bf16.mxu1 %vm206_vm11, %v509_v55  ;;  %v516_v59 = vsel %vm206_vm11, %v508_v54, 0  ;;  %v297_v61 = vmul.f32 %v1141_v21, %v286_v57  ;;  %v296_v27 = vmul.f32 %v1195_v58, %v287_v60  ;;  %v13_v57 = vstv %s1329_s7 }
 0x1f0   :  { %534 = vmatpush1.bf16.msra.mxu1 %v516_v59  ;;  %14 = vst [vmem:[#allocation2] sm:$0x1] %v13_v57 }
 0x1f1   :  { %v301_v62 = vpop.permute.xlu1 %300  ;;  %v483_v4 = vpop.permute.xlu0 %482 }
 0x1f2   :  { %v302_v63 = vsel %vm102_vm1, %v299_v53, %v301_v62  ;;  %v303_v2 = vsel %vm102_vm1, %v301_v62, %v299_v53 }
 0x1f3   :  { %v304_v9 = vmul.f32 %v1010_v23, %v303_v2  ;;  %v323_v10 = vpack.c.bf16 %v302_v63, %v297_v61 }
 0x1f5   :  { %v322_v14 = vpack.c.bf16 %v304_v9, %v296_v27  ;;  %439 = vmatprep.subr.bf16.mxu0 %v323_v10  ;;  %v469_v15 = vpop.permute.xlu1 %468 }
 0x1f6   :  { %v471_v20 = vsel %vm138_vm9, %v469_v15, %v467_v8  ;;  %v470_v24 = vsel %vm138_vm9, %v467_v8, %v469_v15 }
 0x1f7   :  { %440 = vmatpush1.bf16.msra.mxu0 %v322_v14  ;;  %v481_v52 = vmul.f32 %v1210_v17, %v471_v20  ;;  %v480_v34 = vmul.f32 %v470_v24, %v1145_v22  ;;  %v807_v59 = vld [vmem:[#allocation2] sm:$0x1] }
 0x1f9   :  { %v485_v29 = vpop.permute.xlu1 %484 }
 0x1fa   :  { %v487_v30 = vsel %vm147_vm12, %v485_v29, %v483_v4  ;;  %853 = vmatmul.mubr.msk.bf16.vlgmr.msra.gmra.mxu0 %vm365_vm7, %v326_v19  ;;  %v486_v32 = vsel %vm147_vm12, %v483_v4, %v485_v29 }
 0x1fb   :  { %v489_v33 = vmul.f32 %v1047_v41, %v487_v30  ;;  %666 = vmatprep.mubr.bf16.mxu0 %v886_v7  ;;  %v506_v16 = vpack.c.bf16 %v486_v32, %v480_v34 }
 0x1fd   :  { %v507_v35 = vpack.c.bf16 %v489_v33, %v481_v52 }
 0x1fe   :  { %v568_v49 = vpop.permute.xlu0 %567 }
 0x1ff   :  { %535 = vmatprep.subr.bf16.mxu1 %v507_v35 }
 0x200   :  { %536 = vmatpush1.bf16.msra.mxu1 %v506_v16  ;;  %v857_v16 = vld [vmem:[%s1330_s6 + $0x1] sm:$0x1] }
 0x203   :  { %856 = vmatmul.mubr.msk.bf16.vlgmr.msra.gmra.mxu1 %vm365_vm7, %v854_v36 }
 0x204   :  { %716 = vmatprep.mubr.bf16.mxu1 %v886_v7 }
 0x2ab   :  { %v409_v38 = vpop.f32.mrf.mxu1 }
 0x2ad   :  { %v411_v39 = vpop.f32.mrf.mxu1 }
 0x2af   :  { %v413_v40 = vpop.f32.mrf.mxu1 }
 0x2b1   :  { %v414_v28 = vpop.f32.mrf.mxu1 }
 0x2ba   :  { %v459_v42 = vpop.f32.mrf.mxu0 }
 0x2bb   :  { %v460_v45 = vadd.f32 %v459_v42, %v409_v38 }
 0x2bc   :  { %v461_v43 = vpop.f32.mrf.mxu0 }
 0x2bd   :  { %v462_v47 = vadd.f32 %v461_v43, %v411_v39 }
 0x2be   :  { %v463_v5 = vpop.f32.mrf.mxu0 }
 0x2c0   :  { %v464_v44 = vpop.f32.mrf.mxu0 }
 0x2c3   :  { %v555_v46 = vpop.f32.mrf.mxu1 }
 0x2c4   :  { %v562_v48 = vadd.f32 %v555_v46, %v460_v45 }
 0x2c5   :  { %v557_v18 = vpop.f32.mrf.mxu1 }
 0x2c6   :  { %v570_v50 = vadd.f32 %v568_v49, %v562_v48  ;;  %v563_v31 = vadd.f32 %v557_v18, %v462_v47 }
 0x2c7   :  { %v559_v51 = vpop.f32.mrf.mxu1 }
 0x2c8   :  { %v572_v53 = vmax.f32 %v570_v50, 0.0  ;;  %v571_v54 = vadd.f32 %v568_v49, %v563_v31 }
 0x2c9   :  { %v560_v55 = vpop.f32.mrf.mxu1 }
 0x2ca   :  { %v573_v56 = vmax.f32 %v571_v54, 0.0  ;;  %611 = vrot.lane.b32.xlu1 %v572_v53, %s883_s10 }
 0x2cc   :  { %613 = vrot.lane.b32.xlu0 %v573_v56, %s883_s10 }
 0x2ce   :  { %603 = vrot.lane.b32.xlu1 %v572_v53, %s882_s9 }
 0x2d0   :  { %605 = vrot.lane.b32.xlu0 %v573_v56, %s882_s9 }
 0x2d2   :  { %590 = vrot.lane.b32.xlu1 %v572_v53, %s879_s29 }
 0x2d4   :  { %592 = vrot.lane.b32.xlu0 %v573_v56, %s879_s29 }
 0x2d6   :  { %741 = vrot.lane.b32.xlu1 %v572_v53, %s887_s13 }
 0x2d8   :  { %743 = vrot.lane.b32.xlu0 %v573_v56, %s887_s13 }
 0x2da   :  { %574 = vrot.lane.b32.xlu1 %v572_v53, %s881_s0 }
 0x2dc   :  { %576 = vrot.lane.b32.xlu0 %v573_v56, %s881_s0 }
 0x2de   :  { %582 = vrot.lane.b32.xlu1 %v572_v53, %s880_s30 }
 0x2e0   :  { %584 = vrot.lane.b32.xlu0 %v573_v56, %s880_s30 }
 0x2e2   :  { %725 = vrot.lane.b32.xlu1 %v572_v53, %s884_s11 }
 0x2e4   :  { %727 = vrot.lane.b32.xlu0 %v573_v56, %s884_s11 }
 0x2e6   :  { %733 = vrot.lane.b32.xlu1 %v572_v53, %s885_s12 }
 0x2e8   :  { %735 = vrot.lane.b32.xlu0 %v573_v56, %s885_s12 }
 0x2ea   :  { %810 = vperm.xlu1 %878, %v807_v59  }
 0x33c   :  { %v612_v60 = vpop.permute.xlu1 %611 }
 0x33e   :  { %v614_v61 = vpop.permute.xlu0 %613 }
 0x33f   :  { %v615_v62 = vsel %vm129_vm6, %v612_v60, %v614_v61  ;;  %v616_v63 = vsel %vm129_vm6, %v614_v61, %v612_v60 }
 0x340   :  { %v617_v2 = vmul.f32 %v615_v62, %v1128_v12  ;;  %v618_v8 = vmul.f32 %v616_v63, %v1132_v13  ;;  %v604_v27 = vpop.permute.xlu1 %603 }
 0x342   :  { %v621_v9 = vpack.c.bf16 %v617_v2, %v617_v2  ;;  %v622_v10 = vpack.c.bf16 %v618_v8, %v618_v8  ;;  %v606_v14 = vpop.permute.xlu0 %605 }
 0x343   :  { %v607_v15 = vsel %vm120_vm4, %v604_v27, %v606_v14  ;;  %v608_v19 = vsel %vm120_vm4, %v606_v14, %v604_v27  ;;  %v862_v27 = vld [vmem:[%s1330_s6 + $0x2] sm:$0x1] }
 0x344   :  { %v609_v20 = vmul.f32 %v608_v19, %v1145_v22  ;;  %v610_v4 = vmul.f32 %v607_v15, %v1141_v21  ;;  %v591_v24 = vpop.permute.xlu1 %590  ;;  %858 = vmatprep.subr.msk.bf16.mxu0 %vm206_vm11, %v622_v10  ;;  %v629_v12 = vsel %vm206_vm11, %v621_v9, 0 }
 0x345   :  { %647 = vmatpush1.bf16.msra.mxu0 %v629_v12 }
 0x346   :  { %v619_v13 = vpack.c.bf16 %v572_v53, %v609_v20  ;;  %v593_v29 = vpop.permute.xlu0 %592  ;;  %v620_v30 = vpack.c.bf16 %v573_v56, %v610_v4  ;;  %v890_v20 = vmov 1966171168  }
 0x347   :  { %v594_v52 = vsel %vm111_vm2, %v591_v24, %v593_v29  ;;  %v595_v32 = vsel %vm111_vm2, %v593_v29, %v591_v24 }
 0x348   :  { %v596_v33 = vmul.f32 %v595_v32, %v1154_v26  ;;  %v597_v34 = vmul.f32 %v594_v52, %v1162_v37  ;;  %v742_v35 = vpop.permute.xlu1 %741  ;;  %648 = vmatprep.subr.bf16.mxu0 %v620_v30 }
 0x349   :  { %649 = vmatpush1.bf16.msra.mxu0 %v619_v13 }
 0x34a   :  { %v600_v36 = vpack.c.bf16 %v596_v33, %v596_v33  ;;  %v601_v38 = vpack.c.bf16 %v597_v34, %v597_v34  ;;  %v744_v39 = vpop.permute.xlu0 %743 }
 0x34b   :  { %v745_v40 = vsel %vm156_vm15, %v742_v35, %v744_v39  ;;  %v746_v28 = vsel %vm156_vm15, %v744_v39, %v742_v35 }
 0x34c   :  { %v747_v26 = vmul.f32 %v745_v40, %v1172_v25  ;;  %v748_v37 = vmul.f32 %v746_v28, %v1176_v6  ;;  %v575_v42 = vpop.permute.xlu1 %574  ;;  %860 = vmatprep.subr.msk.bf16.mxu1 %vm206_vm11, %v601_v38  ;;  %v679_v43 = vsel %vm206_vm11, %v600_v36, 0  ;;  %859 = vmatmul.mubr.msk.bf16.vlgmr.msra.gmra.mxu0 %vm365_vm7, %v857_v16 }
 0x34d   :  { %697 = vmatpush1.bf16.msra.mxu1 %v679_v43  ;;  %796 = vmatprep.mubr.bf16.mxu0 %v886_v7 }
 0x34e   :  { %v751_v5 = vpack.c.bf16 %v747_v26, %v747_v26  ;;  %v752_v44 = vpack.c.bf16 %v748_v37, %v748_v37  ;;  %v577_v45 = vpop.permute.xlu0 %576 }
 0x34f   :  { %v578_v46 = vsel %vm93_vm3, %v575_v42, %v577_v45  ;;  %v579_v6 = vsel %vm93_vm3, %v577_v45, %v575_v42 }
 0x350   :  { %v583_v47 = vpop.permute.xlu1 %582  ;;  %863 = vmatprep.subr.msk.bf16.mxu0 %vm206_vm11, %v752_v44  ;;  %v759_v25 = vsel %vm206_vm11, %v751_v5, 0  ;;  %v581_v48 = vmul.f32 %v578_v46, %v1141_v21  ;;  %v580_v50 = vmul.f32 %v579_v6, %v1195_v58  ;;  %v602_v21 = vld [vmem:[%s1330_s6] sm:$0x1] }
 0x351   :  { %777 = vmatpush1.bf16.msra.mxu0 %v759_v25 }
 0x352   :  { %v585_v49 = vpop.permute.xlu0 %584 }
 0x353   :  { %v586_v7 = vsel %vm102_vm1, %v583_v47, %v585_v49  ;;  %v587_v18 = vsel %vm102_vm1, %v585_v49, %v583_v47  ;;  %vm839_vm1 = vcmp.lt.s32.totalorder %v33_v0, 256 }
 0x354   :  { %v588_v31 = vmul.f32 %v1010_v23, %v587_v18  ;;  %v599_v51 = vpack.c.bf16 %v586_v7, %v581_v48  ;;  %v726_v53 = vpop.permute.xlu1 %725 }
 0x356   :  { %v598_v54 = vpack.c.bf16 %v588_v31, %v580_v50  ;;  %698 = vmatprep.subr.bf16.mxu1 %v599_v51  ;;  %v728_v55 = vpop.permute.xlu0 %727 }
 0x357   :  { %v730_v56 = vsel %vm138_vm9, %v728_v55, %v726_v53  ;;  %v729_v57 = vsel %vm138_vm9, %v726_v53, %v728_v55 }
 0x358   :  { %699 = vmatpush1.bf16.msra.mxu1 %v598_v54  ;;  %v734_v59 = vpop.permute.xlu1 %733  ;;  %v732_v60 = vmul.f32 %v730_v56, %v1210_v17  ;;  %v731_v63 = vmul.f32 %v729_v57, %v1145_v22  ;;  %v823_v22 = vunpack.c.l.s4 %v890_v20 }
 0x35a   :  { %v736_v58 = vpop.permute.xlu0 %735  ;;  %v824_v52 = vunpack.c.0.s8 %v823_v22 }
 0x35b   :  { %v738_v23 = vsel %vm147_vm12, %v736_v58, %v734_v59  ;;  %861 = vmatmul.mubr.msk.bf16.vlgmr.msra.gmra.mxu1 %vm365_vm7, %v602_v21  ;;  %v737_v61 = vsel %vm147_vm12, %v734_v59, %v736_v58 }
 0x35c   :  { %v740_v62 = vmul.f32 %v1047_v41, %v738_v23  ;;  %v749_v8 = vpack.c.bf16 %v737_v61, %v731_v63  ;;  %v827_v36 = vsub.s32 %v824_v52, %v937_v1 }
 0x35e   :  { %v750_v2 = vpack.c.bf16 %v740_v62, %v732_v60 }
 0x360   :  { %778 = vmatprep.subr.bf16.mxu0 %v750_v2 }
 0x361   :  { %779 = vmatpush1.bf16.msra.mxu0 %v749_v8 }
 0x364   :  { %864 = vmatmul.mubr.msk.bf16.vlgmr.msra.gmra.mxu0 %vm365_vm7, %v862_v27 }
 0x365   :  { %v811_v4 = vpop.permute.xlu1 %810 }
 0x366   :  { %v816_v29 = vrot.slane %v811_v4, %v943_v3 }
 0x40c   :  { %v668_v9 = vpop.f32.mrf.mxu0 }
 0x40e   :  { %v670_v10 = vpop.f32.mrf.mxu0 }
 0x410   :  { %v672_v17 = vpop.f32.mrf.mxu0 }
 0x412   :  { %v673_v14 = vpop.f32.mrf.mxu0 }
 0x41b   :  { %v718_v11 = vpop.f32.mrf.mxu1 }
 0x41c   :  { %v719_v24 = vadd.f32 %v718_v11, %v668_v9 }
 0x41d   :  { %v720_v15 = vpop.f32.mrf.mxu1 }
 0x41e   :  { %v721_v13 = vadd.f32 %v720_v15, %v670_v10 }
 0x41f   :  { %v722_v19 = vpop.f32.mrf.mxu1 }
 0x421   :  { %v723_v41 = vpop.f32.mrf.mxu1 }
 0x424   :  { %v798_v12 = vpop.f32.mrf.mxu0 }
 0x425   :  { %v805_v30 = vadd.f32 %v798_v12, %v719_v24 }
 0x426   :  { %v800_v32 = vpop.f32.mrf.mxu0 }
 0x427   :  { %v806_v33 = vadd.f32 %v800_v32, %v721_v13  ;;  %v817_v35 = vadd.f32 %v816_v29, %v805_v30 }
 0x428   :  { %v802_v34 = vpop.f32.mrf.mxu0 }
 0x429   :  { %v818_v16 = vadd.f32 %v816_v29, %v806_v33 }
 0x42a   :  { %v803_v38 = vpop.f32.mrf.mxu0 }
 0x42b   :  { %v821_v39 = vcombine.low %v817_v35, %v818_v16 }
 0x42d   :  { %v828_v40 = vrot.slane %v821_v39, %v827_v36 }
 0x42f   :  { %v835_v28 = vrot.slane %v828_v40, %v827_v36 }
 0x431   :  { %841 = vst.msk [vmem:[%s1331_s8] sm:$0x3] %vm839_vm1, %v835_v28 }

</bundles_post_ra>
